<compile_context>
chip_gen: v5e
topology: v5e:2x2
jax: 0.10.0
libtpu: 0.0.40
codegen_flags: <defaults>
</compile_context>

<pallas_src>
import functools

import numpy as np
import jax
import jax.numpy as jnp
from jax.experimental import pallas as pl
from jax.experimental.pallas import tpu as pltpu

EPS = 1e-5  # PyTorch BatchNorm default eps


# ----------------------------------------------------------------------------
# Pallas kernels
# ----------------------------------------------------------------------------
def _l1_matmul_stats_kernel(p_ref, w_ref, y_ref, stat_ref):
    """Per-M-tile: y = patches @ w; emit per-tile channel sum / sum-of-squares."""
    y = jnp.dot(p_ref[...], w_ref[...], preferred_element_type=jnp.float32)
    y_ref[...] = y
    stat_ref[0:1, :] = jnp.sum(y, axis=0, keepdims=True)
    stat_ref[1:2, :] = jnp.sum(y * y, axis=0, keepdims=True)


def l1_matmul_stats(patches, w, *, tm):
    """patches: (Mp, K) zero-padded; w: (K, C). -> (y_raw (Mp, C), partial stats)."""
    Mp, K = patches.shape
    C = w.shape[1]
    n_tiles = Mp // tm
    return pl.pallas_call(
        _l1_matmul_stats_kernel,
        out_shape=(
            jax.ShapeDtypeStruct((Mp, C), jnp.float32),
            jax.ShapeDtypeStruct((n_tiles, 2, C), jnp.float32),
        ),
        grid=(n_tiles,),
        in_specs=[
            pl.BlockSpec((tm, K), lambda i: (i, 0)),
            pl.BlockSpec((K, C), lambda i: (0, 0)),
        ],
        out_specs=(
            pl.BlockSpec((tm, C), lambda i: (i, 0)),
            pl.BlockSpec((None, 2, C), lambda i: (i, 0, 0)),
        ),
        compiler_params=pltpu.CompilerParams(
            dimension_semantics=("parallel",)),
    )(patches, w)


def _l1_bn_relu_kernel(y_ref, stat_ref, bn_ref, o_ref, *, inv_m):
    """Training-mode BatchNorm (batch stats) + ReLU, applied per M-tile."""
    mean = stat_ref[0:1, :] * inv_m
    var = stat_ref[1:2, :] * inv_m - mean * mean
    scale = bn_ref[0:1, :] * jax.lax.rsqrt(var + EPS)
    shift = bn_ref[1:2, :] - mean * scale
    o_ref[...] = jnp.maximum(y_ref[...] * scale + shift, 0.0)


def l1_bn_relu(y_raw, stats, bn, *, m_true, tm):
    Mp, C = y_raw.shape
    kern = functools.partial(_l1_bn_relu_kernel, inv_m=1.0 / float(m_true))
    return pl.pallas_call(
        kern,
        out_shape=jax.ShapeDtypeStruct((Mp, C), jnp.float32),
        grid=(Mp // tm,),
        in_specs=[
            pl.BlockSpec((tm, C), lambda i: (i, 0)),
            pl.BlockSpec((2, C), lambda i: (0, 0)),
            pl.BlockSpec((2, C), lambda i: (0, 0)),
        ],
        out_specs=pl.BlockSpec((tm, C), lambda i: (i, 0)),
        compiler_params=pltpu.CompilerParams(
            dimension_semantics=("parallel",)),
    )(y_raw, stats, bn)


def _tail_kernel(p2_ref, w2_ref, bn2_ref, w3_ref, head_ref, o_ref, *,
                 n_batch, n_sp):
    """Fused tail: layer2 matmul + BN2 + ReLU, fc1 (adaptive pool folded into
    the weights), BN3 + ReLU, fc2.  patches2 rows are ordered (spatial, batch)."""
    # layer2 conv-as-matmul (conv bias dropped: cancels in training-mode BN2)
    y2 = jnp.dot(p2_ref[...], w2_ref[...], preferred_element_type=jnp.float32)
    inv_m2 = 1.0 / float(n_batch * n_sp)
    mean2 = jnp.sum(y2, axis=0, keepdims=True) * inv_m2
    var2 = jnp.sum(y2 * y2, axis=0, keepdims=True) * inv_m2 - mean2 * mean2
    scale2 = bn2_ref[0:1, :] * jax.lax.rsqrt(var2 + EPS)
    shift2 = bn2_ref[1:2, :] - mean2 * scale2
    y2 = jnp.maximum(y2 * scale2 + shift2, 0.0)               # (n_sp*n_batch, C2)

    # fc1 with AdaptiveAvgPool2d folded into the weights (fc1 bias cancels in BN3)
    f = w3_ref.shape[2]
    h = jnp.zeros((n_batch, f), jnp.float32)
    for s in range(n_sp):                                     # static, small (9)
        h = h + jnp.dot(y2[s * n_batch:(s + 1) * n_batch, :], w3_ref[s],
                        preferred_element_type=jnp.float32)

    # BN3 (batch stats over N) + ReLU
    inv_n = 1.0 / float(n_batch)
    mean3 = jnp.sum(h, axis=0, keepdims=True) * inv_n
    var3 = jnp.sum(h * h, axis=0, keepdims=True) * inv_n - mean3 * mean3
    scale3 = head_ref[0:1, :] * jax.lax.rsqrt(var3 + EPS)
    shift3 = head_ref[1:2, :] - mean3 * scale3
    h = jnp.maximum(h * scale3 + shift3, 0.0)

    # fc2: (N, F) -> (N, 1): broadcast-mul + lane reduce + scalar bias
    o_ref[...] = (jnp.sum(h * head_ref[2:3, :], axis=-1, keepdims=True)
                  + head_ref[3:4, 0:1])


def tail_fused(patches2, w2, bn2, w3, head, *, n_batch, n_sp):
    # TODO(synk): if batch grows large enough that patches2 no longer fits VMEM
    # (e.g. v5e's 16 MiB default scoped limit), tile this kernel over the batch.
    M2, K2 = patches2.shape
    C2 = w2.shape[1]
    F = w3.shape[2]
    kern = functools.partial(_tail_kernel, n_batch=n_batch, n_sp=n_sp)
    return pl.pallas_call(
        kern,
        out_shape=jax.ShapeDtypeStruct((n_batch, 1), jnp.float32),
        grid=(1,),
        in_specs=[
            pl.BlockSpec((M2, K2), lambda i: (0, 0)),
            pl.BlockSpec((K2, C2), lambda i: (0, 0)),
            pl.BlockSpec((2, C2), lambda i: (0, 0)),
            pl.BlockSpec((n_sp, C2, F), lambda i: (0, 0, 0)),
            pl.BlockSpec((4, F), lambda i: (0, 0)),
        ],
        out_specs=pl.BlockSpec((n_batch, 1), lambda i: (0, 0)),
        compiler_params=pltpu.CompilerParams(
            dimension_semantics=("arbitrary",)),
    )(patches2, w2, bn2, w3, head)


# ----------------------------------------------------------------------------
# Plain-JAX glue (im2col, pooling, adaptive-pool folding, parameter setup)
# ----------------------------------------------------------------------------
def im2col_nhwc(x, kh, kw, stride, *, row_order="ns"):
    """x: (N, H, W, C) -> patches with (kh, kw, c) feature ordering.
    row_order='ns': rows ordered (n, spatial); 'sn': (spatial, n)."""
    N, H, W, C = x.shape
    oh = (H - kh) // stride + 1
    ow = (W - kw) // stride + 1
    cols = []
    for i in range(kh):
        for j in range(kw):
            cols.append(x[:, i:i + stride * oh:stride, j:j + stride * ow:stride, :])
    p = jnp.stack(cols, axis=3)                       # (N, oh, ow, kh*kw, C)
    p = p.reshape(N, oh * ow, kh * kw * C)
    if row_order == "sn":
        p = p.transpose(1, 0, 2)                      # (oh*ow, N, feat)
    return p.reshape(N * oh * ow, kh * kw * C), oh, ow


def max_pool_nhwc(x, k, s):
    """Non-overlapping max pool (k == s) on NHWC, lane-dense in C."""
    assert k == s  # TODO(synk): overlapping max-pool not needed for this config
    N, H, W, C = x.shape
    oh, ow = (H - k) // s + 1, (W - k) // s + 1
    x = x[:, :oh * s, :ow * s, :].reshape(N, oh, s, ow, s, C)
    return jnp.max(x, axis=(2, 4))


def adaptive_pool_matrix(in_size, out_size):
    """Exact PyTorch AdaptiveAvgPool binning as an (out, in) averaging matrix."""
    P = np.zeros((out_size, in_size), np.float32)
    for i in range(out_size):
        start = (i * in_size) // out_size
        end = -((-(i + 1) * in_size) // out_size)     # ceil
        P[i, start:end] = 1.0 / (end - start)
    return jnp.asarray(P)


def init_params(key):
    ks = jax.random.split(key, 8)
    p = {}
    # layer1: Conv2d(1, 128, k=12, s=2)   (conv biases cancel in training-mode BN;
    # kept in the dict for interface fidelity but not used by the kernels)
    p["w1"] = 0.05 * jax.random.normal(ks[0], (128, 1, 12, 12), jnp.float32)
    p["b1"] = 0.05 * jax.random.normal(ks[1], (128,), jnp.float32)
    p["g1"] = jnp.ones((128,), jnp.float32)
    p["be1"] = jnp.zeros((128,), jnp.float32)
    # layer2: Conv2d(128, 32, k=5, s=2)
    p["w2"] = 0.02 * jax.random.normal(ks[2], (32, 128, 5, 5), jnp.float32)
    p["b2"] = 0.05 * jax.random.normal(ks[3], (32,), jnp.float32)
    p["g2"] = jnp.ones((32,), jnp.float32)
    p["be2"] = jnp.zeros((32,), jnp.float32)
    # fc1: Linear(32*8*8=2048, 32), stored (in, out)
    p["wf1"] = 0.02 * jax.random.normal(ks[4], (2048, 32), jnp.float32)
    p["bf1"] = 0.05 * jax.random.normal(ks[5], (32,), jnp.float32)
    p["g3"] = jnp.ones((32,), jnp.float32)
    p["be3"] = jnp.zeros((32,), jnp.float32)
    # fc2: Linear(32, 1)
    p["wf2"] = 0.1 * jax.random.normal(ks[6], (1, 32), jnp.float32)
    p["bf2"] = 0.05 * jax.random.normal(ks[7], (1,), jnp.float32)
    return p


def mel_cnn_adapt_forward(x, p, *, tm=512):
    """x: (N, 1, H, W) float32 -> (N, 1) float32 (training-mode BatchNorm)."""
    N = x.shape[0]
    x = jnp.transpose(x, (0, 2, 3, 1))                # NHWC (C=1, trivial)

    # --- layer1: Conv2d(1,128,k=12,s=2) + BN1 + ReLU as tiled Pallas kernels ---
    patches1, oh1, ow1 = im2col_nhwc(x, 12, 12, 2, row_order="ns")
    M1, K1 = patches1.shape
    K1p = ((K1 + 127) // 128) * 128                   # pad ragged K (144 -> 256)
    Mp = ((M1 + tm - 1) // tm) * tm                   # pad M to a tile multiple
    patches1 = jnp.pad(patches1, ((0, Mp - M1), (0, K1p - K1)))
    C1 = p["w1"].shape[0]
    w1 = p["w1"].transpose(2, 3, 1, 0).reshape(-1, C1)        # (kh*kw*cin, C1)
    w1 = jnp.pad(w1, ((0, K1p - K1), (0, 0)))

    y_raw, stat_part = l1_matmul_stats(patches1, w1, tm=tm)
    stats = jnp.sum(stat_part, axis=0)                # (2, C1): global sum / sumsq
    bn1 = jnp.stack([p["g1"], p["be1"]], axis=0)      # packed (2, C1)
    y1 = l1_bn_relu(y_raw, stats, bn1, m_true=M1, tm=tm)
    y1 = y1[:M1].reshape(N, oh1, ow1, C1)             # NHWC, no transpose

    # --- MaxPool2d(3, 3)  (XLA glue, channels stay in lanes) ---
    y1p = max_pool_nhwc(y1, 3, 3)

    # --- fused tail: layer2 + BN2 + ReLU + (adapt-pool folded) fc1 + BN3 + ReLU + fc2 ---
    patches2, oh2, ow2 = im2col_nhwc(y1p, 5, 5, 2, row_order="sn")
    C2 = p["w2"].shape[0]
    F = p["wf1"].shape[1]
    w2 = p["w2"].transpose(2, 3, 1, 0).reshape(-1, C2)        # (kh*kw*C1, C2)
    bn2 = jnp.stack([p["g2"], p["be2"]], axis=0)              # (2, C2)

    # Fold AdaptiveAvgPool2d((8,8)) into the fc1 weights (the pool is linear).
    Ph = adaptive_pool_matrix(oh2, 8)                         # (8, oh2)
    Pw = adaptive_pool_matrix(ow2, 8)                         # (8, ow2)
    wf1_r = p["wf1"].reshape(C2, 8, 8, F)                     # (c, i, j, o)
    w3 = jnp.einsum("cijo,ip,jq->pqco", wf1_r, Ph, Pw)        # (oh2, ow2, c, o)
    w3 = w3.reshape(oh2 * ow2, C2, F)

    head = jnp.concatenate([
        p["g3"][None, :], p["be3"][None, :],                  # BN3 gamma / beta
        p["wf2"],                                             # fc2 weight (1, F)
        jnp.pad(p["bf2"], (0, F - 1))[None, :],               # fc2 bias at [3, 0]
    ], axis=0)                                                # (4, F)

    return tail_fused(patches2, w2, bn2, w3, head, n_batch=N, n_sp=oh2 * ow2)


if __name__ == "__main__":
    key = jax.random.PRNGKey(0)
    k_x, k_p = jax.random.split(key)
    # Small input consistent with the module: N=2, C=1, 64x64 mel patch.
    x = jax.random.normal(k_x, (2, 1, 64, 64), jnp.float32)
    params = init_params(k_p)

    out = jax.jit(mel_cnn_adapt_forward)(x, params)
    out = jax.block_until_ready(out)
    assert out.shape == (2, 1) and out.dtype == jnp.float32
    assert bool(jnp.all(jnp.isfinite(out)))
    print("KERNEL_OK")
</pallas_src>

<mosaic_0001>
module attributes {stable_mosaic.version = 11 : i64} {
  func.func @_l1_matmul_stats_kernel(%arg0: i32, %arg1: memref<512x256xf32, #tpu.memory_space<vmem>>, %arg2: memref<256x128xf32, #tpu.memory_space<vmem>>, %arg3: memref<512x128xf32, #tpu.memory_space<vmem>>, %arg4: memref<1x2x128xf32, #tpu.memory_space<vmem>>) attributes {dimension_semantics = [#tpu.dimension_semantics<parallel>], iteration_bounds = array<i64: 3>, scalar_prefetch = 0 : i64, scratch_operands = 0 : i64, tpu.core_type = #tpu.core_type<tc>, window_params = [{transform_indices = @transform_0, window_bounds = array<i64: 512, 256>}, {pipeline_mode = #tpu.pipeline_mode<synchronous>, transform_indices = @transform_1, window_bounds = array<i64: 256, 128>}, {transform_indices = @transform_2, window_bounds = array<i64: 512, 128>}, {transform_indices = @transform_3, window_bounds = array<i64: 1, 2, 128>}]} {
    %c0 = arith.constant 0 : index
    %c0_0 = arith.constant 0 : index
    %0 = vector.load %arg1[%c0, %c0_0] : memref<512x256xf32, #tpu.memory_space<vmem>>, vector<512x256xf32>
    %c0_1 = arith.constant 0 : index
    %c0_2 = arith.constant 0 : index
    %1 = vector.load %arg2[%c0_1, %c0_2] : memref<256x128xf32, #tpu.memory_space<vmem>>, vector<256x128xf32>
    %cst = arith.constant dense<0.000000e+00> : vector<512x128xf32>
    %2 = tpu.matmul %0, %1, %cst {dimension_numbers = #tpu.dot_dimension_numbers<[1], [0], [0], [1], [0, 0, 1, 1], [], []>} : vector<512x256xf32>, vector<256x128xf32>, vector<512x128xf32> -> vector<512x128xf32>
    %c0_3 = arith.constant 0 : index
    %c0_4 = arith.constant 0 : index
    %3 = vector.load %arg3[%c0_3, %c0_4] : memref<512x128xf32, #tpu.memory_space<vmem>>, vector<512x128xf32>
    tpu.vector_store %arg3[%c0_3, %c0_4], %2 {strides = array<i32>} : memref<512x128xf32, #tpu.memory_space<vmem>>, vector<512x128xf32>,
    %cst_5 = arith.constant dense<0.000000e+00> : vector<128xf32>
    %4 = vector.multi_reduction <add>, %2, %cst_5 [0] : vector<512x128xf32> to vector<128xf32>
    %5 = vector.shape_cast %4 : vector<128xf32> to vector<1x128xf32>
    %c0_6 = arith.constant 0 : index
    %c0_7 = arith.constant 0 : index
    %c0_8 = arith.constant 0 : index
    %6 = vector.load %arg4[%c0_6, %c0_7, %c0_8] : memref<1x2x128xf32, #tpu.memory_space<vmem>>, vector<1x1x128xf32>
    %7 = vector.shape_cast %6 : vector<1x1x128xf32> to vector<1x128xf32>
    %8 = vector.shape_cast %5 : vector<1x128xf32> to vector<1x1x128xf32>
    tpu.vector_store %arg4[%c0_6, %c0_7, %c0_8], %8 {strides = array<i32>} : memref<1x2x128xf32, #tpu.memory_space<vmem>>, vector<1x1x128xf32>,
    %9 = arith.mulf %2, %2 : vector<512x128xf32>
    %cst_9 = arith.constant dense<0.000000e+00> : vector<128xf32>
    %10 = vector.multi_reduction <add>, %9, %cst_9 [0] : vector<512x128xf32> to vector<128xf32>
    %11 = vector.shape_cast %10 : vector<128xf32> to vector<1x128xf32>
    %c0_10 = arith.constant 0 : index
    %c1 = arith.constant 1 : index
    %c0_11 = arith.constant 0 : index
    %12 = vector.load %arg4[%c0_10, %c1, %c0_11] : memref<1x2x128xf32, #tpu.memory_space<vmem>>, vector<1x1x128xf32>
    %13 = vector.shape_cast %12 : vector<1x1x128xf32> to vector<1x128xf32>
    %14 = vector.shape_cast %11 : vector<1x128xf32> to vector<1x1x128xf32>
    tpu.vector_store %arg4[%c0_10, %c1, %c0_11], %14 {strides = array<i32>} : memref<1x2x128xf32, #tpu.memory_space<vmem>>, vector<1x1x128xf32>,
    return
  }
  func.func @transform_0(%arg0: i32) -> (i32, i32) {
    %c0_i32 = arith.constant 0 : i32
    %c0_i32_0 = arith.constant 0 : i32
    return %arg0, %c0_i32 : i32, i32
  }
  func.func @transform_1(%arg0: i32) -> (i32, i32) {
    %c0_i32 = arith.constant 0 : i32
    %c0_i32_0 = arith.constant 0 : i32
    %c0_i32_1 = arith.constant 0 : i32
    return %c0_i32, %c0_i32_0 : i32, i32
  }
  func.func @transform_2(%arg0: i32) -> (i32, i32) {
    %c0_i32 = arith.constant 0 : i32
    %c0_i32_0 = arith.constant 0 : i32
    return %arg0, %c0_i32 : i32, i32
  }
  func.func @transform_3(%arg0: i32) -> (i32, i32, i32) {
    %c0_i32 = arith.constant 0 : i32
    %c0_i32_0 = arith.constant 0 : i32
    %c0_i32_1 = arith.constant 0 : i32
    return %arg0, %c0_i32, %c0_i32_0 : i32, i32, i32
  }
}

module attributes {stable_mosaic.version = 11 : i64} {
  func.func @_l1_bn_relu_kernel(%arg0: i32, %arg1: memref<512x128xf32, #tpu.memory_space<vmem>>, %arg2: memref<2x128xf32, #tpu.memory_space<vmem>>, %arg3: memref<2x128xf32, #tpu.memory_space<vmem>>, %arg4: memref<512x128xf32, #tpu.memory_space<vmem>>) attributes {dimension_semantics = [#tpu.dimension_semantics<parallel>], iteration_bounds = array<i64: 3>, scalar_prefetch = 0 : i64, scratch_operands = 0 : i64, tpu.core_type = #tpu.core_type<tc>, window_params = [{transform_indices = @transform_0, window_bounds = array<i64: 512, 128>}, {pipeline_mode = #tpu.pipeline_mode<synchronous>, transform_indices = @transform_1, window_bounds = array<i64: 2, 128>}, {pipeline_mode = #tpu.pipeline_mode<synchronous>, transform_indices = @transform_2, window_bounds = array<i64: 2, 128>}, {transform_indices = @transform_3, window_bounds = array<i64: 512, 128>}]} {
    %c0 = arith.constant 0 : index
    %c0_0 = arith.constant 0 : index
    %0 = vector.load %arg2[%c0, %c0_0] : memref<2x128xf32, #tpu.memory_space<vmem>>, vector<1x128xf32>
    %cst = arith.constant 6.85871055E-4 : f32
    %1 = vector.broadcast %cst : f32 to vector<1x128xf32>
    %2 = arith.mulf %0, %1 : vector<1x128xf32>
    %c1 = arith.constant 1 : index
    %c0_1 = arith.constant 0 : index
    %3 = vector.load %arg2[%c1, %c0_1] : memref<2x128xf32, #tpu.memory_space<vmem>>, vector<1x128xf32>
    %cst_2 = arith.constant 6.85871055E-4 : f32
    %4 = vector.broadcast %cst_2 : f32 to vector<1x128xf32>
    %5 = arith.mulf %3, %4 : vector<1x128xf32>
    %6 = arith.mulf %2, %2 : vector<1x128xf32>
    %7 = arith.subf %5, %6 : vector<1x128xf32>
    %c0_3 = arith.constant 0 : index
    %c0_4 = arith.constant 0 : index
    %8 = vector.load %arg3[%c0_3, %c0_4] : memref<2x128xf32, #tpu.memory_space<vmem>>, vector<1x128xf32>
    %cst_5 = arith.constant 9.99999974E-6 : f32
    %9 = vector.broadcast %cst_5 : f32 to vector<1x128xf32>
    %10 = arith.addf %7, %9 : vector<1x128xf32>
    %11 = math.rsqrt %10 : vector<1x128xf32>
    %12 = arith.mulf %8, %11 : vector<1x128xf32>
    %c1_6 = arith.constant 1 : index
    %c0_7 = arith.constant 0 : index
    %13 = vector.load %arg3[%c1_6, %c0_7] : memref<2x128xf32, #tpu.memory_space<vmem>>, vector<1x128xf32>
    %14 = arith.mulf %2, %12 : vector<1x128xf32>
    %15 = arith.subf %13, %14 : vector<1x128xf32>
    %c0_8 = arith.constant 0 : index
    %c0_9 = arith.constant 0 : index
    %16 = vector.load %arg1[%c0_8, %c0_9] : memref<512x128xf32, #tpu.memory_space<vmem>>, vector<512x128xf32>
    %17 = vector.broadcast %12 : vector<1x128xf32> to vector<512x128xf32>
    %18 = arith.mulf %16, %17 : vector<512x128xf32>
    %19 = vector.broadcast %15 : vector<1x128xf32> to vector<512x128xf32>
    %20 = arith.addf %18, %19 : vector<512x128xf32>
    %cst_10 = arith.constant 0.000000e+00 : f32
    %21 = vector.broadcast %cst_10 : f32 to vector<512x128xf32>
    %22 = arith.maximumf %20, %21 : vector<512x128xf32>
    %c0_11 = arith.constant 0 : index
    %c0_12 = arith.constant 0 : index
    %23 = vector.load %arg4[%c0_11, %c0_12] : memref<512x128xf32, #tpu.memory_space<vmem>>, vector<512x128xf32>
    tpu.vector_store %arg4[%c0_11, %c0_12], %22 {strides = array<i32>} : memref<512x128xf32, #tpu.memory_space<vmem>>, vector<512x128xf32>,
    return
  }
  func.func @transform_0(%arg0: i32) -> (i32, i32) {
    %c0_i32 = arith.constant 0 : i32
    %c0_i32_0 = arith.constant 0 : i32
    return %arg0, %c0_i32 : i32, i32
  }
  func.func @transform_1(%arg0: i32) -> (i32, i32) {
    %c0_i32 = arith.constant 0 : i32
    %c0_i32_0 = arith.constant 0 : i32
    %c0_i32_1 = arith.constant 0 : i32
    return %c0_i32, %c0_i32_0 : i32, i32
  }
  func.func @transform_2(%arg0: i32) -> (i32, i32) {
    %c0_i32 = arith.constant 0 : i32
    %c0_i32_0 = arith.constant 0 : i32
    %c0_i32_1 = arith.constant 0 : i32
    return %c0_i32, %c0_i32_0 : i32, i32
  }
  func.func @transform_3(%arg0: i32) -> (i32, i32) {
    %c0_i32 = arith.constant 0 : i32
    %c0_i32_0 = arith.constant 0 : i32
    return %arg0, %c0_i32 : i32, i32
  }
}

module attributes {stable_mosaic.version = 11 : i64} {
  func.func @_tail_kernel(%arg0: i32, %arg1: memref<18x3200xf32, #tpu.memory_space<vmem>>, %arg2: memref<3200x32xf32, #tpu.memory_space<vmem>>, %arg3: memref<2x32xf32, #tpu.memory_space<vmem>>, %arg4: memref<9x32x32xf32, #tpu.memory_space<vmem>>, %arg5: memref<4x32xf32, #tpu.memory_space<vmem>>, %arg6: memref<2x1xf32, #tpu.memory_space<vmem>>) attributes {dimension_semantics = [#tpu.dimension_semantics<arbitrary>], iteration_bounds = array<i64: 1>, scalar_prefetch = 0 : i64, scratch_operands = 0 : i64, tpu.core_type = #tpu.core_type<tc>, window_params = [{pipeline_mode = #tpu.pipeline_mode<synchronous>, transform_indices = @transform_0, window_bounds = array<i64: 18, 3200>}, {pipeline_mode = #tpu.pipeline_mode<synchronous>, transform_indices = @transform_1, window_bounds = array<i64: 3200, 32>}, {pipeline_mode = #tpu.pipeline_mode<synchronous>, transform_indices = @transform_2, window_bounds = array<i64: 2, 32>}, {pipeline_mode = #tpu.pipeline_mode<synchronous>, transform_indices = @transform_3, window_bounds = array<i64: 9, 32, 32>}, {pipeline_mode = #tpu.pipeline_mode<synchronous>, transform_indices = @transform_4, window_bounds = array<i64: 4, 32>}, {pipeline_mode = #tpu.pipeline_mode<synchronous>, transform_indices = @transform_5, window_bounds = array<i64: 2, 1>}]} {
    %c0 = arith.constant 0 : index
    %c0_0 = arith.constant 0 : index
    %0 = vector.load %arg1[%c0, %c0_0] : memref<18x3200xf32, #tpu.memory_space<vmem>>, vector<18x3200xf32>
    %c0_1 = arith.constant 0 : index
    %c0_2 = arith.constant 0 : index
    %1 = vector.load %arg2[%c0_1, %c0_2] : memref<3200x32xf32, #tpu.memory_space<vmem>>, vector<3200x32xf32>
    %cst = arith.constant dense<0.000000e+00> : vector<18x32xf32>
    %2 = tpu.matmul %0, %1, %cst {dimension_numbers = #tpu.dot_dimension_numbers<[1], [0], [0], [1], [0, 0, 1, 1], [], []>} : vector<18x3200xf32>, vector<3200x32xf32>, vector<18x32xf32> -> vector<18x32xf32>
    %cst_3 = arith.constant dense<0.000000e+00> : vector<32xf32>
    %3 = vector.multi_reduction <add>, %2, %cst_3 [0] : vector<18x32xf32> to vector<32xf32>
    %4 = vector.shape_cast %3 : vector<32xf32> to vector<1x32xf32>
    %cst_4 = arith.constant 0.055555556 : f32
    %5 = vector.broadcast %cst_4 : f32 to vector<1x32xf32>
    %6 = arith.mulf %4, %5 : vector<1x32xf32>
    %7 = arith.mulf %2, %2 : vector<18x32xf32>
    %cst_5 = arith.constant dense<0.000000e+00> : vector<32xf32>
    %8 = vector.multi_reduction <add>, %7, %cst_5 [0] : vector<18x32xf32> to vector<32xf32>
    %9 = vector.shape_cast %8 : vector<32xf32> to vector<1x32xf32>
    %cst_6 = arith.constant 0.055555556 : f32
    %10 = vector.broadcast %cst_6 : f32 to vector<1x32xf32>
    %11 = arith.mulf %9, %10 : vector<1x32xf32>
    %12 = arith.mulf %6, %6 : vector<1x32xf32>
    %13 = arith.subf %11, %12 : vector<1x32xf32>
    %c0_7 = arith.constant 0 : index
    %c0_8 = arith.constant 0 : index
    %14 = vector.load %arg3[%c0_7, %c0_8] : memref<2x32xf32, #tpu.memory_space<vmem>>, vector<1x32xf32>
    %cst_9 = arith.constant 9.99999974E-6 : f32
    %15 = vector.broadcast %cst_9 : f32 to vector<1x32xf32>
    %16 = arith.addf %13, %15 : vector<1x32xf32>
    %17 = math.rsqrt %16 : vector<1x32xf32>
    %18 = arith.mulf %14, %17 : vector<1x32xf32>
    %c1 = arith.constant 1 : index
    %c0_10 = arith.constant 0 : index
    %19 = vector.load %arg3[%c1, %c0_10] : memref<2x32xf32, #tpu.memory_space<vmem>>, vector<1x32xf32>
    %20 = arith.mulf %6, %18 : vector<1x32xf32>
    %21 = arith.subf %19, %20 : vector<1x32xf32>
    %22 = vector.broadcast %18 : vector<1x32xf32> to vector<18x32xf32>
    %23 = arith.mulf %2, %22 : vector<18x32xf32>
    %24 = vector.broadcast %21 : vector<1x32xf32> to vector<18x32xf32>
    %25 = arith.addf %23, %24 : vector<18x32xf32>
    %cst_11 = arith.constant 0.000000e+00 : f32
    %26 = vector.broadcast %cst_11 : f32 to vector<18x32xf32>
    %27 = arith.maximumf %25, %26 : vector<18x32xf32>
    %cst_12 = arith.constant 0.000000e+00 : f32
    %28 = vector.broadcast %cst_12 : f32 to vector<2x32xf32>
    %29 = vector.extract_strided_slice %27 {offsets = [0, 0], sizes = [2, 32], strides = [1, 1]} : vector<18x32xf32> to vector<2x32xf32>
    %c0_13 = arith.constant 0 : index
    %c0_14 = arith.constant 0 : index
    %c0_15 = arith.constant 0 : index
    %30 = vector.load %arg4[%c0_13, %c0_14, %c0_15] : memref<9x32x32xf32, #tpu.memory_space<vmem>>, vector<1x32x32xf32>
    %31 = vector.shape_cast %30 : vector<1x32x32xf32> to vector<32x32xf32>
    %cst_16 = arith.constant dense<0.000000e+00> : vector<2x32xf32>
    %32 = tpu.matmul %29, %31, %cst_16 {dimension_numbers = #tpu.dot_dimension_numbers<[1], [0], [0], [1], [0, 0, 1, 1], [], []>} : vector<2x32xf32>, vector<32x32xf32>, vector<2x32xf32> -> vector<2x32xf32>
    %33 = arith.addf %28, %32 : vector<2x32xf32>
    %34 = vector.extract_strided_slice %27 {offsets = [2, 0], sizes = [2, 32], strides = [1, 1]} : vector<18x32xf32> to vector<2x32xf32>
    %c1_17 = arith.constant 1 : index
    %c0_18 = arith.constant 0 : index
    %c0_19 = arith.constant 0 : index
    %35 = vector.load %arg4[%c1_17, %c0_18, %c0_19] : memref<9x32x32xf32, #tpu.memory_space<vmem>>, vector<1x32x32xf32>
    %36 = vector.shape_cast %35 : vector<1x32x32xf32> to vector<32x32xf32>
    %cst_20 = arith.constant dense<0.000000e+00> : vector<2x32xf32>
    %37 = tpu.matmul %34, %36, %cst_20 {dimension_numbers = #tpu.dot_dimension_numbers<[1], [0], [0], [1], [0, 0, 1, 1], [], []>} : vector<2x32xf32>, vector<32x32xf32>, vector<2x32xf32> -> vector<2x32xf32>
    %38 = arith.addf %33, %37 : vector<2x32xf32>
    %39 = vector.extract_strided_slice %27 {offsets = [4, 0], sizes = [2, 32], strides = [1, 1]} : vector<18x32xf32> to vector<2x32xf32>
    %c2 = arith.constant 2 : index
    %c0_21 = arith.constant 0 : index
    %c0_22 = arith.constant 0 : index
    %40 = vector.load %arg4[%c2, %c0_21, %c0_22] : memref<9x32x32xf32, #tpu.memory_space<vmem>>, vector<1x32x32xf32>
    %41 = vector.shape_cast %40 : vector<1x32x32xf32> to vector<32x32xf32>
    %cst_23 = arith.constant dense<0.000000e+00> : vector<2x32xf32>
    %42 = tpu.matmul %39, %41, %cst_23 {dimension_numbers = #tpu.dot_dimension_numbers<[1], [0], [0], [1], [0, 0, 1, 1], [], []>} : vector<2x32xf32>, vector<32x32xf32>, vector<2x32xf32> -> vector<2x32xf32>
    %43 = arith.addf %38, %42 : vector<2x32xf32>
    %44 = vector.extract_strided_slice %27 {offsets = [6, 0], sizes = [2, 32], strides = [1, 1]} : vector<18x32xf32> to vector<2x32xf32>
    %c3 = arith.constant 3 : index
    %c0_24 = arith.constant 0 : index
    %c0_25 = arith.constant 0 : index
    %45 = vector.load %arg4[%c3, %c0_24, %c0_25] : memref<9x32x32xf32, #tpu.memory_space<vmem>>, vector<1x32x32xf32>
    %46 = vector.shape_cast %45 : vector<1x32x32xf32> to vector<32x32xf32>
    %cst_26 = arith.constant dense<0.000000e+00> : vector<2x32xf32>
    %47 = tpu.matmul %44, %46, %cst_26 {dimension_numbers = #tpu.dot_dimension_numbers<[1], [0], [0], [1], [0, 0, 1, 1], [], []>} : vector<2x32xf32>, vector<32x32xf32>, vector<2x32xf32> -> vector<2x32xf32>
    %48 = arith.addf %43, %47 : vector<2x32xf32>
    %49 = vector.extract_strided_slice %27 {offsets = [8, 0], sizes = [2, 32], strides = [1, 1]} : vector<18x32xf32> to vector<2x32xf32>
    %c4 = arith.constant 4 : index
    %c0_27 = arith.constant 0 : index
    %c0_28 = arith.constant 0 : index
    %50 = vector.load %arg4[%c4, %c0_27, %c0_28] : memref<9x32x32xf32, #tpu.memory_space<vmem>>, vector<1x32x32xf32>
    %51 = vector.shape_cast %50 : vector<1x32x32xf32> to vector<32x32xf32>
    %cst_29 = arith.constant dense<0.000000e+00> : vector<2x32xf32>
    %52 = tpu.matmul %49, %51, %cst_29 {dimension_numbers = #tpu.dot_dimension_numbers<[1], [0], [0], [1], [0, 0, 1, 1], [], []>} : vector<2x32xf32>, vector<32x32xf32>, vector<2x32xf32> -> vector<2x32xf32>
    %53 = arith.addf %48, %52 : vector<2x32xf32>
    %54 = vector.extract_strided_slice %27 {offsets = [10, 0], sizes = [2, 32], strides = [1, 1]} : vector<18x32xf32> to vector<2x32xf32>
    %c5 = arith.constant 5 : index
    %c0_30 = arith.constant 0 : index
    %c0_31 = arith.constant 0 : index
    %55 = vector.load %arg4[%c5, %c0_30, %c0_31] : memref<9x32x32xf32, #tpu.memory_space<vmem>>, vector<1x32x32xf32>
    %56 = vector.shape_cast %55 : vector<1x32x32xf32> to vector<32x32xf32>
    %cst_32 = arith.constant dense<0.000000e+00> : vector<2x32xf32>
    %57 = tpu.matmul %54, %56, %cst_32 {dimension_numbers = #tpu.dot_dimension_numbers<[1], [0], [0], [1], [0, 0, 1, 1], [], []>} : vector<2x32xf32>, vector<32x32xf32>, vector<2x32xf32> -> vector<2x32xf32>
    %58 = arith.addf %53, %57 : vector<2x32xf32>
    %59 = vector.extract_strided_slice %27 {offsets = [12, 0], sizes = [2, 32], strides = [1, 1]} : vector<18x32xf32> to vector<2x32xf32>
    %c6 = arith.constant 6 : index
    %c0_33 = arith.constant 0 : index
    %c0_34 = arith.constant 0 : index
    %60 = vector.load %arg4[%c6, %c0_33, %c0_34] : memref<9x32x32xf32, #tpu.memory_space<vmem>>, vector<1x32x32xf32>
    %61 = vector.shape_cast %60 : vector<1x32x32xf32> to vector<32x32xf32>
    %cst_35 = arith.constant dense<0.000000e+00> : vector<2x32xf32>
    %62 = tpu.matmul %59, %61, %cst_35 {dimension_numbers = #tpu.dot_dimension_numbers<[1], [0], [0], [1], [0, 0, 1, 1], [], []>} : vector<2x32xf32>, vector<32x32xf32>, vector<2x32xf32> -> vector<2x32xf32>
    %63 = arith.addf %58, %62 : vector<2x32xf32>
    %64 = vector.extract_strided_slice %27 {offsets = [14, 0], sizes = [2, 32], strides = [1, 1]} : vector<18x32xf32> to vector<2x32xf32>
    %c7 = arith.constant 7 : index
    %c0_36 = arith.constant 0 : index
    %c0_37 = arith.constant 0 : index
    %65 = vector.load %arg4[%c7, %c0_36, %c0_37] : memref<9x32x32xf32, #tpu.memory_space<vmem>>, vector<1x32x32xf32>
    %66 = vector.shape_cast %65 : vector<1x32x32xf32> to vector<32x32xf32>
    %cst_38 = arith.constant dense<0.000000e+00> : vector<2x32xf32>
    %67 = tpu.matmul %64, %66, %cst_38 {dimension_numbers = #tpu.dot_dimension_numbers<[1], [0], [0], [1], [0, 0, 1, 1], [], []>} : vector<2x32xf32>, vector<32x32xf32>, vector<2x32xf32> -> vector<2x32xf32>
    %68 = arith.addf %63, %67 : vector<2x32xf32>
    %69 = vector.extract_strided_slice %27 {offsets = [16, 0], sizes = [2, 32], strides = [1, 1]} : vector<18x32xf32> to vector<2x32xf32>
    %c8 = arith.constant 8 : index
    %c0_39 = arith.constant 0 : index
    %c0_40 = arith.constant 0 : index
    %70 = vector.load %arg4[%c8, %c0_39, %c0_40] : memref<9x32x32xf32, #tpu.memory_space<vmem>>, vector<1x32x32xf32>
    %71 = vector.shape_cast %70 : vector<1x32x32xf32> to vector<32x32xf32>
    %cst_41 = arith.constant dense<0.000000e+00> : vector<2x32xf32>
    %72 = tpu.matmul %69, %71, %cst_41 {dimension_numbers = #tpu.dot_dimension_numbers<[1], [0], [0], [1], [0, 0, 1, 1], [], []>} : vector<2x32xf32>, vector<32x32xf32>, vector<2x32xf32> -> vector<2x32xf32>
    %73 = arith.addf %68, %72 : vector<2x32xf32>
    %cst_42 = arith.constant dense<0.000000e+00> : vector<32xf32>
    %74 = vector.multi_reduction <add>, %73, %cst_42 [0] : vector<2x32xf32> to vector<32xf32>
    %75 = vector.shape_cast %74 : vector<32xf32> to vector<1x32xf32>
    %cst_43 = arith.constant 5.000000e-01 : f32
    %76 = vector.broadcast %cst_43 : f32 to vector<1x32xf32>
    %77 = arith.mulf %75, %76 : vector<1x32xf32>
    %78 = arith.mulf %73, %73 : vector<2x32xf32>
    %cst_44 = arith.constant dense<0.000000e+00> : vector<32xf32>
    %79 = vector.multi_reduction <add>, %78, %cst_44 [0] : vector<2x32xf32> to vector<32xf32>
    %80 = vector.shape_cast %79 : vector<32xf32> to vector<1x32xf32>
    %cst_45 = arith.constant 5.000000e-01 : f32
    %81 = vector.broadcast %cst_45 : f32 to vector<1x32xf32>
    %82 = arith.mulf %80, %81 : vector<1x32xf32>
    %83 = arith.mulf %77, %77 : vector<1x32xf32>
    %84 = arith.subf %82, %83 : vector<1x32xf32>
    %c0_46 = arith.constant 0 : index
    %c0_47 = arith.constant 0 : index
    %85 = vector.load %arg5[%c0_46, %c0_47] : memref<4x32xf32, #tpu.memory_space<vmem>>, vector<1x32xf32>
    %cst_48 = arith.constant 9.99999974E-6 : f32
    %86 = vector.broadcast %cst_48 : f32 to vector<1x32xf32>
    %87 = arith.addf %84, %86 : vector<1x32xf32>
    %88 = math.rsqrt %87 : vector<1x32xf32>
    %89 = arith.mulf %85, %88 : vector<1x32xf32>
    %c1_49 = arith.constant 1 : index
    %c0_50 = arith.constant 0 : index
    %90 = vector.load %arg5[%c1_49, %c0_50] : memref<4x32xf32, #tpu.memory_space<vmem>>, vector<1x32xf32>
    %91 = arith.mulf %77, %89 : vector<1x32xf32>
    %92 = arith.subf %90, %91 : vector<1x32xf32>
    %93 = vector.broadcast %89 : vector<1x32xf32> to vector<2x32xf32>
    %94 = arith.mulf %73, %93 : vector<2x32xf32>
    %95 = vector.broadcast %92 : vector<1x32xf32> to vector<2x32xf32>
    %96 = arith.addf %94, %95 : vector<2x32xf32>
    %cst_51 = arith.constant 0.000000e+00 : f32
    %97 = vector.broadcast %cst_51 : f32 to vector<2x32xf32>
    %98 = arith.maximumf %96, %97 : vector<2x32xf32>
    %c2_52 = arith.constant 2 : index
    %c0_53 = arith.constant 0 : index
    %99 = vector.load %arg5[%c2_52, %c0_53] : memref<4x32xf32, #tpu.memory_space<vmem>>, vector<1x32xf32>
    %100 = vector.broadcast %99 : vector<1x32xf32> to vector<2x32xf32>
    %101 = arith.mulf %98, %100 : vector<2x32xf32>
    %cst_54 = arith.constant dense<0.000000e+00> : vector<2xf32>
    %102 = vector.multi_reduction <add>, %101, %cst_54 [1] : vector<2x32xf32> to vector<2xf32>
    %103 = vector.shape_cast %102 : vector<2xf32> to vector<2x1xf32>
    %c3_55 = arith.constant 3 : index
    %c0_56 = arith.constant 0 : index
    %104 = vector.load %arg5[%c3_55, %c0_56] : memref<4x32xf32, #tpu.memory_space<vmem>>, vector<1x1xf32>
    %105 = vector.broadcast %104 : vector<1x1xf32> to vector<2x1xf32>
    %106 = arith.addf %103, %105 : vector<2x1xf32>
    %c0_57 = arith.constant 0 : index
    %c0_58 = arith.constant 0 : index
    %107 = vector.load %arg6[%c0_57, %c0_58] : memref<2x1xf32, #tpu.memory_space<vmem>>, vector<2x1xf32>
    tpu.vector_store %arg6[%c0_57, %c0_58], %106 {strides = array<i32>} : memref<2x1xf32, #tpu.memory_space<vmem>>, vector<2x1xf32>,
    return
  }
  func.func @transform_0(%arg0: i32) -> (i32, i32) {
    %c0_i32 = arith.constant 0 : i32
    %c0_i32_0 = arith.constant 0 : i32
    %c0_i32_1 = arith.constant 0 : i32
    return %c0_i32, %c0_i32_0 : i32, i32
  }
  func.func @transform_1(%arg0: i32) -> (i32, i32) {
    %c0_i32 = arith.constant 0 : i32
    %c0_i32_0 = arith.constant 0 : i32
    %c0_i32_1 = arith.constant 0 : i32
    return %c0_i32, %c0_i32_0 : i32, i32
  }
  func.func @transform_2(%arg0: i32) -> (i32, i32) {
    %c0_i32 = arith.constant 0 : i32
    %c0_i32_0 = arith.constant 0 : i32
    %c0_i32_1 = arith.constant 0 : i32
    return %c0_i32, %c0_i32_0 : i32, i32
  }
  func.func @transform_3(%arg0: i32) -> (i32, i32, i32) {
    %c0_i32 = arith.constant 0 : i32
    %c0_i32_0 = arith.constant 0 : i32
    %c0_i32_1 = arith.constant 0 : i32
    %c0_i32_2 = arith.constant 0 : i32
    return %c0_i32, %c0_i32_0, %c0_i32_1 : i32, i32, i32
  }
  func.func @transform_4(%arg0: i32) -> (i32, i32) {
    %c0_i32 = arith.constant 0 : i32
    %c0_i32_0 = arith.constant 0 : i32
    %c0_i32_1 = arith.constant 0 : i32
    return %c0_i32, %c0_i32_0 : i32, i32
  }
  func.func @transform_5(%arg0: i32) -> (i32, i32) {
    %c0_i32 = arith.constant 0 : i32
    %c0_i32_0 = arith.constant 0 : i32
    %c0_i32_1 = arith.constant 0 : i32
    return %c0_i32, %c0_i32_0 : i32, i32
  }
}

</mosaic_0001>

<bundles_post_ra>
// kernel: mel_cnn_adapt_forward.4
= control target key start
LH: loop header
LB: loop body
LE: loop exit
PB: predicated region body
PF: predicated region fallthrough
CT: control target
= control target key end

     0   :  { %s623_s12 = smov 0   ;;  %s926_s0 = inlined_call_operand.vmem [shape: f32[1536,128], index: 0, kind: input, shape index: {}]   ;;  %s927_s1 = inlined_call_operand.vmem [shape: f32[2,128], index: 1, kind: input, shape index: {}]   ;;  %s928_s2 = inlined_call_operand.vmem [shape: f32[2,128], index: 2, kind: input, shape index: {}]   ;;  %s929_s3 = inlined_call_operand.vmem [shape: f32[1536,128], index: 3, kind: output, shape index: {}]  }
   0x1 LB: > { %s574_s13 = sadd.s32 4294967295, %s601_s12   ;;  %p578_p0 = scmp.ge.s32.totalorder %s601_s12, 1  ;;  %s601_s12 = sphi %s623_s12, %s13_s12  }
   0x2   : > { %p138_p1 = scmp.lt.s32.totalorder %s601_s12, 4 }
   0x4   : > { %p139_p2 = pnand %p578_p0, %p138_p1 }
   0x5   : > { %s579_s18 = sshll.u32 (!%p139_p2), %s574_s13, 6 }
   0x6   : > { %142 = sbr.rel (%p139_p2) target bundleno = 114 (0x72), region = 32  ;;  %p163_p3 = scmp.lt.s32.totalorder (!%p139_p2), %s579_s18, 191 }
   0xb   : > { %v174_v0 = vld [vmem:[%s927_s1] sm:$0x1]  ;;  %v176_v1 = vld [vmem:[%s927_s1 + $0x1] sm:$0x1]  ;;  %s931_s18 = smov (!%p163_p3, %s579_s18), 191 }
   0xc   : > { %v175_v2 = vmul.f32 0.00068587105, %v174_v0  ;;  %v177_v3 = vmul.f32 0.00068587105, %v176_v1  ;;  %s580_s19 = sshll.u32 %s931_s18, 3 }
   0xd   : > { %v180_v12 = vld [vmem:[%s928_s2] sm:$0x1]  ;;  %s648_s24 = scalar_lea.vmem %s926_s0, %s580_s19  ;;  %v193_v16 = vld [vmem:[%s928_s2 + $0x1] sm:$0x1]  ;;  %s687_s29 = scalar_lea.vmem %s929_s3, %s580_s19 }
   0xe   : > { %v178_v4 = vmul.f32 %v175_v2, %v175_v2  ;;  %v196_v17 = vld [vmem:[%s648_s24] sm:$0xff]  ;;  %v197_v18 = vld [vmem:[%s648_s24 + $0x8] sm:$0xff]  ;;  %v198_v19 = vld [vmem:[%s648_s24 + $0x10] sm:$0xff] }
   0xf   : > { %v199_v22 = vld [vmem:[%s648_s24 + $0x18] sm:$0xff]  ;;  %v200_v23 = vld [vmem:[%s648_s24 + $0x20] sm:$0xff]  ;;  %v201_v24 = vld [vmem:[%s648_s24 + $0x28] sm:$0xff] }
  0x10   : > { %v179_v5 = vsub.f32 %v177_v3, %v178_v4  ;;  %v202_v25 = vld [vmem:[%s648_s24 + $0x30] sm:$0xff]  ;;  %v203_v30 = vld [vmem:[%s648_s24 + $0x38] sm:$0xff]  ;;  %v204_v31 = vld [vmem:[%s648_s24 + $0x40] sm:$0xff] }
  0x11   : > { %v205_v37 = vld [vmem:[%s648_s24 + $0x48] sm:$0xff]  ;;  %v206_v38 = vld [vmem:[%s648_s24 + $0x50] sm:$0xff]  ;;  %v207_v45 = vld [vmem:[%s648_s24 + $0x58] sm:$0xff] }
  0x12   : > { %v181_v6 = vadd.f32 1e-05, %v179_v5  ;;  %v208_v50 = vld [vmem:[%s648_s24 + $0x60] sm:$0xff]  ;;  %v209_v55 = vld [vmem:[%s648_s24 + $0x68] sm:$0xff]  ;;  %v210_v59 = vld [vmem:[%s648_s24 + $0x70] sm:$0xff] }
  0x13   : > { %v211_v63 = vld [vmem:[%s648_s24 + $0x78] sm:$0xff]  ;;  %v212_v3 = vld [vmem:[%s648_s24 + $0x80] sm:$0xff] }
  0x14   : > { %593 = vrsqrt.f32 %v181_v6  ;;  %vm188_vm0 = vweird.f32 %v181_v6 }
  0x1a   : > { %v594_v7 = vpop.eup %593 }
  0x1b   : > { %v183_v8 = vmul.f32 %v594_v7, %v181_v6  ;;  %vm189_vm1 = vweird.f32 %v594_v7 }
  0x1c   : > { %vm190_vm2 = vmor %vm188_vm0, %vm189_vm1 }
  0x1d   : > { %v184_v9 = vmul.f32 %v594_v7, %v183_v8 }
  0x1f   : > { %v185_v10 = vmul.f32 0.5, %v184_v9 }
  0x21   : > { %v186_v11 = vsub.f32 1.5, %v185_v10 }
  0x23   : > { %v187_v13 = vmul.f32 %v594_v7, %v186_v11  ;;  %v214_v11 = vld [vmem:[%s648_s24 + $0x90] sm:$0xff] }
  0x25   : > { %v191_v14 = vsel %vm190_vm2, %v594_v7, %v187_v13  ;;  %v213_v7 = vld [vmem:[%s648_s24 + $0x88] sm:$0xff] }
  0x26   : > { %v192_v15 = vmul.f32 %v191_v14, %v180_v12 }
  0x28   : > { %v194_v20 = vmul.f32 %v192_v15, %v175_v2  ;;  %v656_v21 = vperm.slane %v192_v15, 0  ;;  %v215_v15 = vld [vmem:[%s648_s24 + $0x98] sm:$0xff] }
  0x2a   : > { %v195_v26 = vsub.f32 %v193_v16, %v194_v20  ;;  %v261_v27 = vmul.f32 %v656_v21, %v196_v17  ;;  %v262_v28 = vmul.f32 %v656_v21, %v197_v18  ;;  %v263_v29 = vmul.f32 %v656_v21, %v198_v19  ;;  %v216_v19 = vld [vmem:[%s648_s24 + $0xa0] sm:$0xff] }
  0x2b   : > { %v264_v32 = vmul.f32 %v656_v21, %v199_v22  ;;  %v265_v33 = vmul.f32 %v656_v21, %v200_v23  ;;  %v266_v34 = vmul.f32 %v656_v21, %v201_v24  ;;  %v267_v36 = vmul.f32 %v656_v21, %v202_v25  ;;  %v217_v24 = vld [vmem:[%s648_s24 + $0xa8] sm:$0xff] }
  0x2c   : > { %v670_v35 = vperm.slane %v195_v26, 0  ;;  %v268_v39 = vmul.f32 %v656_v21, %v203_v30  ;;  %v269_v40 = vmul.f32 %v656_v21, %v204_v31  ;;  %v270_v48 = vmul.f32 %v656_v21, %v205_v37  ;;  %v220_v37 = vld [vmem:[%s648_s24 + $0xc0] sm:$0xff] }
  0x2d   : > { %v271_v49 = vmul.f32 %v656_v21, %v206_v38  ;;  %v272_v58 = vmul.f32 %v656_v21, %v207_v45  ;;  %v273_v62 = vmul.f32 %v656_v21, %v208_v50  ;;  %v274_v2 = vmul.f32 %v656_v21, %v209_v55  ;;  %v222_v45 = vld [vmem:[%s648_s24 + $0xd0] sm:$0xff] }
  0x2e   : > { %v326_v41 = vadd.f32 %v670_v35, %v261_v27  ;;  %v327_v42 = vadd.f32 %v670_v35, %v262_v28  ;;  %v328_v43 = vadd.f32 %v670_v35, %v263_v29  ;;  %v329_v44 = vadd.f32 %v670_v35, %v264_v32  ;;  %v218_v28 = vld [vmem:[%s648_s24 + $0xb0] sm:$0xff]  ;;  %v219_v32 = vld [vmem:[%s648_s24 + $0xb8] sm:$0xff] }
  0x2f   : > { %v330_v46 = vadd.f32 %v670_v35, %v265_v33  ;;  %v331_v47 = vadd.f32 %v670_v35, %v266_v34  ;;  %v332_v54 = vadd.f32 %v670_v35, %v267_v36  ;;  %v333_v57 = vadd.f32 %v670_v35, %v268_v39 }
  0x30   : > { %v390_v51 = vmax.f32 %v326_v41, 0.0  ;;  %v391_v52 = vmax.f32 %v327_v42, 0.0  ;;  %v392_v53 = vmax.f32 %v328_v43, 0.0  ;;  %v393_v56 = vmax.f32 %v329_v44, 0.0  ;;  %v221_v41 = vld [vmem:[%s648_s24 + $0xc8] sm:$0xff] }
  0x31   : > { %v394_v60 = vmax.f32 %v330_v46, 0.0  ;;  %v334_v61 = vadd.f32 %v670_v35, %v269_v40  ;;  %v395_v0 = vmax.f32 %v331_v47, 0.0  ;;  %v335_v1 = vadd.f32 %v670_v35, %v270_v48 }
  0x32   : > { %454 = vst [vmem:[%s687_s29] sm:$0xff] %v390_v51  ;;  %v396_v4 = vmax.f32 %v332_v54, 0.0  ;;  %v336_v5 = vadd.f32 %v670_v35, %v271_v49  ;;  %v275_v6 = vmul.f32 %v656_v21, %v210_v59  ;;  %v397_v8 = vmax.f32 %v333_v57, 0.0  ;;  %v223_v49 = vld [vmem:[%s648_s24 + $0xd8] sm:$0xff]  ;;  %v225_v57 = vld [vmem:[%s648_s24 + $0xe8] sm:$0xff] }
  0x33   : > { %455 = vst [vmem:[%s687_s29 + $0x8] sm:$0xff] %v391_v52  ;;  %v337_v9 = vadd.f32 %v670_v35, %v272_v58  ;;  %v276_v10 = vmul.f32 %v656_v21, %v211_v63  ;;  %v398_v12 = vmax.f32 %v334_v61, 0.0  ;;  %v338_v13 = vadd.f32 %v670_v35, %v273_v62  ;;  %v226_v61 = vld [vmem:[%s648_s24 + $0xf0] sm:$0xff] }
  0x34   : > { %456 = vst [vmem:[%s687_s29 + $0x10] sm:$0xff] %v392_v53  ;;  %v277_v14 = vmul.f32 %v656_v21, %v212_v3  ;;  %v399_v16 = vmax.f32 %v335_v1, 0.0  ;;  %v339_v17 = vadd.f32 %v670_v35, %v274_v2  ;;  %v278_v18 = vmul.f32 %v656_v21, %v213_v7  ;;  %v224_v53 = vld [vmem:[%s648_s24 + $0xe0] sm:$0xff]  ;;  %v227_v1 = vld [vmem:[%s648_s24 + $0xf8] sm:$0xff] }
  0x35   : > { %457 = vst [vmem:[%s687_s29 + $0x18] sm:$0xff] %v393_v56  ;;  %v400_v20 = vmax.f32 %v336_v5, 0.0  ;;  %v340_v22 = vadd.f32 %v670_v35, %v275_v6  ;;  %v279_v23 = vmul.f32 %v656_v21, %v214_v11  ;;  %v401_v25 = vmax.f32 %v337_v9, 0.0  ;;  %v228_v5 = vld [vmem:[%s648_s24 + $0x100] sm:$0xff]  ;;  %v229_v9 = vld [vmem:[%s648_s24 + $0x108] sm:$0xff] }
  0x36   : > { %458 = vst [vmem:[%s687_s29 + $0x20] sm:$0xff] %v394_v60  ;;  %v341_v26 = vadd.f32 %v670_v35, %v276_v10  ;;  %v280_v27 = vmul.f32 %v656_v21, %v215_v15  ;;  %v402_v29 = vmax.f32 %v338_v13, 0.0  ;;  %v342_v30 = vadd.f32 %v670_v35, %v277_v14  ;;  %v230_v13 = vld [vmem:[%s648_s24 + $0x110] sm:$0xff] }
  0x37   : > { %459 = vst [vmem:[%s687_s29 + $0x28] sm:$0xff] %v395_v0  ;;  %v281_v31 = vmul.f32 %v656_v21, %v216_v19  ;;  %v403_v33 = vmax.f32 %v339_v17, 0.0  ;;  %v343_v34 = vadd.f32 %v670_v35, %v278_v18  ;;  %v282_v36 = vmul.f32 %v656_v21, %v217_v24  ;;  %v231_v17 = vld [vmem:[%s648_s24 + $0x118] sm:$0xff] }
  0x38   : > { %460 = vst [vmem:[%s687_s29 + $0x30] sm:$0xff] %v396_v4  ;;  %v404_v38 = vmax.f32 %v340_v22, 0.0  ;;  %v344_v39 = vadd.f32 %v670_v35, %v279_v23  ;;  %v283_v40 = vmul.f32 %v656_v21, %v218_v28  ;;  %v405_v42 = vmax.f32 %v341_v26, 0.0  ;;  %v232_v22 = vld [vmem:[%s648_s24 + $0x120] sm:$0xff]  ;;  %v233_v26 = vld [vmem:[%s648_s24 + $0x128] sm:$0xff] }
  0x39   : > { %461 = vst [vmem:[%s687_s29 + $0x38] sm:$0xff] %v397_v8  ;;  %v345_v43 = vadd.f32 %v670_v35, %v280_v27  ;;  %v284_v44 = vmul.f32 %v656_v21, %v219_v32  ;;  %v406_v46 = vmax.f32 %v342_v30, 0.0  ;;  %v346_v47 = vadd.f32 %v670_v35, %v281_v31  ;;  %v234_v30 = vld [vmem:[%s648_s24 + $0x130] sm:$0xff] }
  0x3a   : > { %462 = vst [vmem:[%s687_s29 + $0x40] sm:$0xff] %v398_v12  ;;  %v285_v48 = vmul.f32 %v656_v21, %v220_v37  ;;  %v407_v50 = vmax.f32 %v343_v34, 0.0  ;;  %v347_v51 = vadd.f32 %v670_v35, %v282_v36  ;;  %v286_v52 = vmul.f32 %v656_v21, %v221_v41  ;;  %v235_v34 = vld [vmem:[%s648_s24 + $0x138] sm:$0xff] }
  0x3b   : > { %463 = vst [vmem:[%s687_s29 + $0x48] sm:$0xff] %v399_v16  ;;  %v408_v54 = vmax.f32 %v344_v39, 0.0  ;;  %v348_v55 = vadd.f32 %v670_v35, %v283_v40  ;;  %v287_v56 = vmul.f32 %v656_v21, %v222_v45  ;;  %v409_v58 = vmax.f32 %v345_v43, 0.0  ;;  %v236_v39 = vld [vmem:[%s648_s24 + $0x140] sm:$0xff]  ;;  %v237_v43 = vld [vmem:[%s648_s24 + $0x148] sm:$0xff] }
  0x3c   : > { %464 = vst [vmem:[%s687_s29 + $0x50] sm:$0xff] %v400_v20  ;;  %v349_v59 = vadd.f32 %v670_v35, %v284_v44  ;;  %v288_v60 = vmul.f32 %v656_v21, %v223_v49  ;;  %v410_v62 = vmax.f32 %v346_v47, 0.0  ;;  %v350_v63 = vadd.f32 %v670_v35, %v285_v48  ;;  %v238_v47 = vld [vmem:[%s648_s24 + $0x150] sm:$0xff] }
  0x3d   : > { %465 = vst [vmem:[%s687_s29 + $0x58] sm:$0xff] %v401_v25  ;;  %v289_v0 = vmul.f32 %v656_v21, %v224_v53  ;;  %v411_v2 = vmax.f32 %v347_v51, 0.0  ;;  %v351_v3 = vadd.f32 %v670_v35, %v286_v52  ;;  %v290_v4 = vmul.f32 %v656_v21, %v225_v57  ;;  %v239_v51 = vld [vmem:[%s648_s24 + $0x158] sm:$0xff] }
  0x3e   : > { %466 = vst [vmem:[%s687_s29 + $0x60] sm:$0xff] %v402_v29  ;;  %v412_v6 = vmax.f32 %v348_v55, 0.0  ;;  %v352_v7 = vadd.f32 %v670_v35, %v287_v56  ;;  %v291_v8 = vmul.f32 %v656_v21, %v226_v61  ;;  %v413_v10 = vmax.f32 %v349_v59, 0.0  ;;  %v240_v55 = vld [vmem:[%s648_s24 + $0x160] sm:$0xff]  ;;  %v241_v59 = vld [vmem:[%s648_s24 + $0x168] sm:$0xff] }
  0x3f   : > { %467 = vst [vmem:[%s687_s29 + $0x68] sm:$0xff] %v403_v33  ;;  %v353_v11 = vadd.f32 %v670_v35, %v288_v60  ;;  %v292_v12 = vmul.f32 %v656_v21, %v227_v1  ;;  %v414_v14 = vmax.f32 %v350_v63, 0.0  ;;  %v354_v15 = vadd.f32 %v670_v35, %v289_v0  ;;  %v242_v63 = vld [vmem:[%s648_s24 + $0x170] sm:$0xff] }
  0x40   : > { %468 = vst [vmem:[%s687_s29 + $0x70] sm:$0xff] %v404_v38  ;;  %v293_v16 = vmul.f32 %v656_v21, %v228_v5  ;;  %v415_v18 = vmax.f32 %v351_v3, 0.0  ;;  %v355_v19 = vadd.f32 %v670_v35, %v290_v4  ;;  %v294_v20 = vmul.f32 %v656_v21, %v229_v9  ;;  %v243_v3 = vld [vmem:[%s648_s24 + $0x178] sm:$0xff] }
  0x41   : > { %469 = vst [vmem:[%s687_s29 + $0x78] sm:$0xff] %v405_v42  ;;  %v416_v23 = vmax.f32 %v352_v7, 0.0  ;;  %v356_v24 = vadd.f32 %v670_v35, %v291_v8  ;;  %v295_v25 = vmul.f32 %v656_v21, %v230_v13  ;;  %v417_v27 = vmax.f32 %v353_v11, 0.0  ;;  %v244_v7 = vld [vmem:[%s648_s24 + $0x180] sm:$0xff]  ;;  %v245_v11 = vld [vmem:[%s648_s24 + $0x188] sm:$0xff] }
  0x42   : > { %470 = vst [vmem:[%s687_s29 + $0x80] sm:$0xff] %v406_v46  ;;  %v357_v28 = vadd.f32 %v670_v35, %v292_v12  ;;  %v296_v29 = vmul.f32 %v656_v21, %v231_v17  ;;  %v418_v31 = vmax.f32 %v354_v15, 0.0  ;;  %v358_v32 = vadd.f32 %v670_v35, %v293_v16  ;;  %v259_v12 = vld [vmem:[%s648_s24 + $0x1f8] sm:$0xff]  ;;  %v246_v16 = vld [vmem:[%s648_s24 + $0x190] sm:$0xff] }
  0x43   : > { %471 = vst [vmem:[%s687_s29 + $0x88] sm:$0xff] %v407_v50  ;;  %v297_v33 = vmul.f32 %v656_v21, %v232_v22  ;;  %v419_v36 = vmax.f32 %v355_v19, 0.0  ;;  %v359_v37 = vadd.f32 %v670_v35, %v294_v20  ;;  %v298_v38 = vmul.f32 %v656_v21, %v233_v26  ;;  %v247_v20 = vld [vmem:[%s648_s24 + $0x198] sm:$0xff] }
  0x44   : > { %472 = vst [vmem:[%s687_s29 + $0x90] sm:$0xff] %v408_v54  ;;  %v420_v40 = vmax.f32 %v356_v24, 0.0  ;;  %v360_v41 = vadd.f32 %v670_v35, %v295_v25  ;;  %v299_v42 = vmul.f32 %v656_v21, %v234_v30  ;;  %v421_v44 = vmax.f32 %v357_v28, 0.0  ;;  %v248_v25 = vld [vmem:[%s648_s24 + $0x1a0] sm:$0xff]  ;;  %v249_v30 = vld [vmem:[%s648_s24 + $0x1a8] sm:$0xff] }
  0x45   : > { %473 = vst [vmem:[%s687_s29 + $0x98] sm:$0xff] %v409_v58  ;;  %v361_v45 = vadd.f32 %v670_v35, %v296_v29  ;;  %v300_v46 = vmul.f32 %v656_v21, %v235_v34  ;;  %v422_v48 = vmax.f32 %v358_v32, 0.0  ;;  %v362_v49 = vadd.f32 %v670_v35, %v297_v33  ;;  %v250_v34 = vld [vmem:[%s648_s24 + $0x1b0] sm:$0xff] }
  0x46   : > { %474 = vst [vmem:[%s687_s29 + $0xa0] sm:$0xff] %v410_v62  ;;  %v301_v50 = vmul.f32 %v656_v21, %v236_v39  ;;  %v423_v52 = vmax.f32 %v359_v37, 0.0  ;;  %v363_v53 = vadd.f32 %v670_v35, %v298_v38  ;;  %v302_v54 = vmul.f32 %v656_v21, %v237_v43 }
  0x47   : > { %475 = vst [vmem:[%s687_s29 + $0xa8] sm:$0xff] %v411_v2  ;;  %v424_v56 = vmax.f32 %v360_v41, 0.0  ;;  %v364_v57 = vadd.f32 %v670_v35, %v299_v42  ;;  %v303_v58 = vmul.f32 %v656_v21, %v238_v47  ;;  %v425_v60 = vmax.f32 %v361_v45, 0.0 }
  0x48   : > { %476 = vst [vmem:[%s687_s29 + $0xb0] sm:$0xff] %v412_v6  ;;  %v365_v61 = vadd.f32 %v670_v35, %v300_v46  ;;  %v304_v62 = vmul.f32 %v656_v21, %v239_v51  ;;  %v426_v0 = vmax.f32 %v362_v49, 0.0  ;;  %v366_v1 = vadd.f32 %v670_v35, %v301_v50 }
  0x49   : > { %477 = vst [vmem:[%s687_s29 + $0xb8] sm:$0xff] %v413_v10  ;;  %v305_v2 = vmul.f32 %v656_v21, %v240_v55  ;;  %v427_v4 = vmax.f32 %v363_v53, 0.0  ;;  %v367_v5 = vadd.f32 %v670_v35, %v302_v54  ;;  %v306_v6 = vmul.f32 %v656_v21, %v241_v59 }
  0x4a   : > { %478 = vst [vmem:[%s687_s29 + $0xc0] sm:$0xff] %v414_v14  ;;  %v428_v8 = vmax.f32 %v364_v57, 0.0  ;;  %v368_v9 = vadd.f32 %v670_v35, %v303_v58  ;;  %v307_v10 = vmul.f32 %v656_v21, %v242_v63  ;;  %v429_v13 = vmax.f32 %v365_v61, 0.0 }
  0x4b   : > { %479 = vst [vmem:[%s687_s29 + $0xc8] sm:$0xff] %v415_v18  ;;  %v369_v14 = vadd.f32 %v670_v35, %v304_v62  ;;  %v308_v15 = vmul.f32 %v656_v21, %v243_v3  ;;  %v430_v17 = vmax.f32 %v366_v1, 0.0  ;;  %v370_v18 = vadd.f32 %v670_v35, %v305_v2 }
  0x4c   : > { %480 = vst [vmem:[%s687_s29 + $0xd0] sm:$0xff] %v416_v23  ;;  %v309_v19 = vmul.f32 %v656_v21, %v244_v7  ;;  %v431_v22 = vmax.f32 %v367_v5, 0.0  ;;  %v371_v23 = vadd.f32 %v670_v35, %v306_v6  ;;  %v310_v24 = vmul.f32 %v656_v21, %v245_v11 }
  0x4d   : > { %481 = vst [vmem:[%s687_s29 + $0xd8] sm:$0xff] %v417_v27  ;;  %v324_v26 = vmul.f32 %v656_v21, %v259_v12  ;;  %v432_v27 = vmax.f32 %v368_v9, 0.0  ;;  %v372_v28 = vadd.f32 %v670_v35, %v307_v10  ;;  %v311_v29 = vmul.f32 %v656_v21, %v246_v16 }
  0x4e   : > { %482 = vst [vmem:[%s687_s29 + $0xe0] sm:$0xff] %v418_v31  ;;  %v433_v31 = vmax.f32 %v369_v14, 0.0  ;;  %v373_v32 = vadd.f32 %v670_v35, %v308_v15  ;;  %v312_v33 = vmul.f32 %v656_v21, %v247_v20  ;;  %v434_v37 = vmax.f32 %v370_v18, 0.0 }
  0x4f   : > { %483 = vst [vmem:[%s687_s29 + $0xe8] sm:$0xff] %v419_v36  ;;  %v862_v36 = vadd.f32 %v670_v35, %v324_v26  ;;  %v374_v38 = vadd.f32 %v670_v35, %v309_v19  ;;  %v313_v39 = vmul.f32 %v656_v21, %v248_v25  ;;  %v435_v41 = vmax.f32 %v371_v23, 0.0 }
  0x50   : > { %484 = vst [vmem:[%s687_s29 + $0xf0] sm:$0xff] %v420_v40  ;;  %v251_v40 = vld [vmem:[%s648_s24 + $0x1b8] sm:$0xff]  ;;  %v375_v42 = vadd.f32 %v670_v35, %v310_v24  ;;  %v314_v43 = vmul.f32 %v656_v21, %v249_v30  ;;  %v436_v45 = vmax.f32 %v372_v28, 0.0  ;;  %v376_v46 = vadd.f32 %v670_v35, %v311_v29 }
  0x51   : > { %485 = vst [vmem:[%s687_s29 + $0xf8] sm:$0xff] %v421_v44  ;;  %v252_v44 = vld [vmem:[%s648_s24 + $0x1c0] sm:$0xff]  ;;  %v315_v47 = vmul.f32 %v656_v21, %v250_v34  ;;  %v437_v49 = vmax.f32 %v373_v32, 0.0  ;;  %v377_v50 = vadd.f32 %v670_v35, %v312_v33  ;;  %v316_v51 = vmul.f32 %v656_v21, %v251_v40 }
  0x52   : > { %486 = vst [vmem:[%s687_s29 + $0x100] sm:$0xff] %v422_v48  ;;  %v253_v48 = vld [vmem:[%s648_s24 + $0x1c8] sm:$0xff]  ;;  %v438_v53 = vmax.f32 %v374_v38, 0.0  ;;  %v378_v54 = vadd.f32 %v670_v35, %v313_v39  ;;  %v317_v55 = vmul.f32 %v656_v21, %v252_v44  ;;  %v439_v57 = vmax.f32 %v375_v42, 0.0 }
  0x53   : > { %487 = vst [vmem:[%s687_s29 + $0x108] sm:$0xff] %v423_v52  ;;  %v254_v52 = vld [vmem:[%s648_s24 + $0x1d0] sm:$0xff]  ;;  %v379_v58 = vadd.f32 %v670_v35, %v314_v43  ;;  %v318_v59 = vmul.f32 %v656_v21, %v253_v48  ;;  %v440_v61 = vmax.f32 %v376_v46, 0.0  ;;  %v380_v62 = vadd.f32 %v670_v35, %v315_v47 }
  0x54   : > { %488 = vst [vmem:[%s687_s29 + $0x110] sm:$0xff] %v424_v56  ;;  %v255_v56 = vld [vmem:[%s648_s24 + $0x1d8] sm:$0xff]  ;;  %v319_v63 = vmul.f32 %v656_v21, %v254_v52  ;;  %v441_v1 = vmax.f32 %v377_v50, 0.0  ;;  %v381_v2 = vadd.f32 %v670_v35, %v316_v51  ;;  %v442_v5 = vmax.f32 %v378_v54, 0.0 }
  0x55   : > { %489 = vst [vmem:[%s687_s29 + $0x118] sm:$0xff] %v425_v60  ;;  %v256_v60 = vld [vmem:[%s648_s24 + $0x1e0] sm:$0xff]  ;;  %v320_v3 = vmul.f32 %v656_v21, %v255_v56  ;;  %v382_v6 = vadd.f32 %v670_v35, %v317_v55  ;;  %v383_v9 = vadd.f32 %v670_v35, %v318_v59  ;;  %v444_v11 = vmax.f32 %v380_v62, 0.0 }
  0x56   : > { %490 = vst [vmem:[%s687_s29 + $0x120] sm:$0xff] %v426_v0  ;;  %v257_v0 = vld [vmem:[%s648_s24 + $0x1e8] sm:$0xff]  ;;  %v321_v7 = vmul.f32 %v656_v21, %v256_v60  ;;  %v384_v12 = vadd.f32 %v670_v35, %v319_v63  ;;  %v445_v14 = vmax.f32 %v381_v2, 0.0  ;;  %v453_v26 = vmax.f32 %v862_v36, 0.0 }
  0x57   : > { %491 = vst [vmem:[%s687_s29 + $0x128] sm:$0xff] %v427_v4  ;;  %v258_v4 = vld [vmem:[%s648_s24 + $0x1f0] sm:$0xff]  ;;  %v322_v10 = vmul.f32 %v656_v21, %v257_v0  ;;  %v385_v15 = vadd.f32 %v670_v35, %v320_v3  ;;  %v446_v16 = vmax.f32 %v382_v6, 0.0  ;;  %v447_v18 = vmax.f32 %v383_v9, 0.0 }
  0x58   : > { %492 = vst [vmem:[%s687_s29 + $0x130] sm:$0xff] %v428_v8  ;;  %v443_v8 = vmax.f32 %v379_v58, 0.0 }
  0x59   : > { %493 = vst [vmem:[%s687_s29 + $0x138] sm:$0xff] %v429_v13  ;;  %v323_v13 = vmul.f32 %v656_v21, %v258_v4  ;;  %v387_v19 = vadd.f32 %v670_v35, %v322_v10  ;;  %v448_v21 = vmax.f32 %v384_v12, 0.0 }
  0x5a   : > { %494 = vst [vmem:[%s687_s29 + $0x140] sm:$0xff] %v430_v17  ;;  %v386_v17 = vadd.f32 %v670_v35, %v321_v7 }
  0x5b   : > { %495 = vst [vmem:[%s687_s29 + $0x148] sm:$0xff] %v431_v22  ;;  %v388_v20 = vadd.f32 %v670_v35, %v323_v13  ;;  %v449_v22 = vmax.f32 %v385_v15, 0.0  ;;  %v451_v24 = vmax.f32 %v387_v19, 0.0 }
  0x5c   : > { %496 = vst [vmem:[%s687_s29 + $0x150] sm:$0xff] %v432_v27  ;;  %v450_v23 = vmax.f32 %v386_v17, 0.0 }
  0x5d   : > { %497 = vst [vmem:[%s687_s29 + $0x158] sm:$0xff] %v433_v31  ;;  %v452_v25 = vmax.f32 %v388_v20, 0.0 }
  0x5e   : > { %498 = vst [vmem:[%s687_s29 + $0x160] sm:$0xff] %v434_v37 }
  0x5f   : > { %499 = vst [vmem:[%s687_s29 + $0x168] sm:$0xff] %v435_v41 }
  0x60   : > { %500 = vst [vmem:[%s687_s29 + $0x170] sm:$0xff] %v436_v45 }
  0x61   : > { %501 = vst [vmem:[%s687_s29 + $0x178] sm:$0xff] %v437_v49 }
  0x62   : > { %502 = vst [vmem:[%s687_s29 + $0x180] sm:$0xff] %v438_v53 }
  0x63   : > { %503 = vst [vmem:[%s687_s29 + $0x188] sm:$0xff] %v439_v57 }
  0x64   : > { %504 = vst [vmem:[%s687_s29 + $0x190] sm:$0xff] %v440_v61 }
  0x65   : > { %505 = vst [vmem:[%s687_s29 + $0x198] sm:$0xff] %v441_v1 }
  0x66   : > { %506 = vst [vmem:[%s687_s29 + $0x1a0] sm:$0xff] %v442_v5 }
  0x67   : > { %507 = vst [vmem:[%s687_s29 + $0x1a8] sm:$0xff] %v443_v8 }
  0x68   : > { %508 = vst [vmem:[%s687_s29 + $0x1b0] sm:$0xff] %v444_v11 }
  0x69   : > { %509 = vst [vmem:[%s687_s29 + $0x1b8] sm:$0xff] %v445_v14 }
  0x6a   : > { %510 = vst [vmem:[%s687_s29 + $0x1c0] sm:$0xff] %v446_v16 }
  0x6b   : > { %511 = vst [vmem:[%s687_s29 + $0x1c8] sm:$0xff] %v447_v18 }
  0x6c   : > { %512 = vst [vmem:[%s687_s29 + $0x1d0] sm:$0xff] %v448_v21 }
  0x6d   : > { %513 = vst [vmem:[%s687_s29 + $0x1d8] sm:$0xff] %v449_v22 }
  0x6e   : > { %514 = vst [vmem:[%s687_s29 + $0x1e0] sm:$0xff] %v450_v23 }
  0x6f   : > { %515 = vst [vmem:[%s687_s29 + $0x1e8] sm:$0xff] %v451_v24 }
  0x70   : > { %516 = vst [vmem:[%s687_s29 + $0x1f0] sm:$0xff] %v452_v25 }
  0x71   : > { %517 = vst [vmem:[%s687_s29 + $0x1f8] sm:$0xff] %v453_v26 }
  0x72 PF: > { %s13_s12 = sadd.s32 1, %s601_s12  }
  0x73   : > { %p10_p4 = scmp.ge.s32.totalorder %s13_s12, 5  }
  0x75   :  { %12 = sbr.rel (!%p10_p4) target bundleno = 1 (0x1), region = 62 }

// kernel: mel_cnn_adapt_forward.3
= control target key start
LH: loop header
LB: loop body
LE: loop exit
PB: predicated region body
PF: predicated region fallthrough
CT: control target
= control target key end

     0   :  { %s1203_s12 = smov 0   ;;  %s1722_s0 = inlined_call_operand.vmem [shape: f32[1536,256], index: 0, kind: input, shape index: {}]   ;;  %s1723_s1 = inlined_call_operand.vmem [shape: f32[256,128], index: 1, kind: input, shape index: {}]   ;;  %s1724_s2 = inlined_call_operand.vmem [shape: f32[1536,128], index: 2, kind: output, shape index: {0}]   ;;  %s1725_s3 = inlined_call_operand.vmem [shape: f32[3,2,128], index: 3, kind: output, shape index: {1}]  }
   0x1 LB: > { %s1209_s13 = sadd.s32 4294967295, %s1181_s12   ;;  %p1125_p0 = scmp.ge.s32.totalorder %s1181_s12, 1  ;;  %s1181_s12 = sphi %s1203_s12, %s14_s12  }
   0x2   : > { %p142_p1 = scmp.lt.s32.totalorder %s1181_s12, 4 }
   0x4   : > { %p143_p2 = pnand %p1125_p0, %p142_p1 }
   0x5   : > { %s1126_s21 = sshll.u32 (!%p143_p2), %s1209_s13, 6  ;;  %p184_p4 = scmp.lt.s32.totalorder (!%p143_p2), %s1209_s13, 2 }
   0x6   : > { %146 = sbr.rel (%p143_p2) target bundleno = 501 (0x1f5), region = 28  ;;  %p172_p3 = scmp.lt.s32.totalorder (!%p143_p2), %s1126_s21, 191 }
   0xb   : > { %v331_v0 = vld [vmem:[%s1723_s1 + $0x78] sm:$0xff]  ;;  %v330_v2 = vld [vmem:[%s1723_s1 + $0x70] sm:$0xff]  ;;  %v329_v4 = vld [vmem:[%s1723_s1 + $0x68] sm:$0xff]  ;;  %s1727_s21 = smov (!%p172_p3, %s1126_s21), 191  ;;  %s1729_s13 = smov (!%p184_p4, %s1209_s13), 2 }
   0xc   : > { %v347_v1 = vld [vmem:[%s1723_s1 + $0xf8] sm:$0xff]  ;;  %348 = vmatpush.msra.mxu0 %v331_v0  ;;  %v346_v3 = vld [vmem:[%s1723_s1 + $0xf0] sm:$0xff]  ;;  %v345_v5 = vld [vmem:[%s1723_s1 + $0xe8] sm:$0xff]  ;;  %1135 = vmatpush.msra.mxu2 %v331_v0  ;;  %s1134_s17 = sshll.u32 %s1727_s21, 4  ;;  %s1130_s7 = sshll.u32 %s1727_s21, 3 }
   0xd   : > { %557 = vmatpush.msra.mxu1 %v347_v1  ;;  %1151 = vmatpush.msra.mxu3 %v347_v1  ;;  %v328_v6 = vld [vmem:[%s1723_s1 + $0x60] sm:$0xff]  ;;  %v327_v8 = vld [vmem:[%s1723_s1 + $0x58] sm:$0xff]  ;;  %v326_v10 = vld [vmem:[%s1723_s1 + $0x50] sm:$0xff]  ;;  %s1310_s29 = scalar_lea.vmem %s1722_s0, %s1134_s17  ;;  %s1380_s10 = scalar_lea.vmem %s1724_s2, %s1130_s7 }
   0xe   : > { %349 = vmatpush.msra.mxu0 %v330_v2  ;;  %v344_v7 = vld [vmem:[%s1723_s1 + $0xe0] sm:$0xff]  ;;  %1136 = vmatpush.msra.mxu2 %v330_v2  ;;  %v343_v9 = vld [vmem:[%s1723_s1 + $0xd8] sm:$0xff]  ;;  %v342_v11 = vld [vmem:[%s1723_s1 + $0xd0] sm:$0xff]  ;;  %s1131_s21 = sshll.u32 %s1729_s13, 1 }
   0xf   : > { %558 = vmatpush.msra.mxu1 %v346_v3  ;;  %1152 = vmatpush.msra.mxu3 %v346_v3  ;;  %v325_v12 = vld [vmem:[%s1723_s1 + $0x48] sm:$0xff]  ;;  %v324_v14 = vld [vmem:[%s1723_s1 + $0x40] sm:$0xff]  ;;  %v323_v16 = vld [vmem:[%s1723_s1 + $0x38] sm:$0xff]  ;;  %s187_s15 = scalar_lea.vmem %s1725_s3, %s1131_s21 }
  0x10   : > { %350 = vmatpush.msra.mxu0 %v329_v4  ;;  %1137 = vmatpush.msra.mxu2 %v329_v4  ;;  %v341_v13 = vld [vmem:[%s1723_s1 + $0xc8] sm:$0xff]  ;;  %v340_v15 = vld [vmem:[%s1723_s1 + $0xc0] sm:$0xff]  ;;  %v339_v17 = vld [vmem:[%s1723_s1 + $0xb8] sm:$0xff] }
  0x11   : > { %559 = vmatpush.msra.mxu1 %v345_v5  ;;  %1153 = vmatpush.msra.mxu3 %v345_v5  ;;  %v322_v18 = vld [vmem:[%s1723_s1 + $0x30] sm:$0xff]  ;;  %v321_v20 = vld [vmem:[%s1723_s1 + $0x28] sm:$0xff]  ;;  %v320_v22 = vld [vmem:[%s1723_s1 + $0x20] sm:$0xff] }
  0x12   : > { %351 = vmatpush.msra.mxu0 %v328_v6  ;;  %1138 = vmatpush.msra.mxu2 %v328_v6  ;;  %v338_v19 = vld [vmem:[%s1723_s1 + $0xb0] sm:$0xff]  ;;  %v337_v21 = vld [vmem:[%s1723_s1 + $0xa8] sm:$0xff]  ;;  %v336_v23 = vld [vmem:[%s1723_s1 + $0xa0] sm:$0xff] }
  0x13   : > { %560 = vmatpush.msra.mxu1 %v344_v7  ;;  %1154 = vmatpush.msra.mxu3 %v344_v7  ;;  %v319_v24 = vld [vmem:[%s1723_s1 + $0x18] sm:$0xff]  ;;  %v318_v26 = vld [vmem:[%s1723_s1 + $0x10] sm:$0xff]  ;;  %v317_v28 = vld [vmem:[%s1723_s1 + $0x8] sm:$0xff] }
  0x14   : > { %352 = vmatpush.msra.mxu0 %v327_v8  ;;  %1139 = vmatpush.msra.mxu2 %v327_v8  ;;  %v335_v25 = vld [vmem:[%s1723_s1 + $0x98] sm:$0xff]  ;;  %v334_v27 = vld [vmem:[%s1723_s1 + $0x90] sm:$0xff]  ;;  %v333_v29 = vld [vmem:[%s1723_s1 + $0x88] sm:$0xff] }
  0x15   : > { %561 = vmatpush.msra.mxu1 %v343_v9  ;;  %1155 = vmatpush.msra.mxu3 %v343_v9  ;;  %v316_v30 = vld [vmem:[%s1723_s1] sm:$0xff]  ;;  %v189_v33 = vld [vmem:[%s1310_s29 + $0x8] sm:$0xff]  ;;  %v190_v34 = vld [vmem:[%s1310_s29 + $0x10] sm:$0xff] }
  0x16   : > { %353 = vmatpush.msra.mxu0 %v326_v10  ;;  %1140 = vmatpush.msra.mxu2 %v326_v10  ;;  %v332_v31 = vld [vmem:[%s1723_s1 + $0x80] sm:$0xff]  ;;  %v191_v35 = vld [vmem:[%s1310_s29 + $0x18] sm:$0xff]  ;;  %v193_v37 = vld [vmem:[%s1310_s29 + $0x28] sm:$0xff] }
  0x17   : > { %562 = vmatpush.msra.mxu1 %v342_v11  ;;  %1156 = vmatpush.msra.mxu3 %v342_v11  ;;  %v188_v32 = vld [vmem:[%s1310_s29] sm:$0xff]  ;;  %v194_v38 = vld [vmem:[%s1310_s29 + $0x30] sm:$0xff]  ;;  %v195_v39 = vld [vmem:[%s1310_s29 + $0x38] sm:$0xff] }
  0x18   : > { %354 = vmatpush.msra.mxu0 %v325_v12  ;;  %1141 = vmatpush.msra.mxu2 %v325_v12  ;;  %v192_v36 = vld [vmem:[%s1310_s29 + $0x20] sm:$0xff]  ;;  %v253_v41 = vld [vmem:[%s1310_s29 + $0x208] sm:$0xff]  ;;  %v254_v44 = vld [vmem:[%s1310_s29 + $0x210] sm:$0xff] }
  0x19   : > { %563 = vmatpush.msra.mxu1 %v341_v13  ;;  %1157 = vmatpush.msra.mxu3 %v341_v13  ;;  %v252_v40 = vld [vmem:[%s1310_s29 + $0x200] sm:$0xff]  ;;  %v197_v43 = vld [vmem:[%s1310_s29 + $0x48] sm:$0xff]  ;;  %v255_v45 = vld [vmem:[%s1310_s29 + $0x218] sm:$0xff] }
  0x1a   : > { %355 = vmatpush.msra.mxu0 %v324_v14  ;;  %1142 = vmatpush.msra.mxu2 %v324_v14  ;;  %v196_v42 = vld [vmem:[%s1310_s29 + $0x40] sm:$0xff]  ;;  %v198_v46 = vld [vmem:[%s1310_s29 + $0x50] sm:$0xff]  ;;  %v199_v47 = vld [vmem:[%s1310_s29 + $0x58] sm:$0xff] }
  0x1b   : > { %564 = vmatpush.msra.mxu1 %v340_v15  ;;  %1158 = vmatpush.msra.mxu3 %v340_v15  ;;  %v256_v48 = vld [vmem:[%s1310_s29 + $0x220] sm:$0xff]  ;;  %v257_v49 = vld [vmem:[%s1310_s29 + $0x228] sm:$0xff]  ;;  %v258_v52 = vld [vmem:[%s1310_s29 + $0x230] sm:$0xff] }
  0x1c   : > { %356 = vmatpush.msra.mxu0 %v323_v16  ;;  %1143 = vmatpush.msra.mxu2 %v323_v16  ;;  %v200_v50 = vld [vmem:[%s1310_s29 + $0x60] sm:$0xff]  ;;  %v201_v51 = vld [vmem:[%s1310_s29 + $0x68] sm:$0xff]  ;;  %v259_v53 = vld [vmem:[%s1310_s29 + $0x238] sm:$0xff] }
  0x1d   : > { %565 = vmatpush.msra.mxu1 %v339_v17  ;;  %1159 = vmatpush.msra.mxu3 %v339_v17  ;;  %v202_v54 = vld [vmem:[%s1310_s29 + $0x70] sm:$0xff]  ;;  %v203_v55 = vld [vmem:[%s1310_s29 + $0x78] sm:$0xff]  ;;  %v260_v56 = vld [vmem:[%s1310_s29 + $0x240] sm:$0xff] }
  0x1e   : > { %357 = vmatpush.msra.mxu0 %v322_v18  ;;  %1144 = vmatpush.msra.mxu2 %v322_v18  ;;  %v261_v57 = vld [vmem:[%s1310_s29 + $0x248] sm:$0xff]  ;;  %v204_v58 = vld [vmem:[%s1310_s29 + $0x80] sm:$0xff]  ;;  %v262_v60 = vld [vmem:[%s1310_s29 + $0x250] sm:$0xff] }
  0x1f   : > { %566 = vmatpush.msra.mxu1 %v338_v19  ;;  %1160 = vmatpush.msra.mxu3 %v338_v19  ;;  %v205_v59 = vld [vmem:[%s1310_s29 + $0x88] sm:$0xff]  ;;  %v263_v61 = vld [vmem:[%s1310_s29 + $0x258] sm:$0xff]  ;;  %v206_v62 = vld [vmem:[%s1310_s29 + $0x90] sm:$0xff] }
  0x20   : > { %358 = vmatpush.msra.mxu0 %v321_v20  ;;  %1145 = vmatpush.msra.mxu2 %v321_v20  ;;  %v207_v63 = vld [vmem:[%s1310_s29 + $0x98] sm:$0xff]  ;;  %v264_v0 = vld [vmem:[%s1310_s29 + $0x260] sm:$0xff]  ;;  %v265_v1 = vld [vmem:[%s1310_s29 + $0x268] sm:$0xff] }
  0x21   : > { %567 = vmatpush.msra.mxu1 %v337_v21  ;;  %1161 = vmatpush.msra.mxu3 %v337_v21  ;;  %v208_v2 = vld [vmem:[%s1310_s29 + $0xa0] sm:$0xff]  ;;  %v209_v3 = vld [vmem:[%s1310_s29 + $0xa8] sm:$0xff]  ;;  %v266_v4 = vld [vmem:[%s1310_s29 + $0x270] sm:$0xff] }
  0x22   : > { %359 = vmatpush.msra.mxu0 %v320_v22  ;;  %1146 = vmatpush.msra.mxu2 %v320_v22  ;;  %v267_v5 = vld [vmem:[%s1310_s29 + $0x278] sm:$0xff]  ;;  %v210_v6 = vld [vmem:[%s1310_s29 + $0xb0] sm:$0xff]  ;;  %v268_v8 = vld [vmem:[%s1310_s29 + $0x280] sm:$0xff] }
  0x23   : > { %568 = vmatpush.msra.mxu1 %v336_v23  ;;  %1162 = vmatpush.msra.mxu3 %v336_v23  ;;  %v211_v7 = vld [vmem:[%s1310_s29 + $0xb8] sm:$0xff]  ;;  %v269_v9 = vld [vmem:[%s1310_s29 + $0x288] sm:$0xff]  ;;  %v212_v10 = vld [vmem:[%s1310_s29 + $0xc0] sm:$0xff] }
  0x24   : > { %360 = vmatpush.msra.mxu0 %v319_v24  ;;  %1147 = vmatpush.msra.mxu2 %v319_v24  ;;  %v213_v11 = vld [vmem:[%s1310_s29 + $0xc8] sm:$0xff]  ;;  %v270_v12 = vld [vmem:[%s1310_s29 + $0x290] sm:$0xff]  ;;  %v271_v13 = vld [vmem:[%s1310_s29 + $0x298] sm:$0xff] }
  0x25   : > { %569 = vmatpush.msra.mxu1 %v335_v25  ;;  %1163 = vmatpush.msra.mxu3 %v335_v25  ;;  %v214_v14 = vld [vmem:[%s1310_s29 + $0xd0] sm:$0xff]  ;;  %v215_v15 = vld [vmem:[%s1310_s29 + $0xd8] sm:$0xff]  ;;  %v272_v16 = vld [vmem:[%s1310_s29 + $0x2a0] sm:$0xff] }
  0x26   : > { %361 = vmatpush.msra.mxu0 %v318_v26  ;;  %1148 = vmatpush.msra.mxu2 %v318_v26  ;;  %v273_v17 = vld [vmem:[%s1310_s29 + $0x2a8] sm:$0xff]  ;;  %v216_v18 = vld [vmem:[%s1310_s29 + $0xe0] sm:$0xff]  ;;  %v274_v20 = vld [vmem:[%s1310_s29 + $0x2b0] sm:$0xff] }
  0x27   : > { %570 = vmatpush.msra.mxu1 %v334_v27  ;;  %1164 = vmatpush.msra.mxu3 %v334_v27  ;;  %v217_v19 = vld [vmem:[%s1310_s29 + $0xe8] sm:$0xff]  ;;  %v275_v21 = vld [vmem:[%s1310_s29 + $0x2b8] sm:$0xff]  ;;  %v218_v22 = vld [vmem:[%s1310_s29 + $0xf0] sm:$0xff] }
  0x28   : > { %362 = vmatpush.msra.mxu0 %v317_v28  ;;  %1149 = vmatpush.msra.mxu2 %v317_v28  ;;  %v219_v23 = vld [vmem:[%s1310_s29 + $0xf8] sm:$0xff]  ;;  %v276_v24 = vld [vmem:[%s1310_s29 + $0x2c0] sm:$0xff]  ;;  %v277_v25 = vld [vmem:[%s1310_s29 + $0x2c8] sm:$0xff] }
  0x29   : > { %571 = vmatpush.msra.mxu1 %v333_v29  ;;  %1165 = vmatpush.msra.mxu3 %v333_v29  ;;  %v220_v28 = vld [vmem:[%s1310_s29 + $0x100] sm:$0xff]  ;;  %v221_v29 = vld [vmem:[%s1310_s29 + $0x108] sm:$0xff] }
  0x2a   : > { %363 = vmatpush.msra.mxu0 %v316_v30  ;;  %1150 = vmatpush.msra.mxu2 %v316_v30 }
  0x2b   : > { %572 = vmatpush.msra.mxu1 %v332_v31  ;;  %364 = vmatmul.f32.vlgmr.msra.gmra.mxu0 %v188_v32  ;;  %v279_v32 = vld [vmem:[%s1310_s29 + $0x2d8] sm:$0xff] }
  0x2c   : > { %573 = vmatmul.f32.vlgmr.msra.gmra.mxu1 %v189_v33  ;;  %1166 = vmatpush.msra.mxu3 %v332_v31  ;;  %v278_v31 = vld [vmem:[%s1310_s29 + $0x2d0] sm:$0xff] }
  0x2d   : > { %460 = vmatmul.f32.vlgmr.msra.gmra.mxu2 %v252_v40  ;;  %669 = vmatmul.f32.vlgmr.msra.gmra.mxu3 %v253_v41  ;;  %v280_v41 = vld [vmem:[%s1310_s29 + $0x2e0] sm:$0xff] }
  0x33   : > { %367 = vmatmul.f32.gmra.mxu0 %v190_v34 }
  0x34   : > { %576 = vmatmul.f32.gmra.mxu1 %v191_v35  ;;  %v222_v35 = vld [vmem:[%s1310_s29 + $0x110] sm:$0xff] }
  0x35   : > { %463 = vmatmul.f32.gmra.mxu2 %v254_v44  ;;  %672 = vmatmul.f32.gmra.mxu3 %v255_v45 }
  0x3b   : > { %370 = vmatmul.f32.gmra.mxu0 %v192_v36  ;;  %v223_v36 = vld [vmem:[%s1310_s29 + $0x118] sm:$0xff] }
  0x3c   : > { %579 = vmatmul.f32.gmra.mxu1 %v193_v37 }
  0x3d   : > { %466 = vmatmul.f32.gmra.mxu2 %v256_v48  ;;  %675 = vmatmul.f32.gmra.mxu3 %v257_v49 }
  0x43   : > { %373 = vmatmul.f32.gmra.mxu0 %v194_v38 }
  0x44   : > { %582 = vmatmul.f32.gmra.mxu1 %v195_v39 }
  0x45   : > { %469 = vmatmul.f32.gmra.mxu2 %v258_v52  ;;  %678 = vmatmul.f32.gmra.mxu3 %v259_v53  ;;  %v283_v52 = vld [vmem:[%s1310_s29 + $0x2f8] sm:$0xff] }
  0x4b   : > { %376 = vmatmul.f32.gmra.mxu0 %v196_v42  ;;  %v281_v42 = vld [vmem:[%s1310_s29 + $0x2e8] sm:$0xff] }
  0x4c   : > { %585 = vmatmul.f32.gmra.mxu1 %v197_v43 }
  0x4d   : > { %472 = vmatmul.f32.gmra.mxu2 %v260_v56  ;;  %681 = vmatmul.f32.gmra.mxu3 %v261_v57  ;;  %v226_v56 = vld [vmem:[%s1310_s29 + $0x130] sm:$0xff]  ;;  %v227_v57 = vld [vmem:[%s1310_s29 + $0x138] sm:$0xff] }
  0x53   : > { %379 = vmatmul.f32.gmra.mxu0 %v198_v46  ;;  %v224_v46 = vld [vmem:[%s1310_s29 + $0x120] sm:$0xff] }
  0x54   : > { %588 = vmatmul.f32.gmra.mxu1 %v199_v47  ;;  %v225_v47 = vld [vmem:[%s1310_s29 + $0x128] sm:$0xff] }
  0x55   : > { %475 = vmatmul.f32.gmra.mxu2 %v262_v60  ;;  %684 = vmatmul.f32.gmra.mxu3 %v263_v61  ;;  %v284_v61 = vld [vmem:[%s1310_s29 + $0x300] sm:$0xff] }
  0x5b   : > { %382 = vmatmul.f32.gmra.mxu0 %v200_v50 }
  0x5c   : > { %591 = vmatmul.f32.gmra.mxu1 %v201_v51  ;;  %v282_v51 = vld [vmem:[%s1310_s29 + $0x2f0] sm:$0xff] }
  0x5d   : > { %478 = vmatmul.f32.gmra.mxu2 %v264_v0  ;;  %687 = vmatmul.f32.gmra.mxu3 %v265_v1 }
  0x63   : > { %385 = vmatmul.f32.gmra.mxu0 %v202_v54 }
  0x64   : > { %594 = vmatmul.f32.gmra.mxu1 %v203_v55 }
  0x65   : > { %481 = vmatmul.f32.gmra.mxu2 %v266_v4  ;;  %690 = vmatmul.f32.gmra.mxu3 %v267_v5 }
  0x6b   : > { %388 = vmatmul.f32.gmra.mxu0 %v204_v58 }
  0x6c   : > { %597 = vmatmul.f32.gmra.mxu1 %v205_v59 }
  0x6d   : > { %484 = vmatmul.f32.gmra.mxu2 %v268_v8  ;;  %693 = vmatmul.f32.gmra.mxu3 %v269_v9 }
  0x73   : > { %391 = vmatmul.f32.gmra.mxu0 %v206_v62  ;;  %v285_v62 = vld [vmem:[%s1310_s29 + $0x308] sm:$0xff] }
  0x74   : > { %600 = vmatmul.f32.gmra.mxu1 %v207_v63 }
  0x75   : > { %487 = vmatmul.f32.gmra.mxu2 %v270_v12  ;;  %696 = vmatmul.f32.gmra.mxu3 %v271_v13 }
  0x7b   : > { %394 = vmatmul.f32.gmra.mxu0 %v208_v2  ;;  %v228_v2 = vld [vmem:[%s1310_s29 + $0x140] sm:$0xff] }
  0x7c   : > { %603 = vmatmul.f32.gmra.mxu1 %v209_v3  ;;  %v229_v3 = vld [vmem:[%s1310_s29 + $0x148] sm:$0xff] }
  0x7d   : > { %490 = vmatmul.f32.gmra.mxu2 %v272_v16  ;;  %699 = vmatmul.f32.gmra.mxu3 %v273_v17  ;;  %v231_v16 = vld [vmem:[%s1310_s29 + $0x158] sm:$0xff] }
  0x83   : > { %397 = vmatmul.f32.gmra.mxu0 %v210_v6 }
  0x84   : > { %606 = vmatmul.f32.gmra.mxu1 %v211_v7 }
  0x85   : > { %493 = vmatmul.f32.gmra.mxu2 %v274_v20  ;;  %702 = vmatmul.f32.gmra.mxu3 %v275_v21 }
  0x8b   : > { %400 = vmatmul.f32.gmra.mxu0 %v212_v10  ;;  %v286_v10 = vld [vmem:[%s1310_s29 + $0x310] sm:$0xff] }
  0x8c   : > { %609 = vmatmul.f32.gmra.mxu1 %v213_v11  ;;  %v287_v11 = vld [vmem:[%s1310_s29 + $0x318] sm:$0xff] }
  0x8d   : > { %496 = vmatmul.f32.gmra.mxu2 %v276_v24  ;;  %705 = vmatmul.f32.gmra.mxu3 %v277_v25  ;;  %v289_v24 = vld [vmem:[%s1310_s29 + $0x328] sm:$0xff] }
  0x93   : > { %403 = vmatmul.f32.gmra.mxu0 %v214_v14 }
  0x94   : > { %612 = vmatmul.f32.gmra.mxu1 %v215_v15  ;;  %v230_v15 = vld [vmem:[%s1310_s29 + $0x150] sm:$0xff] }
  0x95   : > { %499 = vmatmul.f32.gmra.mxu2 %v278_v31  ;;  %708 = vmatmul.f32.gmra.mxu3 %v279_v32 }
  0x9b   : > { %406 = vmatmul.f32.gmra.mxu0 %v216_v18 }
  0x9c   : > { %615 = vmatmul.f32.gmra.mxu1 %v217_v19 }
  0x9d   : > { %502 = vmatmul.f32.gmra.mxu2 %v280_v41  ;;  %711 = vmatmul.f32.gmra.mxu3 %v281_v42  ;;  %v234_v41 = vld [vmem:[%s1310_s29 + $0x170] sm:$0xff]  ;;  %v235_v42 = vld [vmem:[%s1310_s29 + $0x178] sm:$0xff] }
  0xa3   : > { %409 = vmatmul.f32.gmra.mxu0 %v218_v22 }
  0xa4   : > { %618 = vmatmul.f32.gmra.mxu1 %v219_v23  ;;  %v288_v23 = vld [vmem:[%s1310_s29 + $0x320] sm:$0xff] }
  0xa5   : > { %505 = vmatmul.f32.gmra.mxu2 %v282_v51  ;;  %714 = vmatmul.f32.gmra.mxu3 %v283_v52 }
  0xa8   : > { %v365_v26 = vpop.f32.mrf.mxu0 }
  0xa9   : > { %v574_v27 = vpop.f32.mrf.mxu1 }
  0xaa   : > { %v575_v30 = vadd.f32 %v574_v27, %v365_v26 }
  0xab   : > { %412 = vmatmul.f32.gmra.mxu0 %v220_v28  ;;  %v232_v28 = vld [vmem:[%s1310_s29 + $0x160] sm:$0xff] }
  0xac   : > { %766 = vst [vmem:[%s1380_s10] sm:$0xff] %v575_v30  ;;  %621 = vmatmul.f32.gmra.mxu1 %v221_v29  ;;  %v900_v38 = vmul.f32 %v575_v30, %v575_v30  ;;  %v233_v29 = vld [vmem:[%s1310_s29 + $0x168] sm:$0xff] }
  0xad   : > { %508 = vmatmul.f32.gmra.mxu2 %v284_v61  ;;  %717 = vmatmul.f32.gmra.mxu3 %v285_v62  ;;  %v294_v62 = vld [vmem:[%s1310_s29 + $0x350] sm:$0xff] }
  0xb0   : > { %v368_v33 = vpop.f32.mrf.mxu0  ;;  %v461_v5 = vpop.f32.mrf.mxu2 }
  0xb1   : > { %v577_v34 = vpop.f32.mrf.mxu1  ;;  %v670_v6 = vpop.f32.mrf.mxu3 }
  0xb2   : > { %v578_v37 = vadd.f32 %v577_v34, %v368_v33  ;;  %v1404_v7 = vadd.f32 %v670_v6, %v461_v5 }
  0xb3   : > { %415 = vmatmul.f32.gmra.mxu0 %v222_v35 }
  0xb4   : > { %767 = vst [vmem:[%s1380_s10 + $0x8] sm:$0xff] %v578_v37  ;;  %v830_v39 = vadd.f32 %v578_v37, %v575_v30  ;;  %v901_v40 = vmul.f32 %v578_v37, %v578_v37  ;;  %624 = vmatmul.f32.gmra.mxu1 %v223_v36  ;;  %v290_v36 = vld [vmem:[%s1310_s29 + $0x330] sm:$0xff]  ;;  %v291_v37 = vld [vmem:[%s1310_s29 + $0x338] sm:$0xff] }
  0xb5   : > { %798 = vst [vmem:[%s1380_s10 + $0x100] sm:$0xff] %v1404_v7  ;;  %511 = vmatmul.f32.gmra.mxu2 %v286_v10  ;;  %720 = vmatmul.f32.gmra.mxu3 %v287_v11 }
  0xb6   : > { %v964_v43 = vadd.f32 %v901_v40, %v900_v38 }
  0xb8   : > { %v371_v44 = vpop.f32.mrf.mxu0  ;;  %v464_v18 = vpop.f32.mrf.mxu2 }
  0xb9   : > { %v580_v45 = vpop.f32.mrf.mxu1  ;;  %v673_v19 = vpop.f32.mrf.mxu3 }
  0xba   : > { %v581_v48 = vadd.f32 %v580_v45, %v371_v44  ;;  %v1413_v20 = vadd.f32 %v673_v19, %v464_v18  ;;  %v241_v18 = vld [vmem:[%s1310_s29 + $0x1a8] sm:$0xff] }
  0xbb   : > { %418 = vmatmul.f32.gmra.mxu0 %v224_v46 }
  0xbc   : > { %768 = vst [vmem:[%s1380_s10 + $0x10] sm:$0xff] %v581_v48  ;;  %v831_v49 = vadd.f32 %v830_v39, %v581_v48  ;;  %v902_v50 = vmul.f32 %v581_v48, %v581_v48  ;;  %627 = vmatmul.f32.gmra.mxu1 %v225_v47 }
  0xbd   : > { %799 = vst [vmem:[%s1380_s10 + $0x108] sm:$0xff] %v1413_v20  ;;  %514 = vmatmul.f32.gmra.mxu2 %v288_v23  ;;  %723 = vmatmul.f32.gmra.mxu3 %v289_v24 }
  0xbe   : > { %v965_v53 = vadd.f32 %v964_v43, %v902_v50  ;;  %v293_v50 = vld [vmem:[%s1310_s29 + $0x348] sm:$0xff] }
  0xc0   : > { %v374_v54 = vpop.f32.mrf.mxu0  ;;  %v467_v31 = vpop.f32.mrf.mxu2 }
  0xc1   : > { %v583_v55 = vpop.f32.mrf.mxu1  ;;  %v676_v32 = vpop.f32.mrf.mxu3 }
  0xc2   : > { %v584_v58 = vadd.f32 %v583_v55, %v374_v54  ;;  %v1422_v33 = vadd.f32 %v676_v32, %v467_v31  ;;  %v236_v54 = vld [vmem:[%s1310_s29 + $0x180] sm:$0xff]  ;;  %v237_v55 = vld [vmem:[%s1310_s29 + $0x188] sm:$0xff]  ;;  %v242_v31 = vld [vmem:[%s1310_s29 + $0x1b0] sm:$0xff] }
  0xc3   : > { %421 = vmatmul.f32.gmra.mxu0 %v226_v56  ;;  %v243_v32 = vld [vmem:[%s1310_s29 + $0x1b8] sm:$0xff] }
  0xc4   : > { %769 = vst [vmem:[%s1380_s10 + $0x18] sm:$0xff] %v584_v58  ;;  %v832_v59 = vadd.f32 %v831_v49, %v584_v58  ;;  %v903_v60 = vmul.f32 %v584_v58, %v584_v58  ;;  %630 = vmatmul.f32.gmra.mxu1 %v227_v57  ;;  %v292_v49 = vld [vmem:[%s1310_s29 + $0x340] sm:$0xff] }
  0xc5   : > { %800 = vst [vmem:[%s1380_s10 + $0x110] sm:$0xff] %v1422_v33  ;;  %517 = vmatmul.f32.gmra.mxu2 %v290_v36  ;;  %726 = vmatmul.f32.gmra.mxu3 %v291_v37 }
  0xc6   : > { %v966_v63 = vadd.f32 %v965_v53, %v903_v60 }
  0xc8   : > { %v377_v0 = vpop.f32.mrf.mxu0  ;;  %v470_v44 = vpop.f32.mrf.mxu2 }
  0xc9   : > { %v586_v1 = vpop.f32.mrf.mxu1  ;;  %v679_v45 = vpop.f32.mrf.mxu3 }
  0xca   : > { %v587_v4 = vadd.f32 %v586_v1, %v377_v0  ;;  %v1431_v46 = vadd.f32 %v679_v45, %v470_v44  ;;  %v244_v45 = vld [vmem:[%s1310_s29 + $0x1c0] sm:$0xff] }
  0xcb   : > { %424 = vmatmul.f32.gmra.mxu0 %v228_v2 }
  0xcc   : > { %770 = vst [vmem:[%s1380_s10 + $0x20] sm:$0xff] %v587_v4  ;;  %v833_v8 = vadd.f32 %v832_v59, %v587_v4  ;;  %v904_v9 = vmul.f32 %v587_v4, %v587_v4  ;;  %633 = vmatmul.f32.gmra.mxu1 %v229_v3  ;;  %v238_v3 = vld [vmem:[%s1310_s29 + $0x190] sm:$0xff]  ;;  %v239_v4 = vld [vmem:[%s1310_s29 + $0x198] sm:$0xff] }
  0xcd   : > { %801 = vst [vmem:[%s1380_s10 + $0x118] sm:$0xff] %v1431_v46  ;;  %520 = vmatmul.f32.gmra.mxu2 %v292_v49  ;;  %729 = vmatmul.f32.gmra.mxu3 %v293_v50 }
  0xce   : > { %v967_v12 = vadd.f32 %v966_v63, %v904_v9  ;;  %v295_v63 = vld [vmem:[%s1310_s29 + $0x358] sm:$0xff] }
  0xd0   : > { %v380_v13 = vpop.f32.mrf.mxu0  ;;  %v473_v57 = vpop.f32.mrf.mxu2 }
  0xd1   : > { %v589_v14 = vpop.f32.mrf.mxu1  ;;  %v682_v58 = vpop.f32.mrf.mxu3 }
  0xd2   : > { %v590_v17 = vadd.f32 %v589_v14, %v380_v13  ;;  %v1440_v59 = vadd.f32 %v682_v58, %v473_v57  ;;  %v297_v13 = vld [vmem:[%s1310_s29 + $0x368] sm:$0xff] }
  0xd3   : > { %427 = vmatmul.f32.gmra.mxu0 %v230_v15 }
  0xd4   : > { %771 = vst [vmem:[%s1380_s10 + $0x28] sm:$0xff] %v590_v17  ;;  %v834_v21 = vadd.f32 %v833_v8, %v590_v17  ;;  %v905_v22 = vmul.f32 %v590_v17, %v590_v17  ;;  %636 = vmatmul.f32.gmra.mxu1 %v231_v16  ;;  %v240_v17 = vld [vmem:[%s1310_s29 + $0x1a0] sm:$0xff] }
  0xd5   : > { %802 = vst [vmem:[%s1380_s10 + $0x120] sm:$0xff] %v1440_v59  ;;  %523 = vmatmul.f32.gmra.mxu2 %v294_v62  ;;  %732 = vmatmul.f32.gmra.mxu3 %v295_v63 }
  0xd6   : > { %v968_v25 = vadd.f32 %v967_v12, %v905_v22  ;;  %v296_v12 = vld [vmem:[%s1310_s29 + $0x360] sm:$0xff] }
  0xd8   : > { %v383_v26 = vpop.f32.mrf.mxu0  ;;  %v476_v6 = vpop.f32.mrf.mxu2 }
  0xd9   : > { %v592_v27 = vpop.f32.mrf.mxu1  ;;  %v685_v8 = vpop.f32.mrf.mxu3 }
  0xda   : > { %v593_v30 = vadd.f32 %v592_v27, %v383_v26  ;;  %v1449_v9 = vadd.f32 %v685_v8, %v476_v6  ;;  %v298_v26 = vld [vmem:[%s1310_s29 + $0x370] sm:$0xff]  ;;  %v299_v27 = vld [vmem:[%s1310_s29 + $0x378] sm:$0xff] }
  0xdb   : > { %430 = vmatmul.f32.gmra.mxu0 %v232_v28 }
  0xdc   : > { %772 = vst [vmem:[%s1380_s10 + $0x30] sm:$0xff] %v593_v30  ;;  %v835_v34 = vadd.f32 %v834_v21, %v593_v30  ;;  %v906_v35 = vmul.f32 %v593_v30, %v593_v30  ;;  %639 = vmatmul.f32.gmra.mxu1 %v233_v29 }
  0xdd   : > { %803 = vst [vmem:[%s1380_s10 + $0x128] sm:$0xff] %v1449_v9  ;;  %526 = vmatmul.f32.gmra.mxu2 %v296_v12  ;;  %735 = vmatmul.f32.gmra.mxu3 %v297_v13  ;;  %v249_v12 = vld [vmem:[%s1310_s29 + $0x1e8] sm:$0xff] }
  0xde   : > { %v969_v38 = vadd.f32 %v968_v25, %v906_v35 }
  0xe0   : > { %v386_v39 = vpop.f32.mrf.mxu0  ;;  %v479_v21 = vpop.f32.mrf.mxu2 }
  0xe1   : > { %v595_v40 = vpop.f32.mrf.mxu1  ;;  %v688_v22 = vpop.f32.mrf.mxu3 }
  0xe2   : > { %v596_v43 = vadd.f32 %v595_v40, %v386_v39  ;;  %v1458_v23 = vadd.f32 %v688_v22, %v479_v21  ;;  %v300_v40 = vld [vmem:[%s1310_s29 + $0x380] sm:$0xff]  ;;  %v307_v21 = vld [vmem:[%s1310_s29 + $0x3b8] sm:$0xff] }
  0xe3   : > { %433 = vmatmul.f32.gmra.mxu0 %v234_v41  ;;  %v301_v41 = vld [vmem:[%s1310_s29 + $0x388] sm:$0xff] }
  0xe4   : > { %773 = vst [vmem:[%s1380_s10 + $0x38] sm:$0xff] %v596_v43  ;;  %v836_v47 = vadd.f32 %v835_v34, %v596_v43  ;;  %v907_v48 = vmul.f32 %v596_v43, %v596_v43  ;;  %642 = vmatmul.f32.gmra.mxu1 %v235_v42 }
  0xe5   : > { %804 = vst [vmem:[%s1380_s10 + $0x130] sm:$0xff] %v1458_v23  ;;  %529 = vmatmul.f32.gmra.mxu2 %v298_v26  ;;  %738 = vmatmul.f32.gmra.mxu3 %v299_v27  ;;  %v250_v26 = vld [vmem:[%s1310_s29 + $0x1f0] sm:$0xff]  ;;  %v251_v27 = vld [vmem:[%s1310_s29 + $0x1f8] sm:$0xff] }
  0xe6   : > { %v970_v51 = vadd.f32 %v969_v38, %v907_v48 }
  0xe8   : > { %v389_v52 = vpop.f32.mrf.mxu0  ;;  %v482_v35 = vpop.f32.mrf.mxu2 }
  0xe9   : > { %v598_v53 = vpop.f32.mrf.mxu1  ;;  %v691_v36 = vpop.f32.mrf.mxu3 }
  0xea   : > { %v599_v56 = vadd.f32 %v598_v53, %v389_v52  ;;  %v1467_v37 = vadd.f32 %v691_v36, %v482_v35  ;;  %v308_v35 = vld [vmem:[%s1310_s29 + $0x3c0] sm:$0xff]  ;;  %v309_v36 = vld [vmem:[%s1310_s29 + $0x3c8] sm:$0xff] }
  0xeb   : > { %436 = vmatmul.f32.gmra.mxu0 %v236_v54  ;;  %v302_v54 = vld [vmem:[%s1310_s29 + $0x390] sm:$0xff] }
  0xec   : > { %774 = vst [vmem:[%s1380_s10 + $0x40] sm:$0xff] %v599_v56  ;;  %v837_v60 = vadd.f32 %v836_v47, %v599_v56  ;;  %v908_v61 = vmul.f32 %v599_v56, %v599_v56  ;;  %645 = vmatmul.f32.gmra.mxu1 %v237_v55  ;;  %v245_v47 = vld [vmem:[%s1310_s29 + $0x1c8] sm:$0xff]  ;;  %v303_v55 = vld [vmem:[%s1310_s29 + $0x398] sm:$0xff] }
  0xed   : > { %805 = vst [vmem:[%s1380_s10 + $0x138] sm:$0xff] %v1467_v37  ;;  %532 = vmatmul.f32.gmra.mxu2 %v300_v40  ;;  %741 = vmatmul.f32.gmra.mxu3 %v301_v41 }
  0xee   : > { %v971_v0 = vadd.f32 %v970_v51, %v908_v61  ;;  %v247_v61 = vld [vmem:[%s1310_s29 + $0x1d8] sm:$0xff] }
  0xf0   : > { %v392_v1 = vpop.f32.mrf.mxu0  ;;  %v485_v49 = vpop.f32.mrf.mxu2 }
  0xf1   : > { %v601_v2 = vpop.f32.mrf.mxu1  ;;  %v694_v50 = vpop.f32.mrf.mxu3 }
  0xf2   : > { %v602_v5 = vadd.f32 %v601_v2, %v392_v1  ;;  %v1476_v51 = vadd.f32 %v694_v50, %v485_v49  ;;  %v311_v49 = vld [vmem:[%s1310_s29 + $0x3d8] sm:$0xff] }
  0xf3   : > { %439 = vmatmul.f32.gmra.mxu0 %v238_v3 }
  0xf4   : > { %775 = vst [vmem:[%s1380_s10 + $0x48] sm:$0xff] %v602_v5  ;;  %v838_v10 = vadd.f32 %v837_v60, %v602_v5  ;;  %v909_v11 = vmul.f32 %v602_v5, %v602_v5  ;;  %648 = vmatmul.f32.gmra.mxu1 %v239_v4  ;;  %v246_v60 = vld [vmem:[%s1310_s29 + $0x1d0] sm:$0xff]  ;;  %v304_v4 = vld [vmem:[%s1310_s29 + $0x3a0] sm:$0xff]  ;;  %v305_v5 = vld [vmem:[%s1310_s29 + $0x3a8] sm:$0xff] }
  0xf5   : > { %806 = vst [vmem:[%s1380_s10 + $0x140] sm:$0xff] %v1476_v51  ;;  %535 = vmatmul.f32.gmra.mxu2 %v302_v54  ;;  %744 = vmatmul.f32.gmra.mxu3 %v303_v55 }
  0xf6   : > { %v972_v14 = vadd.f32 %v971_v0, %v909_v11  ;;  %v248_v11 = vld [vmem:[%s1310_s29 + $0x1e0] sm:$0xff] }
  0xf8   : > { %v395_v15 = vpop.f32.mrf.mxu0  ;;  %v488_v63 = vpop.f32.mrf.mxu2 }
  0xf9   : > { %v604_v16 = vpop.f32.mrf.mxu1  ;;  %v697_v0 = vpop.f32.mrf.mxu3 }
  0xfa   : > { %v605_v19 = vadd.f32 %v604_v16, %v395_v15  ;;  %v1485_v1 = vadd.f32 %v697_v0, %v488_v63 }
  0xfb   : > { %442 = vmatmul.f32.gmra.mxu0 %v240_v17 }
  0xfc   : > { %776 = vst [vmem:[%s1380_s10 + $0x50] sm:$0xff] %v605_v19  ;;  %v839_v24 = vadd.f32 %v838_v10, %v605_v19  ;;  %v910_v25 = vmul.f32 %v605_v19, %v605_v19  ;;  %651 = vmatmul.f32.gmra.mxu1 %v241_v18  ;;  %v306_v19 = vld [vmem:[%s1310_s29 + $0x3b0] sm:$0xff] }
  0xfd   : > { %807 = vst [vmem:[%s1380_s10 + $0x148] sm:$0xff] %v1485_v1  ;;  %538 = vmatmul.f32.gmra.mxu2 %v304_v4  ;;  %747 = vmatmul.f32.gmra.mxu3 %v305_v5 }
  0xfe   : > { %v973_v28 = vadd.f32 %v972_v14, %v910_v25 }
 0x100   : > { %v398_v29 = vpop.f32.mrf.mxu0  ;;  %v491_v14 = vpop.f32.mrf.mxu2 }
 0x101   : > { %v607_v30 = vpop.f32.mrf.mxu1  ;;  %v700_v15 = vpop.f32.mrf.mxu3 }
 0x102   : > { %v608_v34 = vadd.f32 %v607_v30, %v398_v29  ;;  %v1494_v16 = vadd.f32 %v700_v15, %v491_v14 }
 0x103   : > { %445 = vmatmul.f32.gmra.mxu0 %v242_v31 }
 0x104   : > { %777 = vst [vmem:[%s1380_s10 + $0x58] sm:$0xff] %v608_v34  ;;  %v840_v38 = vadd.f32 %v839_v24, %v608_v34  ;;  %v911_v39 = vmul.f32 %v608_v34, %v608_v34  ;;  %654 = vmatmul.f32.gmra.mxu1 %v243_v32 }
 0x105   : > { %808 = vst [vmem:[%s1380_s10 + $0x150] sm:$0xff] %v1494_v16  ;;  %541 = vmatmul.f32.gmra.mxu2 %v306_v19  ;;  %750 = vmatmul.f32.gmra.mxu3 %v307_v21 }
 0x106   : > { %v974_v42 = vadd.f32 %v973_v28, %v911_v39 }
 0x108   : > { %v401_v43 = vpop.f32.mrf.mxu0  ;;  %v494_v29 = vpop.f32.mrf.mxu2 }
 0x109   : > { %v610_v44 = vpop.f32.mrf.mxu1  ;;  %v703_v30 = vpop.f32.mrf.mxu3 }
 0x10a   : > { %v611_v48 = vadd.f32 %v610_v44, %v401_v43  ;;  %v1503_v31 = vadd.f32 %v703_v30, %v494_v29 }
 0x10b   : > { %448 = vmatmul.f32.gmra.mxu0 %v244_v45 }
 0x10c   : > { %778 = vst [vmem:[%s1380_s10 + $0x60] sm:$0xff] %v611_v48  ;;  %v841_v52 = vadd.f32 %v840_v38, %v611_v48  ;;  %v912_v53 = vmul.f32 %v611_v48, %v611_v48  ;;  %657 = vmatmul.f32.gmra.mxu1 %v245_v47  ;;  %v310_v48 = vld [vmem:[%s1310_s29 + $0x3d0] sm:$0xff] }
 0x10d   : > { %809 = vst [vmem:[%s1380_s10 + $0x158] sm:$0xff] %v1503_v31  ;;  %544 = vmatmul.f32.gmra.mxu2 %v308_v35  ;;  %753 = vmatmul.f32.gmra.mxu3 %v309_v36 }
 0x10e   : > { %v975_v56 = vadd.f32 %v974_v42, %v912_v53 }
 0x110   : > { %v404_v57 = vpop.f32.mrf.mxu0  ;;  %v497_v42 = vpop.f32.mrf.mxu2 }
 0x111   : > { %v613_v58 = vpop.f32.mrf.mxu1  ;;  %v706_v43 = vpop.f32.mrf.mxu3 }
 0x112   : > { %v614_v62 = vadd.f32 %v613_v58, %v404_v57  ;;  %v1510_v44 = vadd.f32 %v706_v43, %v497_v42 }
 0x113   : > { %451 = vmatmul.f32.gmra.mxu0 %v246_v60 }
 0x114   : > { %779 = vst [vmem:[%s1380_s10 + $0x68] sm:$0xff] %v614_v62  ;;  %v842_v2 = vadd.f32 %v841_v52, %v614_v62  ;;  %v913_v3 = vmul.f32 %v614_v62, %v614_v62  ;;  %660 = vmatmul.f32.gmra.mxu1 %v247_v61  ;;  %v312_v61 = vld [vmem:[%s1310_s29 + $0x3e0] sm:$0xff]  ;;  %v313_v62 = vld [vmem:[%s1310_s29 + $0x3e8] sm:$0xff] }
 0x115   : > { %810 = vst [vmem:[%s1380_s10 + $0x160] sm:$0xff] %v1510_v44  ;;  %547 = vmatmul.f32.gmra.mxu2 %v310_v48  ;;  %756 = vmatmul.f32.gmra.mxu3 %v311_v49 }
 0x116   : > { %v976_v6 = vadd.f32 %v975_v56, %v913_v3 }
 0x118   : > { %v407_v8 = vpop.f32.mrf.mxu0  ;;  %v500_v55 = vpop.f32.mrf.mxu2 }
 0x119   : > { %v616_v10 = vpop.f32.mrf.mxu1  ;;  %v709_v56 = vpop.f32.mrf.mxu3 }
 0x11a   : > { %v617_v13 = vadd.f32 %v616_v10, %v407_v8  ;;  %v1517_v57 = vadd.f32 %v709_v56, %v500_v55 }
 0x11b   : > { %454 = vmatmul.f32.gmra.mxu0 %v248_v11  ;;  %v314_v11 = vld [vmem:[%s1310_s29 + $0x3f0] sm:$0xff] }
 0x11c   : > { %780 = vst [vmem:[%s1380_s10 + $0x70] sm:$0xff] %v617_v13  ;;  %v843_v17 = vadd.f32 %v842_v2, %v617_v13  ;;  %v914_v18 = vmul.f32 %v617_v13, %v617_v13  ;;  %663 = vmatmul.f32.gmra.mxu1 %v249_v12  ;;  %v315_v12 = vld [vmem:[%s1310_s29 + $0x3f8] sm:$0xff] }
 0x11d   : > { %811 = vst [vmem:[%s1380_s10 + $0x168] sm:$0xff] %v1517_v57  ;;  %550 = vmatmul.f32.gmra.mxu2 %v312_v61  ;;  %759 = vmatmul.f32.gmra.mxu3 %v313_v62 }
 0x11e   : > { %v977_v22 = vadd.f32 %v976_v6, %v914_v18 }
 0x120   : > { %v410_v24 = vpop.f32.mrf.mxu0  ;;  %v503_v4 = vpop.f32.mrf.mxu2 }
 0x121   : > { %v619_v25 = vpop.f32.mrf.mxu1  ;;  %v712_v5 = vpop.f32.mrf.mxu3 }
 0x122   : > { %v620_v28 = vadd.f32 %v619_v25, %v410_v24  ;;  %v1524_v6 = vadd.f32 %v712_v5, %v503_v4 }
 0x123   : > { %457 = vmatmul.f32.gmra.mxu0 %v250_v26 }
 0x124   : > { %781 = vst [vmem:[%s1380_s10 + $0x78] sm:$0xff] %v620_v28  ;;  %v844_v32 = vadd.f32 %v843_v17, %v620_v28  ;;  %v915_v34 = vmul.f32 %v620_v28, %v620_v28  ;;  %666 = vmatmul.f32.gmra.mxu1 %v251_v27 }
 0x125   : > { %812 = vst [vmem:[%s1380_s10 + $0x170] sm:$0xff] %v1524_v6  ;;  %553 = vmatmul.f32.gmra.mxu2 %v314_v11  ;;  %762 = vmatmul.f32.gmra.mxu3 %v315_v12 }
 0x126   : > { %v978_v38 = vadd.f32 %v977_v22, %v915_v34 }
 0x128   : > { %v413_v39 = vpop.f32.mrf.mxu0  ;;  %v506_v18 = vpop.f32.mrf.mxu2 }
 0x129   : > { %v622_v40 = vpop.f32.mrf.mxu1  ;;  %v715_v19 = vpop.f32.mrf.mxu3 }
 0x12a   : > { %v623_v41 = vadd.f32 %v622_v40, %v413_v39  ;;  %v1531_v21 = vadd.f32 %v715_v19, %v506_v18 }
 0x12c   : > { %782 = vst [vmem:[%s1380_s10 + $0x80] sm:$0xff] %v623_v41  ;;  %v845_v45 = vadd.f32 %v844_v32, %v623_v41  ;;  %v916_v47 = vmul.f32 %v623_v41, %v623_v41 }
 0x12d   : > { %813 = vst [vmem:[%s1380_s10 + $0x178] sm:$0xff] %v1531_v21 }
 0x12e   : > { %v979_v50 = vadd.f32 %v978_v38, %v916_v47 }
 0x130   : > { %v416_v52 = vpop.f32.mrf.mxu0  ;;  %v509_v29 = vpop.f32.mrf.mxu2 }
 0x131   : > { %v625_v53 = vpop.f32.mrf.mxu1  ;;  %v718_v30 = vpop.f32.mrf.mxu3 }
 0x132   : > { %v626_v54 = vadd.f32 %v625_v53, %v416_v52  ;;  %v1536_v32 = vadd.f32 %v718_v30, %v509_v29 }
 0x134   : > { %783 = vst [vmem:[%s1380_s10 + $0x88] sm:$0xff] %v626_v54  ;;  %v846_v58 = vadd.f32 %v845_v45, %v626_v54  ;;  %v917_v60 = vmul.f32 %v626_v54, %v626_v54 }
 0x135   : > { %814 = vst [vmem:[%s1380_s10 + $0x180] sm:$0xff] %v1536_v32 }
 0x136   : > { %v980_v63 = vadd.f32 %v979_v50, %v917_v60 }
 0x138   : > { %v419_v0 = vpop.f32.mrf.mxu0  ;;  %v512_v41 = vpop.f32.mrf.mxu2 }
 0x139   : > { %v628_v2 = vpop.f32.mrf.mxu1  ;;  %v721_v42 = vpop.f32.mrf.mxu3 }
 0x13a   : > { %v629_v3 = vadd.f32 %v628_v2, %v419_v0  ;;  %v1547_v43 = vadd.f32 %v721_v42, %v512_v41 }
 0x13c   : > { %784 = vst [vmem:[%s1380_s10 + $0x90] sm:$0xff] %v629_v3  ;;  %v847_v8 = vadd.f32 %v846_v58, %v629_v3  ;;  %v918_v10 = vmul.f32 %v629_v3, %v629_v3 }
 0x13d   : > { %815 = vst [vmem:[%s1380_s10 + $0x188] sm:$0xff] %v1547_v43 }
 0x13e   : > { %v981_v13 = vadd.f32 %v980_v63, %v918_v10 }
 0x140   : > { %v422_v14 = vpop.f32.mrf.mxu0  ;;  %v515_v49 = vpop.f32.mrf.mxu2 }
 0x141   : > { %v631_v15 = vpop.f32.mrf.mxu1  ;;  %v724_v50 = vpop.f32.mrf.mxu3 }
 0x142   : > { %v632_v17 = vadd.f32 %v631_v15, %v422_v14  ;;  %v1553_v52 = vadd.f32 %v724_v50, %v515_v49 }
 0x144   : > { %785 = vst [vmem:[%s1380_s10 + $0x98] sm:$0xff] %v632_v17  ;;  %v848_v22 = vadd.f32 %v847_v8, %v632_v17  ;;  %v919_v24 = vmul.f32 %v632_v17, %v632_v17 }
 0x145   : > { %816 = vst [vmem:[%s1380_s10 + $0x190] sm:$0xff] %v1553_v52 }
 0x146   : > { %v982_v25 = vadd.f32 %v981_v13, %v919_v24 }
 0x148   : > { %v425_v26 = vpop.f32.mrf.mxu0  ;;  %v518_v56 = vpop.f32.mrf.mxu2 }
 0x149   : > { %v634_v27 = vpop.f32.mrf.mxu1  ;;  %v727_v58 = vpop.f32.mrf.mxu3 }
 0x14a   : > { %v635_v28 = vadd.f32 %v634_v27, %v425_v26  ;;  %v1558_v60 = vadd.f32 %v727_v58, %v518_v56 }
 0x14c   : > { %786 = vst [vmem:[%s1380_s10 + $0xa0] sm:$0xff] %v635_v28  ;;  %v1539_v34 = vadd.f32 %v848_v22, %v635_v28  ;;  %v920_v35 = vmul.f32 %v635_v28, %v635_v28 }
 0x14d   : > { %817 = vst [vmem:[%s1380_s10 + $0x198] sm:$0xff] %v1558_v60 }
 0x14e   : > { %v1543_v36 = vadd.f32 %v982_v25, %v920_v35 }
 0x150   : > { %v428_v38 = vpop.f32.mrf.mxu0  ;;  %v521_v0 = vpop.f32.mrf.mxu2 }
 0x151   : > { %v637_v39 = vpop.f32.mrf.mxu1  ;;  %v730_v2 = vpop.f32.mrf.mxu3 }
 0x152   : > { %v1545_v40 = vadd.f32 %v637_v39, %v428_v38  ;;  %v1563_v3 = vadd.f32 %v730_v2, %v521_v0 }
 0x154   : > { %787 = vst [vmem:[%s1380_s10 + $0xa8] sm:$0xff] %v1545_v40  ;;  %v921_v42 = vmul.f32 %v1545_v40, %v1545_v40 }
 0x155   : > { %818 = vst [vmem:[%s1380_s10 + $0x1a0] sm:$0xff] %v1563_v3 }
 0x158   : > { %v431_v45 = vpop.f32.mrf.mxu0  ;;  %v524_v10 = vpop.f32.mrf.mxu2 }
 0x159   : > { %v640_v47 = vpop.f32.mrf.mxu1  ;;  %v733_v11 = vpop.f32.mrf.mxu3 }
 0x15a   : > { %v641_v48 = vadd.f32 %v640_v47, %v431_v45  ;;  %v1568_v12 = vadd.f32 %v733_v11, %v524_v10  ;;  %v850_v45 = vadd.f32 %v1539_v34, %v1545_v40 }
 0x15c   : > { %788 = vst [vmem:[%s1380_s10 + $0xb0] sm:$0xff] %v641_v48  ;;  %v922_v47 = vmul.f32 %v641_v48, %v641_v48 }
 0x15d   : > { %819 = vst [vmem:[%s1380_s10 + $0x1a8] sm:$0xff] %v1568_v12 }
 0x160   : > { %v434_v53 = vpop.f32.mrf.mxu0  ;;  %v527_v17 = vpop.f32.mrf.mxu2 }
 0x161   : > { %v643_v54 = vpop.f32.mrf.mxu1  ;;  %v736_v18 = vpop.f32.mrf.mxu3 }
 0x162   : > { %v644_v55 = vadd.f32 %v643_v54, %v434_v53  ;;  %v1573_v19 = vadd.f32 %v736_v18, %v527_v17  ;;  %v984_v53 = vadd.f32 %v1543_v36, %v921_v42  ;;  %v851_v54 = vadd.f32 %v850_v45, %v641_v48 }
 0x164   : > { %789 = vst [vmem:[%s1380_s10 + $0xb8] sm:$0xff] %v644_v55  ;;  %v923_v56 = vmul.f32 %v644_v55, %v644_v55  ;;  %v985_v2 = vadd.f32 %v984_v53, %v922_v47 }
 0x165   : > { %820 = vst [vmem:[%s1380_s10 + $0x1b0] sm:$0xff] %v1573_v19 }
 0x166   : > { %v986_v10 = vadd.f32 %v985_v2, %v923_v56 }
 0x168   : > { %v437_v61 = vpop.f32.mrf.mxu0  ;;  %v530_v26 = vpop.f32.mrf.mxu2 }
 0x169   : > { %v646_v62 = vpop.f32.mrf.mxu1  ;;  %v739_v27 = vpop.f32.mrf.mxu3 }
 0x16a   : > { %v647_v63 = vadd.f32 %v646_v62, %v437_v61  ;;  %v1578_v28 = vadd.f32 %v739_v27, %v530_v26 }
 0x16c   : > { %790 = vst [vmem:[%s1380_s10 + $0xc0] sm:$0xff] %v647_v63 }
 0x16d   : > { %821 = vst [vmem:[%s1380_s10 + $0x1b8] sm:$0xff] %v1578_v28 }
 0x170   : > { %v440_v4 = vpop.f32.mrf.mxu0  ;;  %v533_v38 = vpop.f32.mrf.mxu2 }
 0x171   : > { %v649_v5 = vpop.f32.mrf.mxu1  ;;  %v742_v39 = vpop.f32.mrf.mxu3 }
 0x172   : > { %v650_v8 = vadd.f32 %v649_v5, %v440_v4  ;;  %v1583_v41 = vadd.f32 %v742_v39, %v533_v38  ;;  %v852_v4 = vadd.f32 %v851_v54, %v644_v55  ;;  %v924_v5 = vmul.f32 %v647_v63, %v647_v63 }
 0x174   : > { %791 = vst [vmem:[%s1380_s10 + $0xc8] sm:$0xff] %v650_v8  ;;  %v853_v34 = vadd.f32 %v852_v4, %v647_v63  ;;  %v925_v40 = vmul.f32 %v650_v8, %v650_v8  ;;  %v987_v11 = vadd.f32 %v986_v10, %v924_v5  ;;  %v933_v10 = vmul.f32 %v1413_v20, %v1413_v20 }
 0x175   : > { %822 = vst [vmem:[%s1380_s10 + $0x1c0] sm:$0xff] %v1583_v41 }
 0x176   : > { %v854_v36 = vadd.f32 %v853_v34, %v650_v8  ;;  %v988_v17 = vadd.f32 %v987_v11, %v925_v40  ;;  %v934_v11 = vmul.f32 %v1422_v33, %v1422_v33 }
 0x178   : > { %v443_v13 = vpop.f32.mrf.mxu0  ;;  %v536_v61 = vpop.f32.mrf.mxu2 }
 0x179   : > { %v652_v14 = vpop.f32.mrf.mxu1  ;;  %v745_v62 = vpop.f32.mrf.mxu3 }
 0x17a   : > { %v653_v15 = vadd.f32 %v652_v14, %v443_v13  ;;  %v1593_v0 = vadd.f32 %v745_v62, %v536_v61 }
 0x17c   : > { %792 = vst [vmem:[%s1380_s10 + $0xd0] sm:$0xff] %v653_v15  ;;  %v926_v48 = vmul.f32 %v653_v15, %v653_v15  ;;  %v855_v18 = vadd.f32 %v854_v36, %v653_v15 }
 0x17d   : > { %823 = vst [vmem:[%s1380_s10 + $0x1c8] sm:$0xff] %v1593_v0 }
 0x180   : > { %v446_v22 = vpop.f32.mrf.mxu0  ;;  %v539_v26 = vpop.f32.mrf.mxu2 }
 0x181   : > { %v655_v24 = vpop.f32.mrf.mxu1  ;;  %v748_v55 = vpop.f32.mrf.mxu3 }
 0x182   : > { %v656_v25 = vadd.f32 %v655_v24, %v446_v22  ;;  %v1598_v27 = vadd.f32 %v748_v55, %v539_v26  ;;  %v937_v26 = vmul.f32 %v1449_v9, %v1449_v9 }
 0x184   : > { %793 = vst [vmem:[%s1380_s10 + $0xd8] sm:$0xff] %v656_v25  ;;  %v927_v22 = vmul.f32 %v656_v25, %v656_v25 }
 0x185   : > { %824 = vst [vmem:[%s1380_s10 + $0x1d0] sm:$0xff] %v1598_v27 }
 0x188   : > { %v449_v29 = vpop.f32.mrf.mxu0  ;;  %v542_v56 = vpop.f32.mrf.mxu2 }
 0x189   : > { %v658_v30 = vpop.f32.mrf.mxu1  ;;  %v751_v61 = vpop.f32.mrf.mxu3 }
 0x18a   : > { %v659_v35 = vadd.f32 %v658_v30, %v449_v29  ;;  %v989_v29 = vadd.f32 %v988_v17, %v926_v48  ;;  %v856_v30 = vadd.f32 %v855_v18, %v656_v25  ;;  %v1603_v25 = vadd.f32 %v751_v61, %v542_v56 }
 0x18c   : > { %794 = vst [vmem:[%s1380_s10 + $0xe0] sm:$0xff] %v659_v35  ;;  %v928_v38 = vmul.f32 %v659_v35, %v659_v35  ;;  %v990_v63 = vadd.f32 %v989_v29, %v927_v22  ;;  %v857_v8 = vadd.f32 %v856_v30, %v659_v35  ;;  %v932_v35 = vmul.f32 %v1404_v7, %v1404_v7 }
 0x18d   : > { %825 = vst [vmem:[%s1380_s10 + $0x1d8] sm:$0xff] %v1603_v25  ;;  %v938_v30 = vmul.f32 %v1458_v23, %v1458_v23 }
 0x18e   : > { %v991_v42 = vadd.f32 %v990_v63, %v928_v38 }
 0x190   : > { %v452_v49 = vpop.f32.mrf.mxu0 }
 0x191   : > { %v661_v50 = vpop.f32.mrf.mxu1 }
 0x192   : > { %v662_v58 = vadd.f32 %v661_v50, %v452_v49 }
 0x194   : > { %795 = vst [vmem:[%s1380_s10 + $0xe8] sm:$0xff] %v662_v58  ;;  %v929_v39 = vmul.f32 %v662_v58, %v662_v58  ;;  %v858_v45 = vadd.f32 %v857_v8, %v662_v58 }
 0x196   : > { %v992_v50 = vadd.f32 %v991_v42, %v929_v39 }
 0x198   : > { %v455_v13 = vpop.f32.mrf.mxu0 }
 0x199   : > { %v664_v14 = vpop.f32.mrf.mxu1 }
 0x19a   : > { %v665_v24 = vadd.f32 %v664_v14, %v455_v13  ;;  %v545_v13 = vpop.f32.mrf.mxu2  ;;  %v754_v14 = vpop.f32.mrf.mxu3 }
 0x19b   : > { %v1617_v17 = vadd.f32 %v754_v14, %v545_v13  ;;  %v947_v13 = vmul.f32 %v1531_v21, %v1531_v21 }
 0x19c   : > { %796 = vst [vmem:[%s1380_s10 + $0xf0] sm:$0xff] %v665_v24  ;;  %v930_v15 = vmul.f32 %v665_v24, %v665_v24  ;;  %v859_v53 = vadd.f32 %v858_v45, %v665_v24 }
 0x19d   : > { %826 = vst [vmem:[%s1380_s10 + $0x1e0] sm:$0xff] %v1617_v17 }
 0x19e   : > { %v993_v62 = vadd.f32 %v992_v50, %v930_v15 }
 0x1a0   : > { %v458_v47 = vpop.f32.mrf.mxu0 }
 0x1a1   : > { %v667_v49 = vpop.f32.mrf.mxu1 }
 0x1a2   : > { %v668_v54 = vadd.f32 %v667_v49, %v458_v47  ;;  %v548_v63 = vpop.f32.mrf.mxu2  ;;  %v757_v8 = vpop.f32.mrf.mxu3  ;;  %v941_v47 = vmul.f32 %v1485_v1, %v1485_v1 }
 0x1a3   : > { %v1633_v39 = vadd.f32 %v757_v8, %v548_v63 }
 0x1a4   : > { %797 = vst [vmem:[%s1380_s10 + $0xf8] sm:$0xff] %v668_v54  ;;  %v860_v2 = vadd.f32 %v859_v53, %v668_v54  ;;  %v931_v4 = vmul.f32 %v668_v54, %v668_v54  ;;  %v942_v53 = vmul.f32 %v1494_v16, %v1494_v16 }
 0x1a5   : > { %827 = vst [vmem:[%s1380_s10 + $0x1e8] sm:$0xff] %v1633_v39 }
 0x1a6   : > { %v861_v58 = vadd.f32 %v860_v2, %v1404_v7  ;;  %v994_v5 = vadd.f32 %v993_v62, %v931_v4  ;;  %v935_v7 = vmul.f32 %v1431_v46, %v1431_v46 }
 0x1a8   : > { %v862_v34 = vadd.f32 %v861_v58, %v1413_v20  ;;  %v995_v40 = vadd.f32 %v994_v5, %v932_v35  ;;  %v936_v20 = vmul.f32 %v1440_v59, %v1440_v59  ;;  %v945_v58 = vmul.f32 %v1517_v57, %v1517_v57 }
 0x1aa   : > { %v863_v36 = vadd.f32 %v862_v34, %v1422_v33  ;;  %v996_v48 = vadd.f32 %v995_v40, %v933_v10  ;;  %v551_v56 = vpop.f32.mrf.mxu2  ;;  %v760_v61 = vpop.f32.mrf.mxu3  ;;  %v946_v34 = vmul.f32 %v1524_v6, %v1524_v6 }
 0x1ab   : > { %v1649_v62 = vadd.f32 %v760_v61, %v551_v56 }
 0x1ac   : > { %v864_v18 = vadd.f32 %v863_v36, %v1431_v46  ;;  %v997_v22 = vadd.f32 %v996_v48, %v934_v11 }
 0x1ad   : > { %828 = vst [vmem:[%s1380_s10 + $0x1f0] sm:$0xff] %v1649_v62 }
 0x1ae   : > { %v865_v24 = vadd.f32 %v864_v18, %v1440_v59  ;;  %v998_v33 = vadd.f32 %v997_v22, %v935_v7  ;;  %v939_v59 = vmul.f32 %v1467_v37, %v1467_v37 }
 0x1b0   : > { %v866_v55 = vadd.f32 %v865_v24, %v1449_v9  ;;  %v999_v29 = vadd.f32 %v998_v33, %v936_v20  ;;  %v940_v9 = vmul.f32 %v1476_v51, %v1476_v51  ;;  %v950_v24 = vmul.f32 %v1553_v52, %v1553_v52 }
 0x1b2   : > { %v867_v46 = vadd.f32 %v866_v55, %v1458_v23  ;;  %v1000_v38 = vadd.f32 %v999_v29, %v937_v26  ;;  %v554_v11 = vpop.f32.mrf.mxu2  ;;  %v763_v36 = vpop.f32.mrf.mxu3  ;;  %v951_v26 = vmul.f32 %v1558_v60, %v1558_v60 }
 0x1b3   : > { %v764_v48 = vadd.f32 %v763_v36, %v554_v11 }
 0x1b4   : > { %v868_v42 = vadd.f32 %v867_v46, %v1467_v37  ;;  %v1001_v45 = vadd.f32 %v1000_v38, %v938_v30 }
 0x1b5   : > { %829 = vst [vmem:[%s1380_s10 + $0x1f8] sm:$0xff] %v764_v48 }
 0x1b6   : > { %v869_v15 = vadd.f32 %v868_v42, %v1476_v51  ;;  %v1002_v23 = vadd.f32 %v1001_v45, %v939_v59  ;;  %v943_v51 = vmul.f32 %v1503_v31, %v1503_v31  ;;  %v955_v42 = vmul.f32 %v1578_v28, %v1578_v28 }
 0x1b8   : > { %v870_v49 = vadd.f32 %v869_v15, %v1485_v1  ;;  %v1003_v50 = vadd.f32 %v1002_v23, %v940_v9  ;;  %v944_v1 = vmul.f32 %v1510_v44, %v1510_v44  ;;  %v956_v15 = vmul.f32 %v1583_v41, %v1583_v41 }
 0x1ba   : > { %v871_v37 = vadd.f32 %v870_v49, %v1494_v16  ;;  %v1004_v54 = vadd.f32 %v1003_v50, %v941_v47  ;;  %v957_v47 = vmul.f32 %v1593_v0, %v1593_v0 }
 0x1bc   : > { %v1005_v2 = vadd.f32 %v1004_v54, %v942_v53  ;;  %v872_v4 = vadd.f32 %v871_v37, %v1503_v31  ;;  %v959_v37 = vmul.f32 %v1603_v25, %v1603_v25 }
 0x1be   : > { %v873_v35 = vadd.f32 %v872_v4, %v1510_v44  ;;  %v1006_v16 = vadd.f32 %v1005_v2, %v943_v51  ;;  %v961_v51 = vmul.f32 %v1633_v39, %v1633_v39  ;;  %v962_v4 = vmul.f32 %v1649_v62, %v1649_v62 }
 0x1c0   : > { %v874_v5 = vadd.f32 %v873_v35, %v1517_v57  ;;  %v1007_v10 = vadd.f32 %v1006_v16, %v944_v1  ;;  %v948_v57 = vmul.f32 %v1536_v32, %v1536_v32 }
 0x1c2   : > { %v875_v31 = vadd.f32 %v874_v5, %v1524_v6  ;;  %v1008_v40 = vadd.f32 %v1007_v10, %v945_v58  ;;  %v949_v6 = vmul.f32 %v1547_v43, %v1547_v43 }
 0x1c4   : > { %v876_v44 = vadd.f32 %v875_v31, %v1531_v21  ;;  %v1009_v14 = vadd.f32 %v1008_v40, %v946_v34 }
 0x1c6   : > { %v877_v7 = vadd.f32 %v876_v44, %v1536_v32  ;;  %v1010_v18 = vadd.f32 %v1009_v14, %v947_v13  ;;  %v952_v32 = vmul.f32 %v1563_v3, %v1563_v3 }
 0x1c8   : > { %v878_v22 = vadd.f32 %v877_v7, %v1547_v43  ;;  %v1011_v20 = vadd.f32 %v1010_v18, %v948_v57  ;;  %v953_v43 = vmul.f32 %v1568_v12, %v1568_v12 }
 0x1ca   : > { %v879_v33 = vadd.f32 %v878_v22, %v1553_v52  ;;  %v1012_v21 = vadd.f32 %v1011_v20, %v949_v6  ;;  %v954_v52 = vmul.f32 %v1573_v19, %v1573_v19 }
 0x1cc   : > { %v880_v55 = vadd.f32 %v879_v33, %v1558_v60  ;;  %v1013_v29 = vadd.f32 %v1012_v21, %v950_v24 }
 0x1ce   : > { %v881_v30 = vadd.f32 %v880_v55, %v1563_v3  ;;  %v1014_v46 = vadd.f32 %v1013_v29, %v951_v26 }
 0x1d0   : > { %v882_v38 = vadd.f32 %v881_v30, %v1568_v12  ;;  %v1015_v63 = vadd.f32 %v1014_v46, %v952_v32 }
 0x1d2   : > { %v883_v8 = vadd.f32 %v882_v38, %v1573_v19  ;;  %v1016_v59 = vadd.f32 %v1015_v63, %v953_v43 }
 0x1d4   : > { %v884_v60 = vadd.f32 %v883_v8, %v1578_v28  ;;  %v1017_v45 = vadd.f32 %v1016_v59, %v954_v52  ;;  %v958_v28 = vmul.f32 %v1598_v27, %v1598_v27 }
 0x1d6   : > { %v1018_v3 = vadd.f32 %v1017_v45, %v955_v42  ;;  %v885_v9 = vadd.f32 %v884_v60, %v1583_v41 }
 0x1d8   : > { %v1019_v12 = vadd.f32 %v1018_v3, %v956_v15  ;;  %v886_v23 = vadd.f32 %v885_v9, %v1593_v0  ;;  %v960_v0 = vmul.f32 %v1617_v17, %v1617_v17 }
 0x1da   : > { %v1020_v19 = vadd.f32 %v1019_v12, %v957_v47  ;;  %v887_v49 = vadd.f32 %v886_v23, %v1598_v27 }
 0x1dc   : > { %v1021_v50 = vadd.f32 %v1020_v19, %v958_v28  ;;  %v888_v53 = vadd.f32 %v887_v49, %v1603_v25  ;;  %v963_v25 = vmul.f32 %v764_v48, %v764_v48 }
 0x1de   : > { %v1022_v41 = vadd.f32 %v1021_v50, %v959_v37  ;;  %v889_v54 = vadd.f32 %v888_v53, %v1617_v17 }
 0x1e0   : > { %v1023_v56 = vadd.f32 %v1022_v41, %v960_v0  ;;  %v890_v61 = vadd.f32 %v889_v54, %v1633_v39 }
 0x1e2   : > { %v1024_v27 = vadd.f32 %v1023_v56, %v961_v51  ;;  %v891_v2 = vadd.f32 %v890_v61, %v1649_v62 }
 0x1e4   : > { %v1025_v1 = vadd.f32 %v1024_v27, %v962_v4  ;;  %v892_v35 = vadd.f32 %v891_v2, %v764_v48 }
 0x1e6   : > { %v893_v16 = vrot.slane %v892_v35, 4  ;;  %v1026_v58 = vadd.f32 %v1025_v1, %v963_v25 }
 0x1e8   : > { %v894_v17 = vadd.f32 %v893_v16, %v892_v35  ;;  %v1027_v5 = vrot.slane %v1026_v58, 4 }
 0x1ea   : > { %v895_v10 = vrot.slane %v894_v17, 2  ;;  %v1028_v34 = vadd.f32 %v1027_v5, %v1026_v58 }
 0x1ec   : > { %v896_v31 = vadd.f32 %v895_v10, %v894_v17  ;;  %v1029_v39 = vrot.slane %v1028_v34, 2 }
 0x1ee   : > { %v897_v40 = vrot.slane %v896_v31, 1  ;;  %v1030_v11 = vadd.f32 %v1029_v39, %v1028_v34 }
 0x1f0   : > { %v898_v62 = vadd.f32 %v897_v40, %v896_v31  ;;  %v1031_v36 = vrot.slane %v1030_v11, 1 }
 0x1f2   : > { %899 = vst [vmem:[%s187_s15] sm:$0x1] %v898_v62  ;;  %v1032_v48 = vadd.f32 %v1031_v36, %v1030_v11 }
 0x1f4   : > { %1033 = vst [vmem:[%s187_s15 + $0x1] sm:$0x1] %v1032_v48 }
 0x1f5 PF: > { %s14_s12 = sadd.s32 1, %s1181_s12  }
 0x1f6   : > { %p11_p5 = scmp.ge.s32.totalorder %s14_s12, 5  }
 0x1f8   :  { %13 = sbr.rel (!%p11_p5) target bundleno = 1 (0x1), region = 70 }

// kernel: mel_cnn_adapt_forward.5
= control target key start
LH: loop header
LB: loop body
LE: loop exit
PB: predicated region body
PF: predicated region fallthrough
CT: control target
= control target key end

     0   :  { %vm1145_vm0 = vcmask 261120   ;;  %vm1149_vm1 = vcmask 254976   ;;  %vm1510_vm8 = vcmask 1024   ;;  %s3200_s1 = inlined_call_operand.vmem [shape: f32[3200,32], index: 1, kind: input, shape index: {}]   ;;  %s3201_s0 = inlined_call_operand.vmem [shape: f32[18,3200], index: 0, kind: input, shape index: {}]   ;;  %s3202_s3 = inlined_call_operand.vmem [shape: f32[9,32,32], index: 3, kind: input, shape index: {}]   ;;  %s3203_s2 = inlined_call_operand.vmem [shape: f32[2,32], index: 2, kind: input, shape index: {}]   ;;  %s3204_s4 = inlined_call_operand.vmem [shape: f32[4,32], index: 4, kind: input, shape index: {}]   ;;  %s3205_s5 = inlined_call_operand.vmem [shape: f32[2,1], index: 5, kind: output, shape index: {}]  }
   0x1   :  { %v110_v0 = vld [vmem:[%s3200_s1 + $0x78] sm:$0xff]  ;;  %v109_v2 = vld [vmem:[%s3200_s1 + $0x70] sm:$0xff]  ;;  %v108_v6 = vld [vmem:[%s3200_s1 + $0x68] sm:$0xff] }
   0x2   :  { %v142_v1 = vld [vmem:[%s3200_s1 + $0x178] sm:$0xff]  ;;  %495 = vmatpush.msra.mxu0 %v110_v0  ;;  %v141_v4 = vld [vmem:[%s3200_s1 + $0x170] sm:$0xff]  ;;  %v140_v8 = vld [vmem:[%s3200_s1 + $0x168] sm:$0xff] }
   0x3   :  { %547 = vmatpush.msra.mxu2 %v142_v1  ;;  %v126_v3 = vld [vmem:[%s3200_s1 + $0xf8] sm:$0xff]  ;;  %v125_v7 = vld [vmem:[%s3200_s1 + $0xf0] sm:$0xff]  ;;  %v124_v10 = vld [vmem:[%s3200_s1 + $0xe8] sm:$0xff] }
   0x4   :  { %v158_v5 = vld [vmem:[%s3200_s1 + $0x1f8] sm:$0xff]  ;;  %521 = vmatpush.msra.mxu1 %v126_v3  ;;  %496 = vmatpush.msra.mxu0 %v109_v2  ;;  %v157_v9 = vld [vmem:[%s3200_s1 + $0x1f0] sm:$0xff]  ;;  %v107_v11 = vld [vmem:[%s3200_s1 + $0x60] sm:$0xff] }
   0x5   :  { %573 = vmatpush.msra.mxu3 %v158_v5  ;;  %548 = vmatpush.msra.mxu2 %v141_v4  ;;  %v139_v12 = vld [vmem:[%s3200_s1 + $0x160] sm:$0xff]  ;;  %v156_v13 = vld [vmem:[%s3200_s1 + $0x1e8] sm:$0xff]  ;;  %v106_v16 = vld [vmem:[%s3200_s1 + $0x58] sm:$0xff] }
   0x6   :  { %522 = vmatpush.msra.mxu1 %v125_v7  ;;  %497 = vmatpush.msra.mxu0 %v108_v6  ;;  %v123_v14 = vld [vmem:[%s3200_s1 + $0xe0] sm:$0xff]  ;;  %v138_v17 = vld [vmem:[%s3200_s1 + $0x158] sm:$0xff]  ;;  %v105_v20 = vld [vmem:[%s3200_s1 + $0x50] sm:$0xff] }
   0x7   :  { %574 = vmatpush.msra.mxu3 %v157_v9  ;;  %549 = vmatpush.msra.mxu2 %v140_v8  ;;  %v155_v15 = vld [vmem:[%s3200_s1 + $0x1e0] sm:$0xff]  ;;  %v122_v18 = vld [vmem:[%s3200_s1 + $0xd8] sm:$0xff]  ;;  %v137_v21 = vld [vmem:[%s3200_s1 + $0x150] sm:$0xff] }
   0x8   :  { %523 = vmatpush.msra.mxu1 %v124_v10  ;;  %498 = vmatpush.msra.mxu0 %v107_v11  ;;  %v154_v19 = vld [vmem:[%s3200_s1 + $0x1d8] sm:$0xff]  ;;  %v121_v22 = vld [vmem:[%s3200_s1 + $0xd0] sm:$0xff]  ;;  %v104_v24 = vld [vmem:[%s3200_s1 + $0x48] sm:$0xff] }
   0x9   :  { %575 = vmatpush.msra.mxu3 %v156_v13  ;;  %550 = vmatpush.msra.mxu2 %v139_v12  ;;  %v153_v23 = vld [vmem:[%s3200_s1 + $0x1d0] sm:$0xff]  ;;  %v136_v25 = vld [vmem:[%s3200_s1 + $0x148] sm:$0xff]  ;;  %v103_v28 = vld [vmem:[%s3200_s1 + $0x40] sm:$0xff] }
   0xa   :  { %524 = vmatpush.msra.mxu1 %v123_v14  ;;  %499 = vmatpush.msra.mxu0 %v106_v16  ;;  %v120_v26 = vld [vmem:[%s3200_s1 + $0xc8] sm:$0xff]  ;;  %v135_v29 = vld [vmem:[%s3200_s1 + $0x140] sm:$0xff]  ;;  %v102_v32 = vld [vmem:[%s3200_s1 + $0x38] sm:$0xff] }
   0xb   :  { %576 = vmatpush.msra.mxu3 %v155_v15  ;;  %551 = vmatpush.msra.mxu2 %v138_v17  ;;  %v152_v27 = vld [vmem:[%s3200_s1 + $0x1c8] sm:$0xff]  ;;  %v119_v30 = vld [vmem:[%s3200_s1 + $0xc0] sm:$0xff]  ;;  %v134_v33 = vld [vmem:[%s3200_s1 + $0x138] sm:$0xff] }
   0xc   :  { %525 = vmatpush.msra.mxu1 %v122_v18  ;;  %500 = vmatpush.msra.mxu0 %v105_v20  ;;  %v151_v31 = vld [vmem:[%s3200_s1 + $0x1c0] sm:$0xff]  ;;  %v118_v34 = vld [vmem:[%s3200_s1 + $0xb8] sm:$0xff]  ;;  %v101_v36 = vld [vmem:[%s3200_s1 + $0x30] sm:$0xff] }
   0xd   :  { %577 = vmatpush.msra.mxu3 %v154_v19  ;;  %552 = vmatpush.msra.mxu2 %v137_v21  ;;  %v150_v35 = vld [vmem:[%s3200_s1 + $0x1b8] sm:$0xff]  ;;  %v133_v37 = vld [vmem:[%s3200_s1 + $0x130] sm:$0xff]  ;;  %v100_v40 = vld [vmem:[%s3200_s1 + $0x28] sm:$0xff] }
   0xe   :  { %526 = vmatpush.msra.mxu1 %v121_v22  ;;  %501 = vmatpush.msra.mxu0 %v104_v24  ;;  %v117_v38 = vld [vmem:[%s3200_s1 + $0xb0] sm:$0xff]  ;;  %v132_v41 = vld [vmem:[%s3200_s1 + $0x128] sm:$0xff]  ;;  %v99_v44 = vld [vmem:[%s3200_s1 + $0x20] sm:$0xff] }
   0xf   :  { %578 = vmatpush.msra.mxu3 %v153_v23  ;;  %553 = vmatpush.msra.mxu2 %v136_v25  ;;  %v149_v39 = vld [vmem:[%s3200_s1 + $0x1b0] sm:$0xff]  ;;  %v116_v42 = vld [vmem:[%s3200_s1 + $0xa8] sm:$0xff]  ;;  %v131_v45 = vld [vmem:[%s3200_s1 + $0x120] sm:$0xff] }
  0x10   :  { %527 = vmatpush.msra.mxu1 %v120_v26  ;;  %502 = vmatpush.msra.mxu0 %v103_v28  ;;  %v148_v43 = vld [vmem:[%s3200_s1 + $0x1a8] sm:$0xff]  ;;  %v115_v46 = vld [vmem:[%s3200_s1 + $0xa0] sm:$0xff]  ;;  %v98_v48 = vld [vmem:[%s3200_s1 + $0x18] sm:$0xff] }
  0x11   :  { %579 = vmatpush.msra.mxu3 %v152_v27  ;;  %554 = vmatpush.msra.mxu2 %v135_v29  ;;  %v147_v47 = vld [vmem:[%s3200_s1 + $0x1a0] sm:$0xff]  ;;  %v130_v49 = vld [vmem:[%s3200_s1 + $0x118] sm:$0xff]  ;;  %v97_v52 = vld [vmem:[%s3200_s1 + $0x10] sm:$0xff] }
  0x12   :  { %528 = vmatpush.msra.mxu1 %v119_v30  ;;  %503 = vmatpush.msra.mxu0 %v102_v32  ;;  %v114_v50 = vld [vmem:[%s3200_s1 + $0x98] sm:$0xff]  ;;  %v129_v53 = vld [vmem:[%s3200_s1 + $0x110] sm:$0xff]  ;;  %v96_v56 = vld [vmem:[%s3200_s1 + $0x8] sm:$0xff] }
  0x13   :  { %580 = vmatpush.msra.mxu3 %v151_v31  ;;  %555 = vmatpush.msra.mxu2 %v134_v33  ;;  %v146_v51 = vld [vmem:[%s3200_s1 + $0x198] sm:$0xff]  ;;  %v113_v54 = vld [vmem:[%s3200_s1 + $0x90] sm:$0xff]  ;;  %v128_v57 = vld [vmem:[%s3200_s1 + $0x108] sm:$0xff] }
  0x14   :  { %529 = vmatpush.msra.mxu1 %v118_v34  ;;  %504 = vmatpush.msra.mxu0 %v101_v36  ;;  %v145_v55 = vld [vmem:[%s3200_s1 + $0x190] sm:$0xff]  ;;  %v112_v58 = vld [vmem:[%s3200_s1 + $0x88] sm:$0xff]  ;;  %v95_v60 = vld [vmem:[%s3200_s1] sm:$0xff] }
  0x15   :  { %581 = vmatpush.msra.mxu3 %v150_v35  ;;  %556 = vmatpush.msra.mxu2 %v133_v37  ;;  %v144_v59 = vld [vmem:[%s3200_s1 + $0x188] sm:$0xff]  ;;  %v127_v61 = vld [vmem:[%s3200_s1 + $0x100] sm:$0xff]  ;;  %v174_v62 = vld [vmem:[%s3200_s1 + $0x278] sm:$0xff] }
  0x16   :  { %530 = vmatpush.msra.mxu1 %v117_v38  ;;  %505 = vmatpush.msra.mxu0 %v100_v40  ;;  %v206_v63 = vld [vmem:[%s3200_s1 + $0x378] sm:$0xff]  ;;  %v111_v0 = vld [vmem:[%s3200_s1 + $0x80] sm:$0xff]  ;;  %v173_v2 = vld [vmem:[%s3200_s1 + $0x270] sm:$0xff] }
  0x17   :  { %582 = vmatpush.msra.mxu3 %v149_v39  ;;  %557 = vmatpush.msra.mxu2 %v132_v41  ;;  %v143_v1 = vld [vmem:[%s3200_s1 + $0x180] sm:$0xff]  ;;  %v190_v3 = vld [vmem:[%s3200_s1 + $0x2f8] sm:$0xff]  ;;  %v205_v4 = vld [vmem:[%s3200_s1 + $0x370] sm:$0xff] }
  0x18   :  { %531 = vmatpush.msra.mxu1 %v116_v42  ;;  %506 = vmatpush.msra.mxu0 %v99_v44  ;;  %v222_v5 = vld [vmem:[%s3200_s1 + $0x3f8] sm:$0xff]  ;;  %v172_v6 = vld [vmem:[%s3200_s1 + $0x268] sm:$0xff]  ;;  %v189_v7 = vld [vmem:[%s3200_s1 + $0x2f0] sm:$0xff] }
  0x19   :  { %583 = vmatpush.msra.mxu3 %v148_v43  ;;  %558 = vmatpush.msra.mxu2 %v131_v45  ;;  %v204_v8 = vld [vmem:[%s3200_s1 + $0x368] sm:$0xff]  ;;  %v221_v9 = vld [vmem:[%s3200_s1 + $0x3f0] sm:$0xff]  ;;  %v171_v10 = vld [vmem:[%s3200_s1 + $0x260] sm:$0xff] }
  0x1a   :  { %532 = vmatpush.msra.mxu1 %v115_v46  ;;  %507 = vmatpush.msra.mxu0 %v98_v48  ;;  %v188_v11 = vld [vmem:[%s3200_s1 + $0x2e8] sm:$0xff]  ;;  %v203_v12 = vld [vmem:[%s3200_s1 + $0x360] sm:$0xff]  ;;  %v170_v14 = vld [vmem:[%s3200_s1 + $0x258] sm:$0xff] }
  0x1b   :  { %584 = vmatpush.msra.mxu3 %v147_v47  ;;  %559 = vmatpush.msra.mxu2 %v130_v49  ;;  %v220_v13 = vld [vmem:[%s3200_s1 + $0x3e8] sm:$0xff]  ;;  %v187_v15 = vld [vmem:[%s3200_s1 + $0x2e0] sm:$0xff]  ;;  %v202_v16 = vld [vmem:[%s3200_s1 + $0x358] sm:$0xff] }
  0x1c   :  { %533 = vmatpush.msra.mxu1 %v114_v50  ;;  %508 = vmatpush.msra.mxu0 %v97_v52  ;;  %v219_v17 = vld [vmem:[%s3200_s1 + $0x3e0] sm:$0xff]  ;;  %v169_v18 = vld [vmem:[%s3200_s1 + $0x250] sm:$0xff]  ;;  %v186_v19 = vld [vmem:[%s3200_s1 + $0x2d8] sm:$0xff] }
  0x1d   :  { %585 = vmatpush.msra.mxu3 %v146_v51  ;;  %560 = vmatpush.msra.mxu2 %v129_v53  ;;  %v201_v20 = vld [vmem:[%s3200_s1 + $0x350] sm:$0xff]  ;;  %v218_v21 = vld [vmem:[%s3200_s1 + $0x3d8] sm:$0xff]  ;;  %v168_v23 = vld [vmem:[%s3200_s1 + $0x248] sm:$0xff] }
  0x1e   :  { %534 = vmatpush.msra.mxu1 %v113_v54  ;;  %509 = vmatpush.msra.mxu0 %v96_v56  ;;  %v22_v22 = vld [vmem:[%s3201_s0 + $0x10] sm:$0xff]  ;;  %v200_v25 = vld [vmem:[%s3200_s1 + $0x348] sm:$0xff]  ;;  %v20_v27 = vld [vmem:[%s3201_s0] sm:$0xff] }
  0x1f   :  { %586 = vmatpush.msra.mxu3 %v145_v55  ;;  %561 = vmatpush.msra.mxu2 %v128_v57  ;;  %v185_v24 = vld [vmem:[%s3200_s1 + $0x2d0] sm:$0xff]  ;;  %v23_v28 = vld [vmem:[%s3201_s0 + $0x18] sm:$0xff]  ;;  %v167_v29 = vld [vmem:[%s3200_s1 + $0x240] sm:$0xff] }
  0x20   :  { %535 = vmatpush.msra.mxu1 %v112_v58  ;;  %510 = vmatpush.msra.mxu0 %v95_v60  ;;  %v217_v26 = vld [vmem:[%s3200_s1 + $0x3d0] sm:$0xff]  ;;  %v184_v30 = vld [vmem:[%s3200_s1 + $0x2c8] sm:$0xff]  ;;  %v199_v31 = vld [vmem:[%s3200_s1 + $0x340] sm:$0xff] }
  0x21   :  { %587 = vmatpush.msra.mxu3 %v144_v59  ;;  %562 = vmatpush.msra.mxu2 %v127_v61  ;;  %v216_v32 = vld [vmem:[%s3200_s1 + $0x3c8] sm:$0xff]  ;;  %v166_v34 = vld [vmem:[%s3200_s1 + $0x238] sm:$0xff]  ;;  %v183_v35 = vld [vmem:[%s3200_s1 + $0x2c0] sm:$0xff] }
  0x22   :  { %599 = vmatpush.msrb.mxu0 %v174_v62  ;;  %536 = vmatpush.msra.mxu1 %v111_v0  ;;  %v21_v33 = vld [vmem:[%s3201_s0 + $0x8] sm:$0xff]  ;;  %v198_v36 = vld [vmem:[%s3200_s1 + $0x338] sm:$0xff]  ;;  %v215_v37 = vld [vmem:[%s3200_s1 + $0x3c0] sm:$0xff] }
  0x23   :  { %651 = vmatpush.msrb.mxu2 %v206_v63  ;;  %588 = vmatpush.msra.mxu3 %v143_v1  ;;  %v165_v38 = vld [vmem:[%s3200_s1 + $0x230] sm:$0xff]  ;;  %v182_v39 = vld [vmem:[%s3200_s1 + $0x2b8] sm:$0xff]  ;;  %v164_v43 = vld [vmem:[%s3200_s1 + $0x228] sm:$0xff] }
  0x24   :  { %600 = vmatpush.msrb.mxu0 %v173_v2  ;;  %625 = vmatpush.msrb.mxu1 %v190_v3  ;;  %v197_v40 = vld [vmem:[%s3200_s1 + $0x330] sm:$0xff]  ;;  %v214_v41 = vld [vmem:[%s3200_s1 + $0x3b8] sm:$0xff]  ;;  %v196_v45 = vld [vmem:[%s3200_s1 + $0x328] sm:$0xff] }
  0x25   :  { %652 = vmatpush.msrb.mxu2 %v205_v4  ;;  %677 = vmatpush.msrb.mxu3 %v222_v5  ;;  %v47_v42 = vld [vmem:[%s3201_s0 + $0xd8] sm:$0xff]  ;;  %v181_v44 = vld [vmem:[%s3200_s1 + $0x2b0] sm:$0xff]  ;;  %v45_v47 = vld [vmem:[%s3201_s0 + $0xc8] sm:$0xff] }
  0x26   :  { %601 = vmatpush.msrb.mxu0 %v172_v6  ;;  %626 = vmatpush.msrb.mxu1 %v189_v7  ;;  %v213_v46 = vld [vmem:[%s3200_s1 + $0x3b0] sm:$0xff]  ;;  %v48_v48 = vld [vmem:[%s3201_s0 + $0xe0] sm:$0xff]  ;;  %v180_v50 = vld [vmem:[%s3200_s1 + $0x2a8] sm:$0xff] }
  0x27   :  { %653 = vmatpush.msrb.mxu2 %v204_v8  ;;  %678 = vmatpush.msrb.mxu3 %v221_v9  ;;  %v163_v49 = vld [vmem:[%s3200_s1 + $0x220] sm:$0xff]  ;;  %v212_v52 = vld [vmem:[%s3200_s1 + $0x3a8] sm:$0xff]  ;;  %v46_v53 = vld [vmem:[%s3201_s0 + $0xd0] sm:$0xff] }
  0x28   :  { %602 = vmatpush.msrb.mxu0 %v171_v10  ;;  %627 = vmatpush.msrb.mxu1 %v188_v11  ;;  %v195_v51 = vld [vmem:[%s3200_s1 + $0x320] sm:$0xff]  ;;  %v162_v54 = vld [vmem:[%s3200_s1 + $0x218] sm:$0xff]  ;;  %v161_v58 = vld [vmem:[%s3200_s1 + $0x210] sm:$0xff] }
  0x29   :  { %654 = vmatpush.msrb.mxu2 %v203_v12  ;;  %679 = vmatpush.msrb.mxu3 %v220_v13  ;;  %v179_v55 = vld [vmem:[%s3200_s1 + $0x2a0] sm:$0xff]  ;;  %v194_v56 = vld [vmem:[%s3200_s1 + $0x318] sm:$0xff]  ;;  %v193_v60 = vld [vmem:[%s3200_s1 + $0x310] sm:$0xff] }
  0x2a   :  { %603 = vmatpush.msrb.mxu0 %v170_v14  ;;  %628 = vmatpush.msrb.mxu1 %v187_v15  ;;  %v211_v57 = vld [vmem:[%s3200_s1 + $0x3a0] sm:$0xff]  ;;  %v178_v59 = vld [vmem:[%s3200_s1 + $0x298] sm:$0xff]  ;;  %v160_v63 = vld [vmem:[%s3200_s1 + $0x208] sm:$0xff] }
  0x2b   :  { %655 = vmatpush.msrb.mxu2 %v202_v16  ;;  %680 = vmatpush.msrb.mxu3 %v219_v17  ;;  %v210_v61 = vld [vmem:[%s3200_s1 + $0x398] sm:$0xff]  ;;  %v72_v62 = vld [vmem:[%s3201_s0 + $0x1a0] sm:$0x3]  ;;  %v177_v0 = vld [vmem:[%s3200_s1 + $0x290] sm:$0xff] }
  0x2c   :  { %604 = vmatpush.msrb.mxu0 %v169_v18  ;;  %629 = vmatpush.msrb.mxu1 %v186_v19  ;;  %v192_v1 = vld [vmem:[%s3200_s1 + $0x308] sm:$0xff]  ;;  %v209_v2 = vld [vmem:[%s3200_s1 + $0x390] sm:$0xff]  ;;  %v159_v5 = vld [vmem:[%s3200_s1 + $0x200] sm:$0xff] }
  0x2d   :  { %656 = vmatpush.msrb.mxu2 %v201_v20  ;;  %681 = vmatpush.msrb.mxu3 %v218_v21  ;;  %v70_v3 = vld [vmem:[%s3201_s0 + $0x190] sm:$0x3]  ;;  %v73_v4 = vld [vmem:[%s3201_s0 + $0x1a8] sm:$0x3]  ;;  %v191_v7 = vld [vmem:[%s3200_s1 + $0x300] sm:$0xff] }
  0x2e   :  { %563 = vmatmul.f32.vlgmr.msra.gmra.mxu2 %v22_v22  ;;  %605 = vmatpush.msrb.mxu0 %v168_v23  ;;  %v176_v6 = vld [vmem:[%s3200_s1 + $0x288] sm:$0xff]  ;;  %v71_v9 = vld [vmem:[%s3201_s0 + $0x198] sm:$0x3]  ;;  %v175_v12 = vld [vmem:[%s3200_s1 + $0x280] sm:$0xff] }
  0x2f   :  { %630 = vmatpush.msrb.mxu1 %v185_v24  ;;  %657 = vmatpush.msrb.mxu2 %v200_v25  ;;  %v208_v8 = vld [vmem:[%s3200_s1 + $0x388] sm:$0xff]  ;;  %v238_v10 = vld [vmem:[%s3200_s1 + $0x478] sm:$0xff]  ;;  %v207_v13 = vld [vmem:[%s3200_s1 + $0x380] sm:$0xff] }
  0x30   :  { %682 = vmatpush.msrb.mxu3 %v217_v26  ;;  %511 = vmatmul.f32.vlgmr.msra.gmra.mxu0 %v20_v27  ;;  %v270_v11 = vld [vmem:[%s3200_s1 + $0x578] sm:$0xff]  ;;  %v237_v14 = vld [vmem:[%s3200_s1 + $0x470] sm:$0xff]  ;;  %v236_v19 = vld [vmem:[%s3200_s1 + $0x468] sm:$0xff] }
  0x31   :  { %589 = vmatmul.f32.vlgmr.msra.gmra.mxu3 %v23_v28  ;;  %606 = vmatpush.msrb.mxu0 %v167_v29  ;;  %v254_v15 = vld [vmem:[%s3200_s1 + $0x4f8] sm:$0xff]  ;;  %v269_v16 = vld [vmem:[%s3200_s1 + $0x570] sm:$0xff]  ;;  %v268_v21 = vld [vmem:[%s3200_s1 + $0x568] sm:$0xff] }
  0x32   :  { %631 = vmatpush.msrb.mxu1 %v184_v30  ;;  %658 = vmatpush.msrb.mxu2 %v199_v31  ;;  %v286_v17 = vld [vmem:[%s3200_s1 + $0x5f8] sm:$0xff]  ;;  %v26_v18 = vld [vmem:[%s3201_s0 + $0x30] sm:$0xff]  ;;  %v24_v23 = vld [vmem:[%s3201_s0 + $0x20] sm:$0xff] }
  0x33   :  { %683 = vmatpush.msrb.mxu3 %v216_v32  ;;  %537 = vmatmul.f32.vlgmr.msra.gmra.mxu1 %v21_v33  ;;  %v253_v20 = vld [vmem:[%s3200_s1 + $0x4f0] sm:$0xff]  ;;  %v27_v24 = vld [vmem:[%s3201_s0 + $0x38] sm:$0xff]  ;;  %v235_v25 = vld [vmem:[%s3200_s1 + $0x460] sm:$0xff] }
  0x34   :  { %607 = vmatpush.msrb.mxu0 %v166_v34  ;;  %632 = vmatpush.msrb.mxu1 %v183_v35  ;;  %v285_v22 = vld [vmem:[%s3200_s1 + $0x5f0] sm:$0xff]  ;;  %v252_v26 = vld [vmem:[%s3200_s1 + $0x4e8] sm:$0xff]  ;;  %v267_v27 = vld [vmem:[%s3200_s1 + $0x560] sm:$0xff] }
  0x35   :  { %659 = vmatpush.msrb.mxu2 %v198_v36  ;;  %684 = vmatpush.msrb.mxu3 %v215_v37  ;;  %v284_v28 = vld [vmem:[%s3200_s1 + $0x5e8] sm:$0xff]  ;;  %v234_v30 = vld [vmem:[%s3200_s1 + $0x458] sm:$0xff]  ;;  %v251_v31 = vld [vmem:[%s3200_s1 + $0x4e0] sm:$0xff] }
  0x36   :  { %608 = vmatpush.msrb.mxu0 %v165_v38  ;;  %633 = vmatpush.msrb.mxu1 %v182_v39  ;;  %v25_v29 = vld [vmem:[%s3201_s0 + $0x28] sm:$0xff]  ;;  %v266_v32 = vld [vmem:[%s3200_s1 + $0x558] sm:$0xff]  ;;  %v283_v33 = vld [vmem:[%s3200_s1 + $0x5e0] sm:$0xff] }
  0x37   :  { %660 = vmatpush.msrb.mxu2 %v197_v40  ;;  %685 = vmatpush.msrb.mxu3 %v214_v41  ;;  %v233_v34 = vld [vmem:[%s3200_s1 + $0x450] sm:$0xff]  ;;  %v250_v35 = vld [vmem:[%s3200_s1 + $0x4d8] sm:$0xff]  ;;  %v232_v38 = vld [vmem:[%s3200_s1 + $0x448] sm:$0xff] }
  0x38   :  { %566 = vmatmul.f32.gmra.mxu2 %v47_v42  ;;  %609 = vmatpush.msrb.mxu0 %v164_v43  ;;  %v265_v36 = vld [vmem:[%s3200_s1 + $0x550] sm:$0xff]  ;;  %v282_v37 = vld [vmem:[%s3200_s1 + $0x5d8] sm:$0xff]  ;;  %v264_v40 = vld [vmem:[%s3200_s1 + $0x548] sm:$0xff] }
  0x39   :  { %634 = vmatpush.msrb.mxu1 %v181_v44  ;;  %661 = vmatpush.msrb.mxu2 %v196_v45  ;;  %v249_v39 = vld [vmem:[%s3200_s1 + $0x4d0] sm:$0xff]  ;;  %v231_v42 = vld [vmem:[%s3200_s1 + $0x440] sm:$0xff]  ;;  %v248_v43 = vld [vmem:[%s3200_s1 + $0x4c8] sm:$0xff] }
  0x3a   :  { %686 = vmatpush.msrb.mxu3 %v213_v46  ;;  %514 = vmatmul.f32.gmra.mxu0 %v45_v47  ;;  %v281_v41 = vld [vmem:[%s3200_s1 + $0x5d0] sm:$0xff]  ;;  %v263_v44 = vld [vmem:[%s3200_s1 + $0x540] sm:$0xff]  ;;  %v280_v45 = vld [vmem:[%s3200_s1 + $0x5c8] sm:$0xff] }
  0x3b   :  { %592 = vmatmul.f32.gmra.mxu3 %v48_v48  ;;  %610 = vmatpush.msrb.mxu0 %v163_v49  ;;  %v49_v46 = vld [vmem:[%s3201_s0 + $0xe8] sm:$0xff]  ;;  %v51_v47 = vld [vmem:[%s3201_s0 + $0xf8] sm:$0xff]  ;;  %v247_v49 = vld [vmem:[%s3200_s1 + $0x4c0] sm:$0xff] }
  0x3c   :  { %635 = vmatpush.msrb.mxu1 %v180_v50  ;;  %662 = vmatpush.msrb.mxu2 %v195_v51  ;;  %v230_v48 = vld [vmem:[%s3200_s1 + $0x438] sm:$0xff]  ;;  %v279_v51 = vld [vmem:[%s3200_s1 + $0x5c0] sm:$0xff] }
  0x3d   :  { %687 = vmatpush.msrb.mxu3 %v212_v52  ;;  %540 = vmatmul.f32.gmra.mxu1 %v46_v53  ;;  %v262_v50 = vld [vmem:[%s3200_s1 + $0x538] sm:$0xff]  ;;  %v50_v52 = vld [vmem:[%s3201_s0 + $0xf0] sm:$0xff]  ;;  %v52_v53 = vld [vmem:[%s3201_s0 + $0x100] sm:$0xff] }
  0x3e   :  { %611 = vmatpush.msrb.mxu0 %v162_v54  ;;  %636 = vmatpush.msrb.mxu1 %v179_v55  ;;  %v229_v54 = vld [vmem:[%s3200_s1 + $0x430] sm:$0xff]  ;;  %v246_v55 = vld [vmem:[%s3200_s1 + $0x4b8] sm:$0xff] }
  0x3f   :  { %663 = vmatpush.msrb.mxu2 %v194_v56  ;;  %688 = vmatpush.msrb.mxu3 %v211_v57  ;;  %v261_v56 = vld [vmem:[%s3200_s1 + $0x530] sm:$0xff]  ;;  %v278_v57 = vld [vmem:[%s3200_s1 + $0x5b8] sm:$0xff] }
  0x40   :  { %612 = vmatpush.msrb.mxu0 %v161_v58  ;;  %637 = vmatpush.msrb.mxu1 %v178_v59  ;;  %v228_v58 = vld [vmem:[%s3200_s1 + $0x428] sm:$0xff]  ;;  %v245_v59 = vld [vmem:[%s3200_s1 + $0x4b0] sm:$0xff] }
  0x41   :  { %664 = vmatpush.msrb.mxu2 %v193_v60  ;;  %689 = vmatpush.msrb.mxu3 %v210_v61  ;;  %v260_v60 = vld [vmem:[%s3200_s1 + $0x528] sm:$0xff]  ;;  %v277_v61 = vld [vmem:[%s3200_s1 + $0x5b0] sm:$0xff] }
  0x42   :  { %569 = vmatmul.f32.gmra.mxu2 %v72_v62  ;;  %613 = vmatpush.msrb.mxu0 %v160_v63  ;;  %v227_v62 = vld [vmem:[%s3200_s1 + $0x420] sm:$0xff]  ;;  %v244_v63 = vld [vmem:[%s3200_s1 + $0x4a8] sm:$0xff] }
  0x43   :  { %638 = vmatpush.msrb.mxu1 %v177_v0  ;;  %665 = vmatpush.msrb.mxu2 %v192_v1  ;;  %v259_v0 = vld [vmem:[%s3200_s1 + $0x520] sm:$0xff]  ;;  %v276_v1 = vld [vmem:[%s3200_s1 + $0x5a8] sm:$0xff] }
  0x44   :  { %690 = vmatpush.msrb.mxu3 %v209_v2  ;;  %517 = vmatmul.f32.gmra.mxu0 %v70_v3  ;;  %v74_v2 = vld [vmem:[%s3201_s0 + $0x1b0] sm:$0x3]  ;;  %v76_v3 = vld [vmem:[%s3201_s0 + $0x1c0] sm:$0x3] }
  0x45   :  { %595 = vmatmul.f32.gmra.mxu3 %v73_v4  ;;  %614 = vmatpush.msrb.mxu0 %v159_v5  ;;  %v226_v4 = vld [vmem:[%s3200_s1 + $0x418] sm:$0xff]  ;;  %v243_v5 = vld [vmem:[%s3200_s1 + $0x4a0] sm:$0xff] }
  0x46   :  { %639 = vmatpush.msrb.mxu1 %v176_v6  ;;  %666 = vmatpush.msrb.mxu2 %v191_v7  ;;  %v258_v6 = vld [vmem:[%s3200_s1 + $0x518] sm:$0xff]  ;;  %v275_v7 = vld [vmem:[%s3200_s1 + $0x5a0] sm:$0xff] }
  0x47   :  { %691 = vmatpush.msrb.mxu3 %v208_v8  ;;  %543 = vmatmul.f32.gmra.mxu1 %v71_v9  ;;  %v75_v8 = vld [vmem:[%s3201_s0 + $0x1b8] sm:$0x3]  ;;  %v77_v9 = vld [vmem:[%s3201_s0 + $0x1c8] sm:$0x3] }
  0x48   :  { %703 = vmatpush.msra.mxu0 %v238_v10  ;;  %755 = vmatpush.msra.mxu2 %v270_v11  ;;  %v225_v10 = vld [vmem:[%s3200_s1 + $0x410] sm:$0xff]  ;;  %v242_v11 = vld [vmem:[%s3200_s1 + $0x498] sm:$0xff] }
  0x49   :  { %640 = vmatpush.msrb.mxu1 %v175_v12  ;;  %692 = vmatpush.msrb.mxu3 %v207_v13  ;;  %v257_v12 = vld [vmem:[%s3200_s1 + $0x510] sm:$0xff]  ;;  %v274_v13 = vld [vmem:[%s3200_s1 + $0x598] sm:$0xff] }
  0x4a   :  { %704 = vmatpush.msra.mxu0 %v237_v14  ;;  %756 = vmatpush.msra.mxu2 %v269_v16  ;;  %v224_v14 = vld [vmem:[%s3200_s1 + $0x408] sm:$0xff] }
  0x4b   :  { %729 = vmatpush.msra.mxu1 %v254_v15  ;;  %781 = vmatpush.msra.mxu3 %v286_v17  ;;  %v241_v15 = vld [vmem:[%s3200_s1 + $0x490] sm:$0xff]  ;;  %v256_v16 = vld [vmem:[%s3200_s1 + $0x508] sm:$0xff] }
  0x4c   :  { %667 = vmatmul.f32.vlgmr.msrb.gmra.mxu2 %v26_v18  ;;  %705 = vmatpush.msra.mxu0 %v236_v19  ;;  %v273_v17 = vld [vmem:[%s3200_s1 + $0x590] sm:$0xff]  ;;  %v223_v18 = vld [vmem:[%s3200_s1 + $0x400] sm:$0xff]  ;;  %v240_v19 = vld [vmem:[%s3200_s1 + $0x488] sm:$0xff] }
  0x4d   :  { %730 = vmatpush.msra.mxu1 %v253_v20  ;;  %757 = vmatpush.msra.mxu2 %v268_v21  ;;  %v255_v20 = vld [vmem:[%s3200_s1 + $0x500] sm:$0xff]  ;;  %v272_v21 = vld [vmem:[%s3200_s1 + $0x588] sm:$0xff] }
  0x4e   :  { %782 = vmatpush.msra.mxu3 %v285_v22  ;;  %615 = vmatmul.f32.vlgmr.msrb.gmra.mxu0 %v24_v23  ;;  %v28_v22 = vld [vmem:[%s3201_s0 + $0x40] sm:$0xff]  ;;  %v30_v23 = vld [vmem:[%s3201_s0 + $0x50] sm:$0xff] }
  0x4f   :  { %693 = vmatmul.f32.vlgmr.msrb.gmra.mxu3 %v27_v24  ;;  %706 = vmatpush.msra.mxu0 %v235_v25  ;;  %v302_v24 = vld [vmem:[%s3200_s1 + $0x678] sm:$0xff] }
  0x50   :  { %731 = vmatpush.msra.mxu1 %v252_v26  ;;  %758 = vmatpush.msra.mxu2 %v267_v27  ;;  %v334_v25 = vld [vmem:[%s3200_s1 + $0x778] sm:$0xff]  ;;  %v239_v26 = vld [vmem:[%s3200_s1 + $0x480] sm:$0xff] }
  0x51   :  { %783 = vmatpush.msra.mxu3 %v284_v28  ;;  %641 = vmatmul.f32.vlgmr.msrb.gmra.mxu1 %v25_v29  ;;  %v271_v27 = vld [vmem:[%s3200_s1 + $0x580] sm:$0xff]  ;;  %v29_v28 = vld [vmem:[%s3201_s0 + $0x48] sm:$0xff]  ;;  %v31_v29 = vld [vmem:[%s3201_s0 + $0x58] sm:$0xff] }
  0x52   :  { %707 = vmatpush.msra.mxu0 %v234_v30  ;;  %732 = vmatpush.msra.mxu1 %v251_v31  ;;  %v301_v30 = vld [vmem:[%s3200_s1 + $0x670] sm:$0xff]  ;;  %v318_v31 = vld [vmem:[%s3200_s1 + $0x6f8] sm:$0xff] }
  0x53   :  { %759 = vmatpush.msra.mxu2 %v266_v32  ;;  %784 = vmatpush.msra.mxu3 %v283_v33  ;;  %v333_v32 = vld [vmem:[%s3200_s1 + $0x770] sm:$0xff]  ;;  %v350_v33 = vld [vmem:[%s3200_s1 + $0x7f8] sm:$0xff] }
  0x54   :  { %708 = vmatpush.msra.mxu0 %v233_v34  ;;  %733 = vmatpush.msra.mxu1 %v250_v35  ;;  %v300_v34 = vld [vmem:[%s3200_s1 + $0x668] sm:$0xff]  ;;  %v317_v35 = vld [vmem:[%s3200_s1 + $0x6f0] sm:$0xff] }
  0x55   :  { %760 = vmatpush.msra.mxu2 %v265_v36  ;;  %785 = vmatpush.msra.mxu3 %v282_v37  ;;  %v332_v36 = vld [vmem:[%s3200_s1 + $0x768] sm:$0xff]  ;;  %v349_v37 = vld [vmem:[%s3200_s1 + $0x7f0] sm:$0xff] }
  0x56   :  { %709 = vmatpush.msra.mxu0 %v232_v38  ;;  %734 = vmatpush.msra.mxu1 %v249_v39  ;;  %v299_v38 = vld [vmem:[%s3200_s1 + $0x660] sm:$0xff]  ;;  %v316_v39 = vld [vmem:[%s3200_s1 + $0x6e8] sm:$0xff] }
  0x57   :  { %761 = vmatpush.msra.mxu2 %v264_v40  ;;  %786 = vmatpush.msra.mxu3 %v281_v41  ;;  %v331_v40 = vld [vmem:[%s3200_s1 + $0x760] sm:$0xff]  ;;  %v348_v41 = vld [vmem:[%s3200_s1 + $0x7e8] sm:$0xff] }
  0x58   :  { %710 = vmatpush.msra.mxu0 %v231_v42  ;;  %735 = vmatpush.msra.mxu1 %v248_v43  ;;  %v53_v42 = vld [vmem:[%s3201_s0 + $0x108] sm:$0xff]  ;;  %v55_v43 = vld [vmem:[%s3201_s0 + $0x118] sm:$0xff] }
  0x59   :  { %762 = vmatpush.msra.mxu2 %v263_v44  ;;  %787 = vmatpush.msra.mxu3 %v280_v45  ;;  %v298_v44 = vld [vmem:[%s3200_s1 + $0x658] sm:$0xff]  ;;  %v315_v45 = vld [vmem:[%s3200_s1 + $0x6e0] sm:$0xff] }
  0x5a   :  { %618 = vmatmul.f32.gmra.mxu0 %v49_v46  ;;  %670 = vmatmul.f32.gmra.mxu2 %v51_v47  ;;  %v330_v46 = vld [vmem:[%s3200_s1 + $0x758] sm:$0xff]  ;;  %v347_v47 = vld [vmem:[%s3200_s1 + $0x7e0] sm:$0xff] }
  0x5b   :  { %711 = vmatpush.msra.mxu0 %v230_v48  ;;  %736 = vmatpush.msra.mxu1 %v247_v49  ;;  %v54_v48 = vld [vmem:[%s3201_s0 + $0x110] sm:$0xff]  ;;  %v56_v49 = vld [vmem:[%s3201_s0 + $0x120] sm:$0xff] }
  0x5c   :  { %763 = vmatpush.msra.mxu2 %v262_v50  ;;  %788 = vmatpush.msra.mxu3 %v279_v51  ;;  %v297_v50 = vld [vmem:[%s3200_s1 + $0x650] sm:$0xff]  ;;  %v314_v51 = vld [vmem:[%s3200_s1 + $0x6d8] sm:$0xff] }
  0x5d   :  { %644 = vmatmul.f32.gmra.mxu1 %v50_v52  ;;  %696 = vmatmul.f32.gmra.mxu3 %v52_v53  ;;  %v329_v52 = vld [vmem:[%s3200_s1 + $0x750] sm:$0xff]  ;;  %v346_v53 = vld [vmem:[%s3200_s1 + $0x7d8] sm:$0xff] }
  0x5e   :  { %712 = vmatpush.msra.mxu0 %v229_v54  ;;  %737 = vmatpush.msra.mxu1 %v246_v55  ;;  %v296_v54 = vld [vmem:[%s3200_s1 + $0x648] sm:$0xff]  ;;  %v313_v55 = vld [vmem:[%s3200_s1 + $0x6d0] sm:$0xff] }
  0x5f   :  { %764 = vmatpush.msra.mxu2 %v261_v56  ;;  %789 = vmatpush.msra.mxu3 %v278_v57  ;;  %v328_v56 = vld [vmem:[%s3200_s1 + $0x748] sm:$0xff]  ;;  %v345_v57 = vld [vmem:[%s3200_s1 + $0x7d0] sm:$0xff] }
  0x60   :  { %713 = vmatpush.msra.mxu0 %v228_v58  ;;  %738 = vmatpush.msra.mxu1 %v245_v59  ;;  %v295_v58 = vld [vmem:[%s3200_s1 + $0x640] sm:$0xff]  ;;  %v312_v59 = vld [vmem:[%s3200_s1 + $0x6c8] sm:$0xff] }
  0x61   :  { %765 = vmatpush.msra.mxu2 %v260_v60  ;;  %790 = vmatpush.msra.mxu3 %v277_v61  ;;  %v327_v60 = vld [vmem:[%s3200_s1 + $0x740] sm:$0xff]  ;;  %v344_v61 = vld [vmem:[%s3200_s1 + $0x7c8] sm:$0xff] }
  0x62   :  { %714 = vmatpush.msra.mxu0 %v227_v62  ;;  %739 = vmatpush.msra.mxu1 %v244_v63  ;;  %v78_v62 = vld [vmem:[%s3201_s0 + $0x1d0] sm:$0x3]  ;;  %v80_v63 = vld [vmem:[%s3201_s0 + $0x1e0] sm:$0x3] }
  0x63   :  { %766 = vmatpush.msra.mxu2 %v259_v0  ;;  %791 = vmatpush.msra.mxu3 %v276_v1  ;;  %v294_v0 = vld [vmem:[%s3200_s1 + $0x638] sm:$0xff]  ;;  %v311_v1 = vld [vmem:[%s3200_s1 + $0x6c0] sm:$0xff] }
  0x64   :  { %621 = vmatmul.f32.gmra.mxu0 %v74_v2  ;;  %673 = vmatmul.f32.gmra.mxu2 %v76_v3  ;;  %v326_v2 = vld [vmem:[%s3200_s1 + $0x738] sm:$0xff]  ;;  %v343_v3 = vld [vmem:[%s3200_s1 + $0x7c0] sm:$0xff] }
  0x65   :  { %715 = vmatpush.msra.mxu0 %v226_v4  ;;  %740 = vmatpush.msra.mxu1 %v243_v5  ;;  %v79_v4 = vld [vmem:[%s3201_s0 + $0x1d8] sm:$0x3]  ;;  %v81_v5 = vld [vmem:[%s3201_s0 + $0x1e8] sm:$0x3] }
  0x66   :  { %767 = vmatpush.msra.mxu2 %v258_v6  ;;  %792 = vmatpush.msra.mxu3 %v275_v7  ;;  %v293_v6 = vld [vmem:[%s3200_s1 + $0x630] sm:$0xff]  ;;  %v310_v7 = vld [vmem:[%s3200_s1 + $0x6b8] sm:$0xff] }
  0x67   :  { %647 = vmatmul.f32.gmra.mxu1 %v75_v8  ;;  %699 = vmatmul.f32.gmra.mxu3 %v77_v9  ;;  %v325_v8 = vld [vmem:[%s3200_s1 + $0x730] sm:$0xff]  ;;  %v342_v9 = vld [vmem:[%s3200_s1 + $0x7b8] sm:$0xff] }
  0x68   :  { %716 = vmatpush.msra.mxu0 %v225_v10  ;;  %741 = vmatpush.msra.mxu1 %v242_v11  ;;  %v292_v10 = vld [vmem:[%s3200_s1 + $0x628] sm:$0xff]  ;;  %v309_v11 = vld [vmem:[%s3200_s1 + $0x6b0] sm:$0xff] }
  0x69   :  { %768 = vmatpush.msra.mxu2 %v257_v12  ;;  %793 = vmatpush.msra.mxu3 %v274_v13  ;;  %v324_v12 = vld [vmem:[%s3200_s1 + $0x728] sm:$0xff]  ;;  %v341_v13 = vld [vmem:[%s3200_s1 + $0x7b0] sm:$0xff] }
  0x6a   :  { %717 = vmatpush.msra.mxu0 %v224_v14  ;;  %742 = vmatpush.msra.mxu1 %v241_v15  ;;  %v291_v14 = vld [vmem:[%s3200_s1 + $0x620] sm:$0xff]  ;;  %v308_v15 = vld [vmem:[%s3200_s1 + $0x6a8] sm:$0xff] }
  0x6b   :  { %769 = vmatpush.msra.mxu2 %v256_v16  ;;  %794 = vmatpush.msra.mxu3 %v273_v17  ;;  %v323_v16 = vld [vmem:[%s3200_s1 + $0x720] sm:$0xff]  ;;  %v340_v17 = vld [vmem:[%s3200_s1 + $0x7a8] sm:$0xff] }
  0x6c   :  { %718 = vmatpush.msra.mxu0 %v223_v18  ;;  %743 = vmatpush.msra.mxu1 %v240_v19  ;;  %v290_v18 = vld [vmem:[%s3200_s1 + $0x618] sm:$0xff]  ;;  %v307_v19 = vld [vmem:[%s3200_s1 + $0x6a0] sm:$0xff] }
  0x6d   :  { %770 = vmatpush.msra.mxu2 %v255_v20  ;;  %795 = vmatpush.msra.mxu3 %v272_v21  ;;  %v322_v20 = vld [vmem:[%s3200_s1 + $0x718] sm:$0xff]  ;;  %v339_v21 = vld [vmem:[%s3200_s1 + $0x7a0] sm:$0xff] }
  0x6e   :  { %719 = vmatmul.f32.vlgmr.msra.gmra.mxu0 %v28_v22  ;;  %771 = vmatmul.f32.vlgmr.msra.gmra.mxu2 %v30_v23  ;;  %v289_v22 = vld [vmem:[%s3200_s1 + $0x610] sm:$0xff]  ;;  %v306_v23 = vld [vmem:[%s3200_s1 + $0x698] sm:$0xff] }
  0x6f   :  { %807 = vmatpush.msrb.mxu0 %v302_v24  ;;  %859 = vmatpush.msrb.mxu2 %v334_v25  ;;  %v321_v24 = vld [vmem:[%s3200_s1 + $0x710] sm:$0xff]  ;;  %v338_v25 = vld [vmem:[%s3200_s1 + $0x798] sm:$0xff] }
  0x70   :  { %744 = vmatpush.msra.mxu1 %v239_v26  ;;  %796 = vmatpush.msra.mxu3 %v271_v27  ;;  %v288_v26 = vld [vmem:[%s3200_s1 + $0x608] sm:$0xff]  ;;  %v305_v27 = vld [vmem:[%s3200_s1 + $0x690] sm:$0xff] }
  0x71   :  { %745 = vmatmul.f32.vlgmr.msra.gmra.mxu1 %v29_v28  ;;  %797 = vmatmul.f32.vlgmr.msra.gmra.mxu3 %v31_v29  ;;  %v320_v28 = vld [vmem:[%s3200_s1 + $0x708] sm:$0xff]  ;;  %v337_v29 = vld [vmem:[%s3200_s1 + $0x790] sm:$0xff] }
  0x72   :  { %808 = vmatpush.msrb.mxu0 %v301_v30  ;;  %833 = vmatpush.msrb.mxu1 %v318_v31  ;;  %v287_v30 = vld [vmem:[%s3200_s1 + $0x600] sm:$0xff]  ;;  %v304_v31 = vld [vmem:[%s3200_s1 + $0x688] sm:$0xff] }
  0x73   :  { %860 = vmatpush.msrb.mxu2 %v333_v32  ;;  %885 = vmatpush.msrb.mxu3 %v350_v33  ;;  %v319_v32 = vld [vmem:[%s3200_s1 + $0x700] sm:$0xff]  ;;  %v336_v33 = vld [vmem:[%s3200_s1 + $0x788] sm:$0xff] }
  0x74   :  { %809 = vmatpush.msrb.mxu0 %v300_v34  ;;  %834 = vmatpush.msrb.mxu1 %v317_v35  ;;  %v32_v34 = vld [vmem:[%s3201_s0 + $0x60] sm:$0xff]  ;;  %v34_v35 = vld [vmem:[%s3201_s0 + $0x70] sm:$0xff] }
  0x75   :  { %861 = vmatpush.msrb.mxu2 %v332_v36  ;;  %886 = vmatpush.msrb.mxu3 %v349_v37  ;;  %v366_v36 = vld [vmem:[%s3200_s1 + $0x878] sm:$0xff] }
  0x76   :  { %810 = vmatpush.msrb.mxu0 %v299_v38  ;;  %835 = vmatpush.msrb.mxu1 %v316_v39  ;;  %v398_v37 = vld [vmem:[%s3200_s1 + $0x978] sm:$0xff]  ;;  %v303_v38 = vld [vmem:[%s3200_s1 + $0x680] sm:$0xff] }
  0x77   :  { %862 = vmatpush.msrb.mxu2 %v331_v40  ;;  %887 = vmatpush.msrb.mxu3 %v348_v41  ;;  %v335_v39 = vld [vmem:[%s3200_s1 + $0x780] sm:$0xff]  ;;  %v33_v40 = vld [vmem:[%s3201_s0 + $0x68] sm:$0xff]  ;;  %v35_v41 = vld [vmem:[%s3201_s0 + $0x78] sm:$0xff] }
  0x78   :  { %722 = vmatmul.f32.gmra.mxu0 %v53_v42  ;;  %774 = vmatmul.f32.gmra.mxu2 %v55_v43  ;;  %v365_v42 = vld [vmem:[%s3200_s1 + $0x870] sm:$0xff]  ;;  %v382_v43 = vld [vmem:[%s3200_s1 + $0x8f8] sm:$0xff] }
  0x79   :  { %811 = vmatpush.msrb.mxu0 %v298_v44  ;;  %836 = vmatpush.msrb.mxu1 %v315_v45  ;;  %v397_v44 = vld [vmem:[%s3200_s1 + $0x970] sm:$0xff]  ;;  %v414_v45 = vld [vmem:[%s3200_s1 + $0x9f8] sm:$0xff] }
  0x7a   :  { %863 = vmatpush.msrb.mxu2 %v330_v46  ;;  %888 = vmatpush.msrb.mxu3 %v347_v47  ;;  %v364_v46 = vld [vmem:[%s3200_s1 + $0x868] sm:$0xff]  ;;  %v381_v47 = vld [vmem:[%s3200_s1 + $0x8f0] sm:$0xff] }
  0x7b   :  { %748 = vmatmul.f32.gmra.mxu1 %v54_v48  ;;  %800 = vmatmul.f32.gmra.mxu3 %v56_v49  ;;  %v396_v48 = vld [vmem:[%s3200_s1 + $0x968] sm:$0xff]  ;;  %v413_v49 = vld [vmem:[%s3200_s1 + $0x9f0] sm:$0xff] }
  0x7c   :  { %812 = vmatpush.msrb.mxu0 %v297_v50  ;;  %837 = vmatpush.msrb.mxu1 %v314_v51  ;;  %v363_v50 = vld [vmem:[%s3200_s1 + $0x860] sm:$0xff]  ;;  %v380_v51 = vld [vmem:[%s3200_s1 + $0x8e8] sm:$0xff] }
  0x7d   :  { %864 = vmatpush.msrb.mxu2 %v329_v52  ;;  %889 = vmatpush.msrb.mxu3 %v346_v53  ;;  %v395_v52 = vld [vmem:[%s3200_s1 + $0x960] sm:$0xff]  ;;  %v412_v53 = vld [vmem:[%s3200_s1 + $0x9e8] sm:$0xff] }
  0x7e   :  { %813 = vmatpush.msrb.mxu0 %v296_v54  ;;  %838 = vmatpush.msrb.mxu1 %v313_v55  ;;  %v57_v54 = vld [vmem:[%s3201_s0 + $0x128] sm:$0xff]  ;;  %v59_v55 = vld [vmem:[%s3201_s0 + $0x138] sm:$0xff] }
  0x7f   :  { %865 = vmatpush.msrb.mxu2 %v328_v56  ;;  %890 = vmatpush.msrb.mxu3 %v345_v57  ;;  %v362_v56 = vld [vmem:[%s3200_s1 + $0x858] sm:$0xff]  ;;  %v379_v57 = vld [vmem:[%s3200_s1 + $0x8e0] sm:$0xff] }
  0x80   :  { %814 = vmatpush.msrb.mxu0 %v295_v58  ;;  %839 = vmatpush.msrb.mxu1 %v312_v59  ;;  %v394_v58 = vld [vmem:[%s3200_s1 + $0x958] sm:$0xff]  ;;  %v411_v59 = vld [vmem:[%s3200_s1 + $0x9e0] sm:$0xff] }
  0x81   :  { %866 = vmatpush.msrb.mxu2 %v327_v60  ;;  %891 = vmatpush.msrb.mxu3 %v344_v61  ;;  %v58_v60 = vld [vmem:[%s3201_s0 + $0x130] sm:$0xff]  ;;  %v60_v61 = vld [vmem:[%s3201_s0 + $0x140] sm:$0xff] }
  0x82   :  { %725 = vmatmul.f32.gmra.mxu0 %v78_v62  ;;  %777 = vmatmul.f32.gmra.mxu2 %v80_v63  ;;  %v361_v62 = vld [vmem:[%s3200_s1 + $0x850] sm:$0xff]  ;;  %v378_v63 = vld [vmem:[%s3200_s1 + $0x8d8] sm:$0xff] }
  0x83   :  { %815 = vmatpush.msrb.mxu0 %v294_v0  ;;  %840 = vmatpush.msrb.mxu1 %v311_v1  ;;  %v393_v0 = vld [vmem:[%s3200_s1 + $0x950] sm:$0xff]  ;;  %v410_v1 = vld [vmem:[%s3200_s1 + $0x9d8] sm:$0xff] }
  0x84   :  { %867 = vmatpush.msrb.mxu2 %v326_v2  ;;  %892 = vmatpush.msrb.mxu3 %v343_v3  ;;  %v360_v2 = vld [vmem:[%s3200_s1 + $0x848] sm:$0xff]  ;;  %v377_v3 = vld [vmem:[%s3200_s1 + $0x8d0] sm:$0xff] }
  0x85   :  { %751 = vmatmul.f32.gmra.mxu1 %v79_v4  ;;  %803 = vmatmul.f32.gmra.mxu3 %v81_v5  ;;  %v392_v4 = vld [vmem:[%s3200_s1 + $0x948] sm:$0xff]  ;;  %v409_v5 = vld [vmem:[%s3200_s1 + $0x9d0] sm:$0xff] }
  0x86   :  { %816 = vmatpush.msrb.mxu0 %v293_v6  ;;  %841 = vmatpush.msrb.mxu1 %v310_v7  ;;  %v359_v6 = vld [vmem:[%s3200_s1 + $0x840] sm:$0xff]  ;;  %v376_v7 = vld [vmem:[%s3200_s1 + $0x8c8] sm:$0xff] }
  0x87   :  { %868 = vmatpush.msrb.mxu2 %v325_v8  ;;  %893 = vmatpush.msrb.mxu3 %v342_v9  ;;  %v391_v8 = vld [vmem:[%s3200_s1 + $0x940] sm:$0xff]  ;;  %v408_v9 = vld [vmem:[%s3200_s1 + $0x9c8] sm:$0xff] }
  0x88   :  { %817 = vmatpush.msrb.mxu0 %v292_v10  ;;  %842 = vmatpush.msrb.mxu1 %v309_v11  ;;  %v82_v10 = vld [vmem:[%s3201_s0 + $0x1f0] sm:$0x3]  ;;  %v84_v11 = vld [vmem:[%s3201_s0 + $0x200] sm:$0x3] }
  0x89   :  { %869 = vmatpush.msrb.mxu2 %v324_v12  ;;  %894 = vmatpush.msrb.mxu3 %v341_v13  ;;  %v358_v12 = vld [vmem:[%s3200_s1 + $0x838] sm:$0xff]  ;;  %v375_v13 = vld [vmem:[%s3200_s1 + $0x8c0] sm:$0xff] }
  0x8a   :  { %818 = vmatpush.msrb.mxu0 %v291_v14  ;;  %843 = vmatpush.msrb.mxu1 %v308_v15  ;;  %v390_v14 = vld [vmem:[%s3200_s1 + $0x938] sm:$0xff]  ;;  %v407_v15 = vld [vmem:[%s3200_s1 + $0x9c0] sm:$0xff] }
  0x8b   :  { %870 = vmatpush.msrb.mxu2 %v323_v16  ;;  %895 = vmatpush.msrb.mxu3 %v340_v17  ;;  %v83_v16 = vld [vmem:[%s3201_s0 + $0x1f8] sm:$0x3]  ;;  %v85_v17 = vld [vmem:[%s3201_s0 + $0x208] sm:$0x3] }
  0x8c   :  { %819 = vmatpush.msrb.mxu0 %v290_v18  ;;  %844 = vmatpush.msrb.mxu1 %v307_v19  ;;  %v357_v18 = vld [vmem:[%s3200_s1 + $0x830] sm:$0xff]  ;;  %v374_v19 = vld [vmem:[%s3200_s1 + $0x8b8] sm:$0xff] }
  0x8d   :  { %871 = vmatpush.msrb.mxu2 %v322_v20  ;;  %896 = vmatpush.msrb.mxu3 %v339_v21  ;;  %v389_v20 = vld [vmem:[%s3200_s1 + $0x930] sm:$0xff]  ;;  %v406_v21 = vld [vmem:[%s3200_s1 + $0x9b8] sm:$0xff] }
  0x8e   :  { %820 = vmatpush.msrb.mxu0 %v289_v22  ;;  %845 = vmatpush.msrb.mxu1 %v306_v23  ;;  %v356_v22 = vld [vmem:[%s3200_s1 + $0x828] sm:$0xff]  ;;  %v373_v23 = vld [vmem:[%s3200_s1 + $0x8b0] sm:$0xff] }
  0x8f   :  { %872 = vmatpush.msrb.mxu2 %v321_v24  ;;  %897 = vmatpush.msrb.mxu3 %v338_v25  ;;  %v388_v24 = vld [vmem:[%s3200_s1 + $0x928] sm:$0xff]  ;;  %v405_v25 = vld [vmem:[%s3200_s1 + $0x9b0] sm:$0xff] }
  0x90   :  { %821 = vmatpush.msrb.mxu0 %v288_v26  ;;  %846 = vmatpush.msrb.mxu1 %v305_v27  ;;  %v355_v26 = vld [vmem:[%s3200_s1 + $0x820] sm:$0xff]  ;;  %v372_v27 = vld [vmem:[%s3200_s1 + $0x8a8] sm:$0xff] }
  0x91   :  { %873 = vmatpush.msrb.mxu2 %v320_v28  ;;  %898 = vmatpush.msrb.mxu3 %v337_v29  ;;  %v387_v29 = vld [vmem:[%s3200_s1 + $0x920] sm:$0xff] }
  0x92   :  { %822 = vmatpush.msrb.mxu0 %v287_v30  ;;  %847 = vmatpush.msrb.mxu1 %v304_v31  ;;  %v404_v30 = vld [vmem:[%s3200_s1 + $0x9a8] sm:$0xff]  ;;  %v354_v31 = vld [vmem:[%s3200_s1 + $0x818] sm:$0xff] }
  0x93   :  { %874 = vmatpush.msrb.mxu2 %v319_v32  ;;  %899 = vmatpush.msrb.mxu3 %v336_v33  ;;  %v371_v32 = vld [vmem:[%s3200_s1 + $0x8a0] sm:$0xff]  ;;  %v386_v33 = vld [vmem:[%s3200_s1 + $0x918] sm:$0xff] }
  0x94   :  { %823 = vmatmul.f32.vlgmr.msrb.gmra.mxu0 %v32_v34  ;;  %875 = vmatmul.f32.vlgmr.msrb.gmra.mxu2 %v34_v35  ;;  %v403_v34 = vld [vmem:[%s3200_s1 + $0x9a0] sm:$0xff] }
  0x95   :  { %911 = vmatpush.msra.mxu0 %v366_v36  ;;  %963 = vmatpush.msra.mxu2 %v398_v37  ;;  %v353_v36 = vld [vmem:[%s3200_s1 + $0x810] sm:$0xff]  ;;  %v370_v37 = vld [vmem:[%s3200_s1 + $0x898] sm:$0xff] }
  0x96   :  { %848 = vmatpush.msrb.mxu1 %v303_v38  ;;  %900 = vmatpush.msrb.mxu3 %v335_v39 }
  0x97   :  { %849 = vmatmul.f32.vlgmr.msrb.gmra.mxu1 %v33_v40  ;;  %901 = vmatmul.f32.vlgmr.msrb.gmra.mxu3 %v35_v41  ;;  %v385_v40 = vld [vmem:[%s3200_s1 + $0x910] sm:$0xff]  ;;  %v402_v41 = vld [vmem:[%s3200_s1 + $0x998] sm:$0xff] }
  0x98   :  { %912 = vmatpush.msra.mxu0 %v365_v42  ;;  %937 = vmatpush.msra.mxu1 %v382_v43  ;;  %v352_v42 = vld [vmem:[%s3200_s1 + $0x808] sm:$0xff]  ;;  %v369_v43 = vld [vmem:[%s3200_s1 + $0x890] sm:$0xff] }
  0x99   :  { %964 = vmatpush.msra.mxu2 %v397_v44  ;;  %989 = vmatpush.msra.mxu3 %v414_v45  ;;  %v384_v45 = vld [vmem:[%s3200_s1 + $0x908] sm:$0xff] }
  0x9a   :  { %913 = vmatpush.msra.mxu0 %v364_v46  ;;  %938 = vmatpush.msra.mxu1 %v381_v47  ;;  %v401_v46 = vld [vmem:[%s3200_s1 + $0x990] sm:$0xff] }
  0x9b   :  { %965 = vmatpush.msra.mxu2 %v396_v48  ;;  %990 = vmatpush.msra.mxu3 %v413_v49  ;;  %v351_v48 = vld [vmem:[%s3200_s1 + $0x800] sm:$0xff]  ;;  %v368_v49 = vld [vmem:[%s3200_s1 + $0x888] sm:$0xff] }
  0x9c   :  { %914 = vmatpush.msra.mxu0 %v363_v50  ;;  %939 = vmatpush.msra.mxu1 %v380_v51  ;;  %v383_v51 = vld [vmem:[%s3200_s1 + $0x900] sm:$0xff] }
  0x9d   :  { %966 = vmatpush.msra.mxu2 %v395_v52  ;;  %991 = vmatpush.msra.mxu3 %v412_v53  ;;  %v400_v52 = vld [vmem:[%s3200_s1 + $0x988] sm:$0xff]  ;;  %v36_v53 = vld [vmem:[%s3201_s0 + $0x80] sm:$0xff] }
  0x9e   :  { %826 = vmatmul.f32.gmra.mxu0 %v57_v54  ;;  %878 = vmatmul.f32.gmra.mxu2 %v59_v55  ;;  %v38_v54 = vld [vmem:[%s3201_s0 + $0x90] sm:$0xff] }
  0x9f   :  { %915 = vmatpush.msra.mxu0 %v362_v56  ;;  %940 = vmatpush.msra.mxu1 %v379_v57  ;;  %v430_v56 = vld [vmem:[%s3200_s1 + $0xa78] sm:$0xff] }
  0xa0   :  { %967 = vmatpush.msra.mxu2 %v394_v58  ;;  %992 = vmatpush.msra.mxu3 %v411_v59  ;;  %v462_v57 = vld [vmem:[%s3200_s1 + $0xb78] sm:$0xff]  ;;  %v367_v58 = vld [vmem:[%s3200_s1 + $0x880] sm:$0xff] }
  0xa1   :  { %852 = vmatmul.f32.gmra.mxu1 %v58_v60  ;;  %904 = vmatmul.f32.gmra.mxu3 %v60_v61  ;;  %v399_v59 = vld [vmem:[%s3200_s1 + $0x980] sm:$0xff]  ;;  %v37_v60 = vld [vmem:[%s3201_s0 + $0x88] sm:$0xff]  ;;  %v39_v61 = vld [vmem:[%s3201_s0 + $0x98] sm:$0xff] }
  0xa2   :  { %916 = vmatpush.msra.mxu0 %v361_v62  ;;  %941 = vmatpush.msra.mxu1 %v378_v63  ;;  %v429_v63 = vld [vmem:[%s3200_s1 + $0xa70] sm:$0xff] }
  0xa3   :  { %968 = vmatpush.msra.mxu2 %v393_v0  ;;  %993 = vmatpush.msra.mxu3 %v410_v1  ;;  %v446_v0 = vld [vmem:[%s3200_s1 + $0xaf8] sm:$0xff] }
  0xa4   :  { %917 = vmatpush.msra.mxu0 %v360_v2  ;;  %942 = vmatpush.msra.mxu1 %v377_v3  ;;  %v461_v3 = vld [vmem:[%s3200_s1 + $0xb70] sm:$0xff] }
  0xa5   :  { %969 = vmatpush.msra.mxu2 %v392_v4  ;;  %994 = vmatpush.msra.mxu3 %v409_v5  ;;  %v478_v4 = vld [vmem:[%s3200_s1 + $0xbf8] sm:$0xff]  ;;  %v428_v5 = vld [vmem:[%s3200_s1 + $0xa68] sm:$0xff] }
  0xa6   :  { %918 = vmatpush.msra.mxu0 %v359_v6  ;;  %943 = vmatpush.msra.mxu1 %v376_v7  ;;  %v445_v6 = vld [vmem:[%s3200_s1 + $0xaf0] sm:$0xff] }
  0xa7   :  { %970 = vmatpush.msra.mxu2 %v391_v8  ;;  %995 = vmatpush.msra.mxu3 %v408_v9  ;;  %v460_v8 = vld [vmem:[%s3200_s1 + $0xb68] sm:$0xff]  ;;  %v477_v9 = vld [vmem:[%s3200_s1 + $0xbf0] sm:$0xff] }
  0xa8   :  { %829 = vmatmul.f32.gmra.mxu0 %v82_v10  ;;  %881 = vmatmul.f32.gmra.mxu2 %v84_v11  ;;  %v427_v11 = vld [vmem:[%s3200_s1 + $0xa60] sm:$0xff] }
  0xa9   :  { %919 = vmatpush.msra.mxu0 %v358_v12  ;;  %944 = vmatpush.msra.mxu1 %v375_v13  ;;  %v444_v12 = vld [vmem:[%s3200_s1 + $0xae8] sm:$0xff] }
  0xaa   :  { %971 = vmatpush.msra.mxu2 %v390_v14  ;;  %996 = vmatpush.msra.mxu3 %v407_v15  ;;  %v459_v14 = vld [vmem:[%s3200_s1 + $0xb60] sm:$0xff]  ;;  %v476_v15 = vld [vmem:[%s3200_s1 + $0xbe8] sm:$0xff] }
  0xab   :  { %855 = vmatmul.f32.gmra.mxu1 %v83_v16  ;;  %907 = vmatmul.f32.gmra.mxu3 %v85_v17  ;;  %v61_v16 = vld [vmem:[%s3201_s0 + $0x148] sm:$0xff]  ;;  %v63_v17 = vld [vmem:[%s3201_s0 + $0x158] sm:$0xff] }
  0xac   :  { %920 = vmatpush.msra.mxu0 %v357_v18  ;;  %945 = vmatpush.msra.mxu1 %v374_v19  ;;  %v426_v19 = vld [vmem:[%s3200_s1 + $0xa58] sm:$0xff] }
  0xad   :  { %972 = vmatpush.msra.mxu2 %v389_v20  ;;  %997 = vmatpush.msra.mxu3 %v406_v21  ;;  %v512_v28 = vpop.f32.mrf.mxu0  ;;  %v443_v20 = vld [vmem:[%s3200_s1 + $0xae0] sm:$0xff]  ;;  %v458_v21 = vld [vmem:[%s3200_s1 + $0xb58] sm:$0xff] }
  0xae   :  { %921 = vmatpush.msra.mxu0 %v356_v22  ;;  %946 = vmatpush.msra.mxu1 %v373_v23  ;;  %v475_v22 = vld [vmem:[%s3200_s1 + $0xbe0] sm:$0xff]  ;;  %v62_v23 = vld [vmem:[%s3201_s0 + $0x150] sm:$0xff] }
  0xaf   :  { %973 = vmatpush.msra.mxu2 %v388_v24  ;;  %998 = vmatpush.msra.mxu3 %v405_v25  ;;  %v64_v24 = vld [vmem:[%s3201_s0 + $0x160] sm:$0xff] }
  0xb0   :  { %922 = vmatpush.msra.mxu0 %v355_v26  ;;  %947 = vmatpush.msra.mxu1 %v372_v27  ;;  %v538_v35 = vpop.f32.mrf.mxu1  ;;  %v425_v26 = vld [vmem:[%s3200_s1 + $0xa50] sm:$0xff]  ;;  %v442_v27 = vld [vmem:[%s3200_s1 + $0xad8] sm:$0xff] }
  0xb1   :  { %974 = vmatpush.msra.mxu2 %v387_v29  ;;  %999 = vmatpush.msra.mxu3 %v404_v30  ;;  %v539_v38 = vadd.f32 %v538_v35, %v512_v28  ;;  %v564_v39 = vpop.f32.mrf.mxu2  ;;  %v457_v30 = vld [vmem:[%s3200_s1 + $0xb50] sm:$0xff]  ;;  %v456_v35 = vld [vmem:[%s3200_s1 + $0xb48] sm:$0xff] }
  0xb2   :  { %923 = vmatpush.msra.mxu0 %v354_v31  ;;  %948 = vmatpush.msra.mxu1 %v371_v32  ;;  %v474_v31 = vld [vmem:[%s3200_s1 + $0xbd8] sm:$0xff]  ;;  %v424_v32 = vld [vmem:[%s3200_s1 + $0xa48] sm:$0xff] }
  0xb3   :  { %975 = vmatpush.msra.mxu2 %v386_v33  ;;  %1000 = vmatpush.msra.mxu3 %v403_v34  ;;  %v565_v44 = vadd.f32 %v564_v39, %v539_v38  ;;  %v441_v33 = vld [vmem:[%s3200_s1 + $0xad0] sm:$0xff]  ;;  %v423_v38 = vld [vmem:[%s3200_s1 + $0xa40] sm:$0xff]  ;;  %v440_v39 = vld [vmem:[%s3200_s1 + $0xac8] sm:$0xff] }
  0xb4   :  { %924 = vmatpush.msra.mxu0 %v353_v36  ;;  %949 = vmatpush.msra.mxu1 %v370_v37  ;;  %v590_v47 = vpop.f32.mrf.mxu3  ;;  %v473_v36 = vld [vmem:[%s3200_s1 + $0xbd0] sm:$0xff] }
  0xb5   :  { %976 = vmatpush.msra.mxu2 %v385_v40  ;;  %1001 = vmatpush.msra.mxu3 %v402_v41  ;;  %v2685_v50 = vadd.f32 %v590_v47, %v565_v44  ;;  %v455_v41 = vld [vmem:[%s3200_s1 + $0xb40] sm:$0xff] }
  0xb6   :  { %925 = vmatpush.msra.mxu0 %v352_v42  ;;  %950 = vmatpush.msra.mxu1 %v369_v43  ;;  %v472_v42 = vld [vmem:[%s3200_s1 + $0xbc8] sm:$0xff]  ;;  %v86_v43 = vld [vmem:[%s3201_s0 + $0x210] sm:$0x3]  ;;  %v88_v44 = vld [vmem:[%s3201_s0 + $0x220] sm:$0x3] }
  0xb7   :  { %977 = vmatpush.msra.mxu2 %v384_v45  ;;  %1002 = vmatpush.msra.mxu3 %v401_v46  ;;  %v515_v55 = vpop.f32.mrf.mxu0  ;;  %v422_v46 = vld [vmem:[%s3200_s1 + $0xa38] sm:$0xff]  ;;  %v439_v47 = vld [vmem:[%s3200_s1 + $0xac0] sm:$0xff] }
  0xb8   :  { %926 = vmatpush.msra.mxu0 %v351_v48  ;;  %951 = vmatpush.msra.mxu1 %v368_v49  ;;  %v454_v49 = vld [vmem:[%s3200_s1 + $0xb38] sm:$0xff] }
  0xb9   :  { %978 = vmatpush.msra.mxu2 %v383_v51  ;;  %1003 = vmatpush.msra.mxu3 %v400_v52  ;;  %v471_v51 = vld [vmem:[%s3200_s1 + $0xbc0] sm:$0xff]  ;;  %v87_v52 = vld [vmem:[%s3201_s0 + $0x218] sm:$0x3] }
  0xba   :  { %927 = vmatmul.f32.vlgmr.msra.gmra.mxu0 %v36_v53  ;;  %979 = vmatmul.f32.vlgmr.msra.gmra.mxu2 %v38_v54  ;;  %v541_v62 = vpop.f32.mrf.mxu1  ;;  %v421_v54 = vld [vmem:[%s3200_s1 + $0xa30] sm:$0xff] }
  0xbb   :  { %1015 = vmatpush.msrb.mxu0 %v430_v56  ;;  %1067 = vmatpush.msrb.mxu2 %v462_v57  ;;  %v542_v1 = vadd.f32 %v541_v62, %v515_v55  ;;  %v567_v2 = vpop.f32.mrf.mxu2  ;;  %v438_v55 = vld [vmem:[%s3200_s1 + $0xab8] sm:$0xff] }
  0xbc   :  { %952 = vmatpush.msra.mxu1 %v367_v58  ;;  %1004 = vmatpush.msra.mxu3 %v399_v59  ;;  %v453_v58 = vld [vmem:[%s3200_s1 + $0xb30] sm:$0xff]  ;;  %v470_v59 = vld [vmem:[%s3200_s1 + $0xbb8] sm:$0xff] }
  0xbd   :  { %953 = vmatmul.f32.vlgmr.msra.gmra.mxu1 %v37_v60  ;;  %1005 = vmatmul.f32.vlgmr.msra.gmra.mxu3 %v39_v61  ;;  %v568_v7 = vadd.f32 %v567_v2, %v542_v1  ;;  %v420_v60 = vld [vmem:[%s3200_s1 + $0xa28] sm:$0xff]  ;;  %v437_v61 = vld [vmem:[%s3200_s1 + $0xab0] sm:$0xff]  ;;  %v419_v2 = vld [vmem:[%s3200_s1 + $0xa20] sm:$0xff] }
  0xbe   :  { %1016 = vmatpush.msrb.mxu0 %v429_v63  ;;  %1041 = vmatpush.msrb.mxu1 %v446_v0  ;;  %v593_v10 = vpop.f32.mrf.mxu3  ;;  %v452_v63 = vld [vmem:[%s3200_s1 + $0xb28] sm:$0xff]  ;;  %v469_v0 = vld [vmem:[%s3200_s1 + $0xbb0] sm:$0xff] }
  0xbf   :  { %1068 = vmatpush.msrb.mxu2 %v461_v3  ;;  %1093 = vmatpush.msrb.mxu3 %v478_v4  ;;  %v2747_v13 = vadd.f32 %v593_v10, %v568_v7  ;;  %v436_v3 = vld [vmem:[%s3200_s1 + $0xaa8] sm:$0xff]  ;;  %v418_v7 = vld [vmem:[%s3200_s1 + $0xa18] sm:$0xff]  ;;  %v467_v10 = vld [vmem:[%s3200_s1 + $0xba0] sm:$0xff] }
  0xc0   :  { %1017 = vmatpush.msrb.mxu0 %v428_v5  ;;  %1042 = vmatpush.msrb.mxu1 %v445_v6  ;;  %v451_v5 = vld [vmem:[%s3200_s1 + $0xb20] sm:$0xff]  ;;  %v468_v6 = vld [vmem:[%s3200_s1 + $0xba8] sm:$0xff] }
  0xc1   :  { %1069 = vmatpush.msrb.mxu2 %v460_v8  ;;  %1094 = vmatpush.msrb.mxu3 %v477_v9  ;;  %v518_v18 = vpop.f32.mrf.mxu0  ;;  %v435_v8 = vld [vmem:[%s3200_s1 + $0xaa0] sm:$0xff]  ;;  %v450_v9 = vld [vmem:[%s3200_s1 + $0xb18] sm:$0xff] }
  0xc2   :  { %1018 = vmatpush.msrb.mxu0 %v427_v11  ;;  %1043 = vmatpush.msrb.mxu1 %v444_v12  ;;  %v417_v11 = vld [vmem:[%s3200_s1 + $0xa10] sm:$0xff]  ;;  %v434_v12 = vld [vmem:[%s3200_s1 + $0xa98] sm:$0xff] }
  0xc3   :  { %1070 = vmatpush.msrb.mxu2 %v459_v14  ;;  %1095 = vmatpush.msrb.mxu3 %v476_v15  ;;  %v449_v15 = vld [vmem:[%s3200_s1 + $0xb10] sm:$0xff] }
  0xc4   :  { %930 = vmatmul.f32.gmra.mxu0 %v61_v16  ;;  %982 = vmatmul.f32.gmra.mxu2 %v63_v17  ;;  %v544_v25 = vpop.f32.mrf.mxu1  ;;  %v466_v16 = vld [vmem:[%s3200_s1 + $0xb98] sm:$0xff] }
  0xc5   :  { %1019 = vmatpush.msrb.mxu0 %v426_v19  ;;  %1044 = vmatpush.msrb.mxu1 %v443_v20  ;;  %v545_v28 = vadd.f32 %v544_v25, %v518_v18  ;;  %v570_v29 = vpop.f32.mrf.mxu2  ;;  %v416_v18 = vld [vmem:[%s3200_s1 + $0xa08] sm:$0xff]  ;;  %v433_v19 = vld [vmem:[%s3200_s1 + $0xa90] sm:$0xff]  ;;  %v447_v25 = vld [vmem:[%s3200_s1 + $0xb00] sm:$0xff] }
  0xc6   :  { %1071 = vmatpush.msrb.mxu2 %v458_v21  ;;  %1096 = vmatpush.msrb.mxu3 %v475_v22  ;;  %v448_v20 = vld [vmem:[%s3200_s1 + $0xb08] sm:$0xff]  ;;  %v415_v22 = vld [vmem:[%s3200_s1 + $0xa00] sm:$0xff] }
  0xc7   :  { %956 = vmatmul.f32.gmra.mxu1 %v62_v23  ;;  %1008 = vmatmul.f32.gmra.mxu3 %v64_v24  ;;  %v571_v34 = vadd.f32 %v570_v29, %v545_v28  ;;  %v432_v23 = vld [vmem:[%s3200_s1 + $0xa88] sm:$0xff]  ;;  %v42_v28 = vld [vmem:[%s3201_s0 + $0xb0] sm:$0xff] }
  0xc8   :  { %1020 = vmatpush.msrb.mxu0 %v425_v26  ;;  %1045 = vmatpush.msrb.mxu1 %v442_v27  ;;  %v596_v37 = vpop.f32.mrf.mxu3  ;;  %v464_v26 = vld [vmem:[%s3200_s1 + $0xb88] sm:$0xff]  ;;  %v40_v27 = vld [vmem:[%s3201_s0 + $0xa0] sm:$0xff] }
  0xc9   :  { %1072 = vmatpush.msrb.mxu2 %v457_v30  ;;  %1097 = vmatpush.msrb.mxu3 %v474_v31  ;;  %v2809_v40 = vadd.f32 %v596_v37, %v571_v34  ;;  %v494_v30 = vld [vmem:[%s3200_s1 + $0xc78] sm:$0xff]  ;;  %v431_v31 = vld [vmem:[%s3200_s1 + $0xa80] sm:$0xff]  ;;  %v41_v34 = vld [vmem:[%s3201_s0 + $0xa8] sm:$0xff] }
  0xca   :  { %1021 = vmatpush.msrb.mxu0 %v424_v32  ;;  %1046 = vmatpush.msrb.mxu1 %v441_v33  ;;  %v463_v33 = vld [vmem:[%s3200_s1 + $0xb80] sm:$0xff] }
  0xcb   :  { %1073 = vmatpush.msrb.mxu2 %v456_v35  ;;  %1098 = vmatpush.msrb.mxu3 %v473_v36  ;;  %v616_v45 = vpop.f32.mrf.mxu0  ;;  %v43_v35 = vld [vmem:[%s3201_s0 + $0xb8] sm:$0xff]  ;;  %v493_v36 = vld [vmem:[%s3200_s1 + $0xc70] sm:$0xff] }
  0xcc   :  { %1022 = vmatpush.msrb.mxu0 %v423_v38  ;;  %1047 = vmatpush.msrb.mxu1 %v440_v39  ;;  %v617_v48 = vadd.f32 %v616_v45, %v2685_v50  ;;  %v89_v50 = vld [vmem:[%s3201_s0 + $0x228] sm:$0x3] }
  0xcd   :  { %1074 = vmatpush.msrb.mxu2 %v455_v41  ;;  %1099 = vmatpush.msrb.mxu3 %v472_v42  ;;  %v492_v41 = vld [vmem:[%s3200_s1 + $0xc68] sm:$0xff] }
  0xce   :  { %933 = vmatmul.f32.gmra.mxu0 %v86_v43  ;;  %985 = vmatmul.f32.gmra.mxu2 %v88_v44  ;;  %v642_v53 = vpop.f32.mrf.mxu1  ;;  %v491_v43 = vld [vmem:[%s3200_s1 + $0xc60] sm:$0xff]  ;;  %v65_v45 = vld [vmem:[%s3201_s0 + $0x168] sm:$0xff] }
  0xcf   :  { %1023 = vmatpush.msrb.mxu0 %v422_v46  ;;  %1048 = vmatpush.msrb.mxu1 %v439_v47  ;;  %v643_v56 = vadd.f32 %v642_v53, %v617_v48  ;;  %v668_v57 = vpop.f32.mrf.mxu2  ;;  %v67_v46 = vld [vmem:[%s3201_s0 + $0x178] sm:$0xff]  ;;  %v66_v48 = vld [vmem:[%s3201_s0 + $0x170] sm:$0xff]  ;;  %v488_v53 = vld [vmem:[%s3200_s1 + $0xc48] sm:$0xff] }
  0xd0   :  { %1075 = vmatpush.msrb.mxu2 %v454_v49  ;;  %1100 = vmatpush.msrb.mxu3 %v471_v51  ;;  %v68_v51 = vld [vmem:[%s3201_s0 + $0x180] sm:$0xff] }
  0xd1   :  { %959 = vmatmul.f32.gmra.mxu1 %v87_v52  ;;  %1011 = vmatmul.f32.gmra.mxu3 %v89_v50  ;;  %v669_v62 = vadd.f32 %v668_v57, %v643_v56  ;;  %v489_v52 = vld [vmem:[%s3200_s1 + $0xc50] sm:$0xff]  ;;  %v487_v57 = vld [vmem:[%s3200_s1 + $0xc40] sm:$0xff] }
  0xd2   :  { %1024 = vmatpush.msrb.mxu0 %v421_v54  ;;  %1049 = vmatpush.msrb.mxu1 %v438_v55  ;;  %v694_v1 = vpop.f32.mrf.mxu3 }
  0xd3   :  { %1076 = vmatpush.msrb.mxu2 %v453_v58  ;;  %1101 = vmatpush.msrb.mxu3 %v470_v59  ;;  %v2872_v4 = vadd.f32 %v694_v1, %v669_v62  ;;  %v90_v59 = vld [vmem:[%s3201_s0 + $0x230] sm:$0x3]  ;;  %v91_v62 = vld [vmem:[%s3201_s0 + $0x238] sm:$0x3]  ;;  %v484_v1 = vld [vmem:[%s3200_s1 + $0xc28] sm:$0xff] }
  0xd4   :  { %1025 = vmatpush.msrb.mxu0 %v420_v60  ;;  %1050 = vmatpush.msrb.mxu1 %v437_v61  ;;  %v92_v60 = vld [vmem:[%s3201_s0 + $0x240] sm:$0x3]  ;;  %v486_v61 = vld [vmem:[%s3200_s1 + $0xc38] sm:$0xff] }
  0xd5   :  { %1077 = vmatpush.msrb.mxu2 %v452_v63  ;;  %1102 = vmatpush.msrb.mxu3 %v469_v0  ;;  %v93_v63 = vld [vmem:[%s3201_s0 + $0x248] sm:$0x3]  ;;  %v485_v0 = vld [vmem:[%s3200_s1 + $0xc30] sm:$0xff] }
  0xd6   :  { %1026 = vmatpush.msrb.mxu0 %v419_v2  ;;  %1051 = vmatpush.msrb.mxu1 %v436_v3  ;;  %v483_v2 = vld [vmem:[%s3200_s1 + $0xc20] sm:$0xff] }
  0xd7   :  { %1078 = vmatpush.msrb.mxu2 %v451_v5  ;;  %1103 = vmatpush.msrb.mxu3 %v468_v6  ;;  %v619_v14 = vpop.f32.mrf.mxu0  ;;  %v481_v6 = vld [vmem:[%s3200_s1 + $0xc10] sm:$0xff] }
  0xd8   :  { %1027 = vmatpush.msrb.mxu0 %v418_v7  ;;  %1052 = vmatpush.msrb.mxu1 %v435_v8  ;;  %v620_v17 = vadd.f32 %v619_v14, %v2747_v13  ;;  %v465_v13 = vld [vmem:[%s3200_s1 + $0xb90] sm:$0xff]  ;;  %v480_v7 = vld [vmem:[%s3200_s1 + $0xc08] sm:$0xff]  ;;  %v479_v8 = vld [vmem:[%s3200_s1 + $0xc00] sm:$0xff] }
  0xd9   :  { %1079 = vmatpush.msrb.mxu2 %v450_v9  ;;  %1104 = vmatpush.msrb.mxu3 %v467_v10  ;;  %v44_v9 = vld [vmem:[%s3201_s0 + $0xc0] sm:$0xff]  ;;  %v94_v14 = vld [vmem:[%s3201_s0 + $0x250] sm:$0x3] }
  0xda   :  { %1028 = vmatpush.msrb.mxu0 %v417_v11  ;;  %1053 = vmatpush.msrb.mxu1 %v434_v12  ;;  %v645_v21 = vpop.f32.mrf.mxu1  ;;  %v69_v12 = vld [vmem:[%s3201_s0 + $0x188] sm:$0xff] }
  0xdb   :  { %1080 = vmatpush.msrb.mxu2 %v449_v15  ;;  %1105 = vmatpush.msrb.mxu3 %v466_v16  ;;  %v646_v24 = vadd.f32 %v645_v21, %v620_v17 }
  0xdc   :  { %1029 = vmatpush.msrb.mxu0 %v416_v18  ;;  %1054 = vmatpush.msrb.mxu1 %v433_v19 }
  0xdd   :  { %1081 = vmatpush.msrb.mxu2 %v448_v20  ;;  %1106 = vmatpush.msrb.mxu3 %v465_v13  ;;  %v671_v29 = vpop.f32.mrf.mxu2 }
  0xde   :  { %1030 = vmatpush.msrb.mxu0 %v415_v22  ;;  %1055 = vmatpush.msrb.mxu1 %v432_v23  ;;  %v672_v32 = vadd.f32 %v671_v29, %v646_v24 }
  0xdf   :  { %1082 = vmatpush.msrb.mxu2 %v447_v25  ;;  %1107 = vmatpush.msrb.mxu3 %v464_v26 }
  0xe0   :  { %1031 = vmatmul.f32.vlgmr.msrb.gmra.mxu0 %v40_v27  ;;  %1083 = vmatmul.f32.vlgmr.msrb.gmra.mxu2 %v42_v28  ;;  %v697_v37 = vpop.f32.mrf.mxu3 }
  0xe1   :  { %1119 = vmatpush.msra.mxu0 %v494_v30  ;;  %1056 = vmatpush.msrb.mxu1 %v431_v31  ;;  %v622_v38 = vpop.f32.mrf.mxu0  ;;  %v698_v39 = vadd.f32 %v697_v37, %v672_v32 }
  0xe2   :  { %1108 = vmatpush.msrb.mxu3 %v463_v33  ;;  %1057 = vmatmul.f32.vlgmr.msrb.gmra.mxu1 %v41_v34  ;;  %v623_v42 = vadd.f32 %v622_v38, %v2809_v40  ;;  %v490_v40 = vld [vmem:[%s3200_s1 + $0xc58] sm:$0xff] }
  0xe3   :  { %1109 = vmatmul.f32.vlgmr.msrb.gmra.mxu3 %v43_v35  ;;  %1120 = vmatpush.msra.mxu0 %v493_v36 }
  0xe4   :  { %v648_v44 = vpop.f32.mrf.mxu1 }
  0xe5   :  { %1121 = vmatpush.msra.mxu0 %v492_v41  ;;  %v649_v47 = vadd.f32 %v648_v44, %v623_v42 }
  0xe7   :  { %1122 = vmatpush.msra.mxu0 %v491_v43  ;;  %v674_v49 = vpop.f32.mrf.mxu2 }
  0xe8   :  { %1034 = vmatmul.f32.gmra.mxu0 %v65_v45  ;;  %1086 = vmatmul.f32.gmra.mxu2 %v67_v46  ;;  %v675_v50 = vadd.f32 %v674_v49, %v649_v47 }
  0xe9   :  { %1123 = vmatpush.msra.mxu0 %v490_v40 }
  0xea   :  { %1060 = vmatmul.f32.gmra.mxu1 %v66_v48  ;;  %v700_v54 = vpop.f32.mrf.mxu3 }
  0xeb   :  { %1112 = vmatmul.f32.gmra.mxu3 %v68_v51  ;;  %1124 = vmatpush.msra.mxu0 %v489_v52  ;;  %v701_v55 = vadd.f32 %v700_v54, %v675_v50  ;;  %v720_v56 = vpop.f32.mrf.mxu0 }
  0xec   :  { %v721_v58 = vadd.f32 %v720_v56, %v2872_v4  ;;  %v482_v4 = vld [vmem:[%s3200_s1 + $0xc18] sm:$0xff] }
  0xed   :  { %1125 = vmatpush.msra.mxu0 %v488_v53 }
  0xee   :  { %v746_v15 = vpop.f32.mrf.mxu1 }
  0xef   :  { %1126 = vmatpush.msra.mxu0 %v487_v57 }
  0xf0   :  { %1037 = vmatmul.f32.gmra.mxu0 %v90_v59  ;;  %1089 = vmatmul.f32.gmra.mxu2 %v92_v60 }
  0xf1   :  { %1127 = vmatpush.msra.mxu0 %v486_v61  ;;  %v772_v16 = vpop.f32.mrf.mxu2 }
  0xf2   :  { %1063 = vmatmul.f32.gmra.mxu1 %v91_v62 }
  0xf3   :  { %1115 = vmatmul.f32.gmra.mxu3 %v93_v63  ;;  %1128 = vmatpush.msra.mxu0 %v485_v0 }
  0xf4   :  { %v798_v17 = vpop.f32.mrf.mxu3 }
  0xf5   :  { %1129 = vmatpush.msra.mxu0 %v484_v1  ;;  %v723_v3 = vpop.f32.mrf.mxu0 }
  0xf6   :  { %v724_v5 = vadd.f32 %v723_v3, %v698_v39  ;;  %v747_v39 = vadd.f32 %v746_v15, %v721_v58 }
  0xf7   :  { %1130 = vmatpush.msra.mxu0 %v483_v2 }
  0xf8   :  { %v749_v18 = vpop.f32.mrf.mxu1  ;;  %v773_v41 = vadd.f32 %v772_v16, %v747_v39 }
  0xf9   :  { %1131 = vmatpush.msra.mxu0 %v482_v4  ;;  %v750_v44 = vadd.f32 %v749_v18, %v724_v5 }
  0xfa   :  { %v799_v45 = vadd.f32 %v798_v17, %v773_v41 }
  0xfb   :  { %1132 = vmatpush.msra.mxu0 %v481_v6  ;;  %v775_v19 = vpop.f32.mrf.mxu2 }
  0xfc   :  { %v776_v46 = vadd.f32 %v775_v19, %v750_v44 }
  0xfd   :  { %1133 = vmatpush.msra.mxu0 %v480_v7 }
  0xfe   :  { %v801_v13 = vpop.f32.mrf.mxu3 }
  0xff   :  { %1134 = vmatpush.msra.mxu0 %v479_v8  ;;  %v726_v10 = vpop.f32.mrf.mxu0  ;;  %v802_v49 = vadd.f32 %v801_v13, %v776_v46 }
 0x100   :  { %1135 = vmatmul.f32.vlgmr.msra.gmra.mxu0 %v44_v9  ;;  %v727_v11 = vadd.f32 %v726_v10, %v701_v55 }
 0x102   :  { %v752_v21 = vpop.f32.mrf.mxu1 }
 0x103   :  { %v753_v52 = vadd.f32 %v752_v21, %v727_v11 }
 0x105   :  { %v778_v22 = vpop.f32.mrf.mxu2 }
 0x106   :  { %v779_v55 = vadd.f32 %v778_v22, %v753_v52 }
 0x108   :  { %1138 = vmatmul.f32.gmra.mxu0 %v69_v12  ;;  %v804_v24 = vpop.f32.mrf.mxu3 }
 0x109   :  { %v805_v58 = vadd.f32 %v804_v24, %v779_v55 }
 0x110   :  { %1141 = vmatmul.f32.gmra.mxu0 %v94_v14 }
 0x111   :  { %v824_v20 = vpop.f32.mrf.mxu0 }
 0x112   :  { %v825_v40 = vadd.f32 %v824_v20, %v799_v45 }
 0x114   :  { %v850_v25 = vpop.f32.mrf.mxu1 }
 0x115   :  { %v851_v50 = vadd.f32 %v850_v25, %v825_v40 }
 0x117   :  { %v876_v26 = vpop.f32.mrf.mxu2 }
 0x118   :  { %v877_v56 = vadd.f32 %v876_v26, %v851_v50 }
 0x11a   :  { %v902_v27 = vpop.f32.mrf.mxu3 }
 0x11b   :  { %v827_v23 = vpop.f32.mrf.mxu0  ;;  %v903_v60 = vadd.f32 %v902_v27, %v877_v56 }
 0x11c   :  { %v828_v53 = vadd.f32 %v827_v23, %v802_v49 }
 0x11e   :  { %v853_v29 = vpop.f32.mrf.mxu1 }
 0x11f   :  { %v854_v57 = vadd.f32 %v853_v29, %v828_v53 }
 0x121   :  { %v879_v30 = vpop.f32.mrf.mxu2 }
 0x122   :  { %v880_v61 = vadd.f32 %v879_v30, %v854_v57 }
 0x124   :  { %v905_v32 = vpop.f32.mrf.mxu3 }
 0x125   :  { %v830_v28 = vpop.f32.mrf.mxu0  ;;  %v906_v2 = vadd.f32 %v905_v32, %v880_v61 }
 0x126   :  { %v831_v63 = vadd.f32 %v830_v28, %v805_v58 }
 0x128   :  { %v856_v33 = vpop.f32.mrf.mxu1 }
 0x129   :  { %v857_v4 = vadd.f32 %v856_v33, %v831_v63 }
 0x12b   :  { %v882_v34 = vpop.f32.mrf.mxu2 }
 0x12c   :  { %v883_v8 = vadd.f32 %v882_v34, %v857_v4 }
 0x12e   :  { %v908_v36 = vpop.f32.mrf.mxu3 }
 0x12f   :  { %v909_v12 = vadd.f32 %v908_v36, %v883_v8 }
 0x137   :  { %v928_v31 = vpop.f32.mrf.mxu0 }
 0x138   :  { %v929_v0 = vadd.f32 %v928_v31, %v903_v60 }
 0x13a   :  { %v954_v37 = vpop.f32.mrf.mxu1 }
 0x13b   :  { %v955_v5 = vadd.f32 %v954_v37, %v929_v0 }
 0x13d   :  { %v980_v38 = vpop.f32.mrf.mxu2 }
 0x13e   :  { %v981_v9 = vadd.f32 %v980_v38, %v955_v5 }
 0x140   :  { %v1006_v42 = vpop.f32.mrf.mxu3 }
 0x141   :  { %v931_v35 = vpop.f32.mrf.mxu0  ;;  %v1007_v14 = vadd.f32 %v1006_v42, %v981_v9  ;;  %v1525_v9 = vld [vmem:[%s3202_s3 + $0x58] sm:$0xff] }
 0x142   :  { %v932_v6 = vadd.f32 %v931_v35, %v906_v2  ;;  %1278 = vmatpush.msra.mxu3 %v1525_v9  ;;  %v1542_v9 = vld [vmem:[%s3202_s3 + $0xc0] sm:$0xff] }
 0x144   :  { %v957_v47 = vpop.f32.mrf.mxu1 }
 0x145   :  { %v958_v11 = vadd.f32 %v957_v47, %v932_v6  ;;  %v1206_v6 = vld [vmem:[%s3202_s3 + $0x18] sm:$0xff] }
 0x146   :  { %1250 = vmatpush.msra.mxu2 %v1206_v6  ;;  %v1552_v6 = vld [vmem:[%s3202_s3 + $0x100] sm:$0xff] }
 0x147   :  { %v983_v48 = vpop.f32.mrf.mxu2 }
 0x148   :  { %v984_v15 = vadd.f32 %v983_v48, %v958_v11  ;;  %v1205_v11 = vld [vmem:[%s3202_s3 + $0x10] sm:$0xff] }
 0x149   :  { %1251 = vmatpush.msra.mxu2 %v1205_v11 }
 0x14a   :  { %v1009_v54 = vpop.f32.mrf.mxu3 }
 0x14b   :  { %v934_v43 = vpop.f32.mrf.mxu0  ;;  %v1010_v20 = vadd.f32 %v1009_v54, %v984_v15  ;;  %v1524_v15 = vld [vmem:[%s3202_s3 + $0x50] sm:$0xff] }
 0x14c   :  { %v935_v18 = vadd.f32 %v934_v43, %v909_v12  ;;  %1279 = vmatpush.msra.mxu3 %v1524_v15 }
 0x14e   :  { %v960_v59 = vpop.f32.mrf.mxu1 }
 0x14f   :  { %v961_v21 = vadd.f32 %v960_v59, %v935_v18 }
 0x151   :  { %v986_v62 = vpop.f32.mrf.mxu2 }
 0x152   :  { %v987_v25 = vadd.f32 %v986_v62, %v961_v21  ;;  %v1522_v21 = vld [vmem:[%s3202_s3 + $0x40] sm:$0xff] }
 0x154   :  { %v1012_v3 = vpop.f32.mrf.mxu3 }
 0x155   :  { %v1013_v30 = vadd.f32 %v1012_v3, %v987_v25  ;;  %v1534_v25 = vld [vmem:[%s3202_s3 + $0x90] sm:$0xff] }
 0x15d   :  { %v1032_v51 = vpop.f32.mrf.mxu0 }
 0x15e   :  { %v1033_v19 = vadd.f32 %v1032_v51, %v1007_v14 }
 0x15f   :  { %v1058_v7 = vpop.f32.mrf.mxu1 }
 0x160   :  { %v1059_v22 = vadd.f32 %v1058_v7, %v1033_v19  ;;  %v1523_v19 = vld [vmem:[%s3202_s3 + $0x48] sm:$0xff] }
 0x161   :  { %1280 = vmatpush.msra.mxu3 %v1523_v19 }
 0x163   :  { %v1084_v10 = vpop.f32.mrf.mxu2  ;;  %1281 = vmatpush.msra.mxu3 %v1522_v21 }
 0x164   :  { %v1085_v26 = vadd.f32 %v1084_v10, %v1059_v22  ;;  %v1519_v10 = vld [vmem:[%s3202_s3 + $0x38] sm:$0xff]  ;;  %v1516_v22 = vld [vmem:[%s3202_s3 + $0x20] sm:$0xff] }
 0x165   :  { %v1035_v1 = vpop.f32.mrf.mxu0  ;;  %1228 = vmatpush.msra.mxu1 %v1519_v10 }
 0x166   :  { %v1110_v16 = vpop.f32.mrf.mxu3  ;;  %v1036_v23 = vadd.f32 %v1035_v1, %v1010_v20  ;;  %v1517_v20 = vld [vmem:[%s3202_s3 + $0x28] sm:$0xff] }
 0x167   :  { %v1061_v13 = vpop.f32.mrf.mxu1  ;;  %v1111_v31 = vadd.f32 %v1110_v16, %v1085_v26  ;;  %v1518_v16 = vld [vmem:[%s3202_s3 + $0x30] sm:$0xff]  ;;  %v1540_v26 = vld [vmem:[%s3202_s3 + $0xb8] sm:$0xff] }
 0x168   :  { %v1062_v28 = vadd.f32 %v1061_v13, %v1036_v23  ;;  %1229 = vmatpush.msra.mxu1 %v1518_v16  ;;  %v1203_v13 = vld [vmem:[%s3202_s3] sm:$0xff]  ;;  %1365 = vmatpush.msrb.mxu3 %v1540_v26 }
 0x16a   :  { %1230 = vmatpush.msra.mxu1 %v1517_v20 }
 0x16b   :  { %v1087_v24 = vpop.f32.mrf.mxu2 }
 0x16c   :  { %v1088_v32 = vadd.f32 %v1087_v24, %v1062_v28  ;;  %v1535_v24 = vld [vmem:[%s3202_s3 + $0x98] sm:$0xff]  ;;  %1231 = vmatpush.msra.mxu1 %v1516_v22  ;;  %v1533_v28 = vld [vmem:[%s3202_s3 + $0x88] sm:$0xff] }
 0x16d   :  { %v1038_v17 = vpop.f32.mrf.mxu0 }
 0x16e   :  { %v1113_v29 = vpop.f32.mrf.mxu3  ;;  %v1039_v33 = vadd.f32 %v1038_v17, %v1013_v30  ;;  %v1204_v17 = vld [vmem:[%s3202_s3 + $0x8] sm:$0xff]  ;;  %v1529_v30 = vld [vmem:[%s3202_s3 + $0x70] sm:$0xff] }
 0x16f   :  { %v1064_v35 = vpop.f32.mrf.mxu1  ;;  %v1114_v36 = vadd.f32 %v1113_v29, %v1088_v32  ;;  %1252 = vmatpush.msra.mxu2 %v1204_v17  ;;  %v1539_v29 = vld [vmem:[%s3202_s3 + $0xb0] sm:$0xff]  ;;  %v1528_v32 = vld [vmem:[%s3202_s3 + $0x68] sm:$0xff] }
 0x170   :  { %v1065_v39 = vadd.f32 %v1064_v35, %v1039_v33  ;;  %1366 = vmatpush.msrb.mxu3 %v1539_v29  ;;  %v1532_v33 = vld [vmem:[%s3202_s3 + $0x80] sm:$0xff] }
 0x171   :  { %1253 = vmatpush.msra.mxu2 %v1203_v13 }
 0x173   :  { %v1090_v37 = vpop.f32.mrf.mxu2  ;;  %1336 = vmatpush.msrb.mxu2 %v1535_v24 }
 0x174   :  { %v1091_v43 = vadd.f32 %v1090_v37, %v1065_v39  ;;  %v1527_v37 = vld [vmem:[%s3202_s3 + $0x60] sm:$0xff] }
 0x175   :  { %1337 = vmatpush.msrb.mxu2 %v1534_v25 }
 0x176   :  { %v1116_v47 = vpop.f32.mrf.mxu3 }
 0x177   :  { %v1117_v52 = vadd.f32 %v1116_v47, %v1091_v43  ;;  %1338 = vmatpush.msrb.mxu2 %v1533_v28 }
 0x179   :  { %1339 = vmatpush.msrb.mxu2 %v1532_v33 }
 0x17d   :  { %v1136_v27 = vpop.f32.mrf.mxu0 }
 0x17e   :  { %v3030_v34 = vadd.f32 %v1136_v27, %v1111_v31  ;;  %v1530_v27 = vld [vmem:[%s3202_s3 + $0x78] sm:$0xff]  ;;  %v1538_v31 = vld [vmem:[%s3202_s3 + $0xa8] sm:$0xff] }
 0x17f   :  { %1307 = vmatpush.msrb.mxu1 %v1530_v27  ;;  %1367 = vmatpush.msrb.mxu3 %v1538_v31 }
 0x180   :  { %v1159_v41 = vmul.f32 %v3030_v34, %v3030_v34  ;;  %v1146_v44 = vsel %vm1145_vm0, %v3030_v34, 0.0 }
 0x181   :  { %1308 = vmatpush.msrb.mxu1 %v1529_v30 }
 0x182   :  { %v1162_v48 = vsel %vm1145_vm0, %v1159_v41, 0.0 }
 0x183   :  { %1309 = vmatpush.msrb.mxu1 %v1528_v32 }
 0x185   :  { %v1139_v38 = vpop.f32.mrf.mxu0  ;;  %1310 = vmatpush.msrb.mxu1 %v1527_v37 }
 0x186   :  { %v3034_v42 = vadd.f32 %v1139_v38, %v1114_v36  ;;  %v1537_v36 = vld [vmem:[%s3202_s3 + $0xa0] sm:$0xff] }
 0x187   :  { %1368 = vmatpush.msrb.mxu3 %v1537_v36 }
 0x188   :  { %v1147_v45 = vsel %vm1145_vm0, %v3034_v42, 0.0  ;;  %v1160_v46 = vmul.f32 %v3034_v42, %v3034_v42 }
 0x189   :  { %v1148_v40 = vadd.f32 %v1147_v45, %v1146_v44  ;;  %v1176_v44 = vld [vmem:[%s3203_s2] sm:$0x1] }
 0x18a   :  { %v1163_v49 = vsel %vm1145_vm0, %v1160_v46, 0.0 }
 0x18b   :  { %v1164_v51 = vadd.f32 %v1163_v49, %v1162_v48 }
 0x18d   :  { %v1142_v50 = vpop.f32.mrf.mxu0 }
 0x18e   :  { %v3044_v53 = vadd.f32 %v1142_v50, %v1117_v52 }
 0x190   :  { %v1150_v54 = vsel %vm1149_vm1, %v3044_v53, 0.0  ;;  %v1161_v55 = vmul.f32 %v3044_v53, %v3044_v53 }
 0x191   :  { %v1151_v56 = vadd.f32 %v1150_v54, %v1148_v40  ;;  %v1189_v40 = vld [vmem:[%s3203_s2 + $0x1] sm:$0x1] }
 0x192   :  { %v1165_v57 = vsel %vm1149_vm1, %v1161_v55, 0.0 }
 0x193   :  { %v1152_v59 = vrot.slane %v1151_v56, 4  ;;  %v1166_v58 = vadd.f32 %v1165_v57, %v1164_v51 }
 0x195   :  { %v1153_v60 = vadd.f32 %v1152_v59, %v1151_v56  ;;  %v1167_v61 = vrot.slane %v1166_v58, 4 }
 0x197   :  { %v1154_v62 = vrot.slane %v1153_v60, 2  ;;  %v1168_v63 = vadd.f32 %v1167_v61, %v1166_v58 }
 0x199   :  { %v1155_v0 = vadd.f32 %v1154_v62, %v1153_v60  ;;  %v1169_v1 = vrot.slane %v1168_v63, 2  ;;  %v1550_v60 = vld [vmem:[%s3202_s3 + $0xf8] sm:$0xff] }
 0x19b   :  { %v1156_v2 = vrot.slane %v1155_v0, 1  ;;  %v1170_v3 = vadd.f32 %v1169_v1, %v1168_v63  ;;  %v1548_v63 = vld [vmem:[%s3202_s3 + $0xe8] sm:$0xff]  ;;  %v1544_v1 = vld [vmem:[%s3202_s3 + $0xd0] sm:$0xff] }
 0x19d   :  { %v1157_v4 = vadd.f32 %v1156_v2, %v1155_v0  ;;  %v1171_v5 = vrot.slane %v1170_v3, 1  ;;  %v1554_v0 = vld [vmem:[%s3202_s3 + $0x110] sm:$0xff] }
 0x19f   :  { %v3054_v7 = vmul.f32 0.055555556, %v1157_v4  ;;  %v1172_v8 = vadd.f32 %v1171_v5, %v1170_v3  ;;  %v1547_v3 = vld [vmem:[%s3202_s3 + $0xe0] sm:$0xff]  ;;  %v1553_v4 = vld [vmem:[%s3202_s3 + $0x108] sm:$0xff] }
 0x1a0   :  { %v1543_v5 = vld [vmem:[%s3202_s3 + $0xc8] sm:$0xff] }
 0x1a1   :  { %v1173_v12 = vmul.f32 0.055555556, %v1172_v8  ;;  %v1174_v14 = vmul.f32 %v3054_v7, %v3054_v7 }
 0x1a3   :  { %v1175_v18 = vsub.f32 %v1173_v12, %v1174_v14 }
 0x1a5   :  { %v1177_v23 = vadd.f32 1e-05, %v1175_v18 }
 0x1a7   :  { %1559 = vrsqrt.f32 %v1177_v23  ;;  %vm1184_vm3 = vweird.f32 %v1177_v23 }
 0x1ad   :  { %v1560_v35 = vpop.eup %1559 }
 0x1ae   :  { %v1179_v38 = vmul.f32 %v1560_v35, %v1177_v23  ;;  %vm1185_vm2 = vweird.f32 %v1560_v35 }
 0x1af   :  { %vm1186_vm4 = vmor %vm1184_vm3, %vm1185_vm2 }
 0x1b0   :  { %v1180_v39 = vmul.f32 %v1560_v35, %v1179_v38 }
 0x1b2   :  { %v1181_v41 = vmul.f32 0.5, %v1180_v39 }
 0x1b4   :  { %v1182_v43 = vsub.f32 1.5, %v1181_v41 }
 0x1b6   :  { %v1183_v45 = vmul.f32 %v1560_v35, %v1182_v43 }
 0x1b8   :  { %v1187_v46 = vsel %vm1186_vm4, %v1560_v35, %v1183_v45 }
 0x1b9   :  { %v1188_v47 = vmul.f32 %v1187_v46, %v1176_v44 }
 0x1bb   :  { %v1190_v48 = vmul.f32 %v1188_v47, %v3054_v7  ;;  %v1192_v49 = vperm.slane %v1188_v47, 0 }
 0x1bd   :  { %v1191_v51 = vsub.f32 %v1189_v40, %v1190_v48  ;;  %v1193_v52 = vmul.f32 %v1192_v49, %v3030_v34  ;;  %v1194_v50 = vmul.f32 %v1192_v49, %v3034_v42  ;;  %v1195_v54 = vmul.f32 %v1192_v49, %v3044_v53  ;;  %v1549_v34 = vld [vmem:[%s3202_s3 + $0xf0] sm:$0xff]  ;;  %v1555_v42 = vld [vmem:[%s3202_s3 + $0x118] sm:$0xff] }
 0x1be   :  { %v1545_v53 = vld [vmem:[%s3202_s3 + $0xd8] sm:$0xff] }
 0x1bf   :  { %v1196_v55 = vperm.slane %v1191_v51, 0 }
 0x1c1   :  { %v1199_v56 = vadd.f32 %v1196_v55, %v1195_v54  ;;  %v1197_v57 = vadd.f32 %v1196_v55, %v1193_v52  ;;  %v1198_v59 = vadd.f32 %v1196_v55, %v1194_v50 }
 0x1c3   :  { %v1200_v58 = vmax.f32 %v1197_v57, 0.0  ;;  %v1201_v2 = vmax.f32 %v1198_v59, 0.0  ;;  %v1202_v11 = vmax.f32 %v1199_v56, 0.0  ;;  %v1480_v59 = vld [vmem:[%s3204_s4] sm:$0x1] }
 0x1c5   :  { %1521 = vmatmul.msk.f32.vlgmr.msra.gmra.mxu2 %vm1145_vm0, %v1200_v58  ;;  %v1213_v61 = vrot.slane %v1200_v58, 2  ;;  %v1263_v62 = vrot.slane %v1200_v58, 4  ;;  %v1292_v7 = vrot.slane %v1200_v58, 6  ;;  %v1350_v8 = vrot.slane %v1201_v2, 2 }
 0x1c6   :  { %1423 = vmatpush.msra.mxu2 %v1550_v60  ;;  %v1408_v10 = vrot.slane %v1201_v2, 6  ;;  %v1379_v12 = vrot.slane %v1201_v2, 4 }
 0x1c7   :  { %1520 = vmatmul.msk.f32.vlgmr.msra.gmra.mxu1 %vm1145_vm0, %v1213_v61  ;;  %1526 = vmatmul.msk.f32.vlgmr.msra.gmra.mxu3 %vm1145_vm0, %v1263_v62  ;;  %v1493_v62 = vld [vmem:[%s3204_s4 + $0x1] sm:$0x1] }
 0x1c8   :  { %1424 = vmatpush.msra.mxu2 %v1549_v34  ;;  %1452 = vmatpush.msra.mxu3 %v1555_v42 }
 0x1c9   :  { %1394 = vmatpush.msra.mxu1 %v1545_v53 }
 0x1ca   :  { %1425 = vmatpush.msra.mxu2 %v1548_v63  ;;  %1453 = vmatpush.msra.mxu3 %v1554_v0 }
 0x1cb   :  { %1395 = vmatpush.msra.mxu1 %v1544_v1 }
 0x1cc   :  { %1426 = vmatpush.msra.mxu2 %v1547_v3  ;;  %1454 = vmatpush.msra.mxu3 %v1553_v4 }
 0x1cd   :  { %1536 = vmatmul.msk.f32.vlgmr.msrb.gmra.mxu2 %vm1145_vm0, %v1201_v2  ;;  %1396 = vmatpush.msra.mxu1 %v1543_v5  ;;  %v1557_v2 = vld [vmem:[%s3204_s4 + $0x2] ss:$0 sm:$0xff] }
 0x1ce   :  { %1455 = vmatpush.msra.mxu3 %v1552_v6  ;;  %v1558_v6 = vld [vmem:[%s3204_s4 + $0x3] ss:$0 sm:$0xff] }
 0x1cf   :  { %1531 = vmatmul.msk.f32.vlgmr.msrb.gmra.mxu1 %vm1145_vm0, %v1292_v7  ;;  %1541 = vmatmul.msk.f32.vlgmr.msrb.gmra.mxu3 %vm1145_vm0, %v1350_v8 }
 0x1d0   :  { %1397 = vmatpush.msra.mxu1 %v1542_v9 }
 0x1d5   :  { %1551 = vmatmul.msk.f32.vlgmr.msra.gmra.mxu2 %vm1145_vm0, %v1408_v10 }
 0x1d7   :  { %1546 = vmatmul.msk.f32.vlgmr.msra.gmra.mxu1 %vm1145_vm0, %v1379_v12  ;;  %1556 = vmatmul.msk.f32.vlgmr.msra.gmra.mxu3 %vm1145_vm0, %v1202_v11 }
 0x244   :  { %v1233_v14 = vpop.f32.mrf.mxu1 }
 0x248   :  { %v1255_v15 = vpop.f32.mrf.mxu2 }
 0x249   :  { %v1256_v16 = vadd.f32 %v1255_v15, %v1233_v14 }
 0x24a   :  { %v1283_v17 = vpop.f32.mrf.mxu3 }
 0x24b   :  { %v1286_v18 = vadd.f32 %v1283_v17, %v1256_v16 }
 0x24c   :  { %v1312_v19 = vpop.f32.mrf.mxu1 }
 0x24d   :  { %v1315_v20 = vadd.f32 %v1312_v19, %v1286_v18 }
 0x250   :  { %v1341_v13 = vpop.f32.mrf.mxu2 }
 0x251   :  { %v1344_v21 = vadd.f32 %v1341_v13, %v1315_v20 }
 0x252   :  { %v1370_v22 = vpop.f32.mrf.mxu3 }
 0x253   :  { %v1373_v23 = vadd.f32 %v1370_v22, %v1344_v21 }
 0x254   :  { %v1399_v24 = vpop.f32.mrf.mxu1 }
 0x255   :  { %v1402_v25 = vadd.f32 %v1399_v24, %v1373_v23 }
 0x258   :  { %v1428_v26 = vpop.f32.mrf.mxu2 }
 0x259   :  { %v1431_v27 = vadd.f32 %v1428_v26, %v1402_v25 }
 0x25a   :  { %v1457_v28 = vpop.f32.mrf.mxu3 }
 0x25b   :  { %v1460_v29 = vadd.f32 %v1457_v28, %v1431_v27 }
 0x25d   :  { %v1461_v30 = vsel %vm1149_vm1, %v1460_v29, 0.0  ;;  %v1469_v31 = vmul.f32 %v1460_v29, %v1460_v29 }
 0x25e   :  { %v1462_v32 = vrot.slane %v1461_v30, 4 }
 0x25f   :  { %v1470_v33 = vsel %vm1149_vm1, %v1469_v31, 0.0 }
 0x260   :  { %v1463_v35 = vadd.f32 %v1462_v32, %v1461_v30  ;;  %v1471_v36 = vrot.slane %v1470_v33, 4 }
 0x262   :  { %v1464_v37 = vrot.slane %v1463_v35, 2  ;;  %v1472_v38 = vadd.f32 %v1471_v36, %v1470_v33 }
 0x264   :  { %v1465_v39 = vadd.f32 %v1464_v37, %v1463_v35  ;;  %v1473_v41 = vrot.slane %v1472_v38, 2 }
 0x266   :  { %v1466_v43 = vrot.slane %v1465_v39, 1  ;;  %v1474_v44 = vadd.f32 %v1473_v41, %v1472_v38 }
 0x268   :  { %v1467_v45 = vadd.f32 %v1466_v43, %v1465_v39  ;;  %v1475_v46 = vrot.slane %v1474_v44, 1 }
 0x26a   :  { %v1468_v47 = vmul.f32 0.5, %v1467_v45  ;;  %v1476_v40 = vadd.f32 %v1475_v46, %v1474_v44 }
 0x26c   :  { %v1477_v48 = vmul.f32 0.5, %v1476_v40  ;;  %v1478_v49 = vmul.f32 %v1468_v47, %v1468_v47 }
 0x26e   :  { %v1479_v51 = vsub.f32 %v1477_v48, %v1478_v49 }
 0x270   :  { %v1481_v52 = vadd.f32 1e-05, %v1479_v51 }
 0x272   :  { %1561 = vrsqrt.f32 %v1481_v52  ;;  %vm1488_vm6 = vweird.f32 %v1481_v52 }
 0x278   :  { %v1562_v50 = vpop.eup %1561 }
 0x279   :  { %v1483_v54 = vmul.f32 %v1562_v50, %v1481_v52  ;;  %vm1489_vm5 = vweird.f32 %v1562_v50 }
 0x27a   :  { %vm1490_vm7 = vmor %vm1488_vm6, %vm1489_vm5 }
 0x27b   :  { %v1484_v55 = vmul.f32 %v1562_v50, %v1483_v54 }
 0x27d   :  { %v1485_v56 = vmul.f32 0.5, %v1484_v55 }
 0x27f   :  { %v1486_v57 = vsub.f32 1.5, %v1485_v56 }
 0x281   :  { %v1487_v58 = vmul.f32 %v1562_v50, %v1486_v57 }
 0x283   :  { %v1491_v60 = vsel %vm1490_vm7, %v1562_v50, %v1487_v58 }
 0x284   :  { %v1492_v61 = vmul.f32 %v1491_v60, %v1480_v59 }
 0x286   :  { %v1496_v34 = vperm.slane %v1492_v61, 0  ;;  %v1494_v42 = vmul.f32 %v1492_v61, %v1468_v47 }
 0x288   :  { %v1495_v53 = vsub.f32 %v1493_v62, %v1494_v42  ;;  %v1497_v63 = vmul.f32 %v1496_v34, %v1460_v29 }
 0x28a   :  { %v1498_v0 = vperm.slane %v1495_v53, 0 }
 0x28c   :  { %v1499_v1 = vadd.f32 %v1498_v0, %v1497_v63 }
 0x28e   :  { %v1500_v3 = vmax.f32 %v1499_v1, 0.0 }
 0x290   :  { %v1503_v4 = vmul.f32 %v1557_v2, %v1500_v3 }
 0x292   :  { %v1504_v5 = vsel %vm1149_vm1, %v1503_v4, 0.0 }
 0x293   :  { %1505 = vadd.xlane.f32.xlu0 %v1504_v5 }
 0x306   :  { %v1506_v7 = vpop.xlane.xlu0 %1505 }
 0x307   :  { %v1509_v8 = vadd.f32 %v1558_v6, %v1506_v7 }
 0x309   :  { %1511 = vst.msk [vmem:[%s3205_s5] sm:$0x3] %vm1510_vm8, %v1509_v8 }

</bundles_post_ra>
